<compile_context>
chip_gen: v7x
topology: tpu7x:2x2x1
jax: 0.10.0
libtpu: 0.0.40
codegen_flags: <defaults>
</compile_context>

<pallas_src>
import functools

import jax
import jax.numpy as jnp
from jax.experimental import pallas as pl
from jax.experimental.pallas import tpu as pltpu

BN_EPS = 1e-5


# --------------------------------------------------------------------------
# VMEM budgeting / tile selection
# --------------------------------------------------------------------------
def _round_up(x, m):
    return ((x + m - 1) // m) * m


def _vmem_budget():
    """(vmem_limit_bytes, tiling_budget_bytes) per TPU generation.

    v5e/v6e have 128 MiB VMEM per core, v7x only 64 MiB.  Never hand the
    compiler the full physical size: cap ~48 MiB on v7x / ~96 MiB elsewhere
    and leave headroom below that for the working set.
    """
    phys = None
    try:
        info = pltpu.get_tpu_info()
        for attr in ("vmem_capacity_bytes", "vmem_bytes", "vmem_size_bytes"):
            v = getattr(info, attr, None)
            if isinstance(v, int) and v > 0:
                phys = v
                break
    except Exception:
        phys = None
    if phys is None:
        phys = 64 << 20                      # assume the smallest (v7x)
    vmem_limit = min((phys * 3) // 4, 96 << 20)
    budget = max(vmem_limit - (8 << 20), 16 << 20)
    return vmem_limit, budget


def _batch_tile_candidates(B):
    # tile_b must divide B and (unless == B) be a multiple of 8 so the
    # (tile_b, tile_c) output blocks stay sublane-aligned.
    cands = [B]
    b = 8
    while b < B:
        if B % b == 0:
            cands.append(b)
        b += 8
    return sorted(set(cands), reverse=True)


def _channel_tile_candidates(C):
    if C % 128 != 0:
        return [C]
    cands = []
    c = 128
    while c <= C:
        if C % c == 0:
            cands.append(c)
        c += 128
    return sorted(cands, reverse=True)


def _choose_tiles(B, C, HW_pad, x_bytes, budget, n_bc_outputs, n_vec_params):
    """Budget-aware (tile_b, tile_c, tile_hw) for the pooling kernels."""
    # Largest multiple-of-128 divisor of HW_pad, capped at 512 (>=512 already
    # sits near the HBM roofline; bigger only burns VMEM).
    tile_hw = 128
    t = 128
    while t <= min(HW_pad, 512):
        if HW_pad % t == 0:
            tile_hw = t
        t += 128

    def footprint(tb, tc):
        x_blk = 2 * tb * tc * tile_hw * x_bytes      # double-buffered x stream
        acc = tb * tc * 128 * 4                      # lane-partial accumulator
        outs = 2 * n_bc_outputs * tb * tc * 4        # (tb, tc) f32 outputs
        vecs = 2 * n_vec_params * tc * 4             # per-channel BN params
        return x_blk + acc + outs + vecs

    tb = tc = None
    for cb in _batch_tile_candidates(B):
        for cc in _channel_tile_candidates(C):
            if footprint(cb, cc) <= budget:
                tb, tc = cb, cc
                break
        if tb is not None:
            break
    if tb is None:                                   # fall back to smallest legal
        tb = _batch_tile_candidates(B)[-1]
        tc = _channel_tile_candidates(C)[-1]

    # Expose >=2 programs on the parallel axes so v7x's second TensorCore
    # has work (pooling / eval-BN are per-channel independent).
    while ((B // tb) * (C // tc) < 2 and tc > 128 and tc % 256 == 0
           and C % (tc // 2) == 0):
        tc //= 2
    return tb, tc, tile_hw


# --------------------------------------------------------------------------
# Kernels
# --------------------------------------------------------------------------
def _pool_kernel(inv_hw, n_chunks, x_ref, gfeat_ref, acc_ref):
    """Global average pool over the (zero-padded) HW axis.

    x block: (tile_b, tile_c, tile_hw) in the feature map's native dtype.
    Inner loop is VALU-only lane-chunk adds into a (tile_b, tile_c, 128) f32
    partial accumulator; the single XLU lane reduce + relayout happens once
    per (b, c) block at the last HW step.
    """
    k = pl.program_id(2)

    @pl.when(k == 0)
    def _():
        acc_ref[...] = jnp.zeros_like(acc_ref)

    xb = x_ref[...].astype(jnp.float32)
    acc = acc_ref[...]
    for ch in range(n_chunks):                       # static, small (<= 4)
        acc = acc + xb[:, :, ch * 128:(ch + 1) * 128]
    acc_ref[...] = acc

    @pl.when(k == pl.num_programs(2) - 1)
    def _():
        gfeat_ref[...] = jnp.sum(acc_ref[...], axis=-1) * inv_hw


def _pool_bn_eval_kernel(inv_hw, n_chunks,
                         x_ref, gamma_ref, beta_ref, mean_ref, var_ref,
                         feat_ref, acc_ref):
    """Eval: avg-pool + BatchNorm1d with running stats, fused (feat only)."""
    k = pl.program_id(2)

    @pl.when(k == 0)
    def _():
        acc_ref[...] = jnp.zeros_like(acc_ref)

    xb = x_ref[...].astype(jnp.float32)
    acc = acc_ref[...]
    for ch in range(n_chunks):
        acc = acc + xb[:, :, ch * 128:(ch + 1) * 128]
    acc_ref[...] = acc

    @pl.when(k == pl.num_programs(2) - 1)
    def _():
        gfeat = jnp.sum(acc_ref[...], axis=-1) * inv_hw
        inv_std = jax.lax.rsqrt(var_ref[...] + BN_EPS)
        feat_ref[...] = ((gfeat - mean_ref[...]) * inv_std * gamma_ref[...]
                         + beta_ref[...])


def _bn_cls_train_kernel(inv_b, use_bn,
                         gfeat_ref, gamma_ref, beta_ref, wcls_ref,
                         score_ref, feat_sc):
    """Training head: batch-stat BatchNorm1d + bias-free classifier matmul.

    Operands ((B, C) pooled features, (C, ncls) weight) are tiny relative to
    the feature map, so this is a separate small kernel tiled only over the
    class dim.  feat is cached as bf16 in VMEM scratch and reused for every
    class tile (bf16 x bf16 -> f32 MXU matmul).
    """
    j = pl.program_id(0)

    @pl.when(j == 0)
    def _():
        gf = gfeat_ref[...]
        if use_bn:
            mu = jnp.sum(gf, axis=0, keepdims=True) * inv_b
            centered = gf - mu
            var = jnp.sum(centered * centered, axis=0, keepdims=True) * inv_b
            inv_std = jax.lax.rsqrt(var + BN_EPS)
            feat = centered * inv_std * gamma_ref[...] + beta_ref[...]
        else:
            feat = gf
        feat_sc[...] = feat.astype(jnp.bfloat16)

    score_ref[...] = jnp.dot(feat_sc[...], wcls_ref[...],
                             preferred_element_type=jnp.float32)


# --------------------------------------------------------------------------
# Wrappers
# --------------------------------------------------------------------------
def _prep_pooled_input(x_feat_nchw):
    B, C, H, W = x_feat_nchw.shape
    HW = H * W
    HW_pad = _round_up(HW, 128)
    # Free NCHW -> (B, C, HW) reshape (contiguous).  Zero-pad HW to a lane
    # multiple so loads are (8,128)-aligned and the HW axis stays pipelined;
    # inv_hw uses the true HW, so padded zeros don't change the mean.
    x = x_feat_nchw.reshape(B, C, HW)
    if HW_pad != HW:
        x = jnp.pad(x, ((0, 0), (0, 0), (0, HW_pad - HW)))
    return x, B, C, HW, HW_pad


def global_avg_pool_pallas(x_feat_nchw):
    """adaptive_avg_pool2d(x, 1).view(B, -1) on the NCHW feature map."""
    x, B, C, HW, HW_pad = _prep_pooled_input(x_feat_nchw)
    vmem_limit, budget = _vmem_budget()
    tile_b, tile_c, tile_hw = _choose_tiles(
        B, C, HW_pad, x.dtype.itemsize, budget,
        n_bc_outputs=1, n_vec_params=0)
    n_chunks = tile_hw // 128
    grid = (B // tile_b, C // tile_c, HW_pad // tile_hw)

    kernel = functools.partial(_pool_kernel, 1.0 / float(HW), n_chunks)
    return pl.pallas_call(
        kernel,
        out_shape=jax.ShapeDtypeStruct((B, C), jnp.float32),
        grid=grid,
        in_specs=[pl.BlockSpec((tile_b, tile_c, tile_hw),
                               lambda b, c, k: (b, c, k))],
        out_specs=pl.BlockSpec((tile_b, tile_c), lambda b, c, k: (b, c)),
        scratch_shapes=[pltpu.VMEM((tile_b, tile_c, 128), jnp.float32)],
        compiler_params=pltpu.CompilerParams(
            dimension_semantics=("parallel", "parallel", "arbitrary"),
            vmem_limit_bytes=vmem_limit),
    )(x)


def pool_bn_eval_pallas(x_feat_nchw, params):
    """Eval path: fused avg-pool + bnneck (running-stat BatchNorm1d)."""
    x, B, C, HW, HW_pad = _prep_pooled_input(x_feat_nchw)
    vmem_limit, budget = _vmem_budget()
    tile_b, tile_c, tile_hw = _choose_tiles(
        B, C, HW_pad, x.dtype.itemsize, budget,
        n_bc_outputs=1, n_vec_params=4)
    n_chunks = tile_hw // 128
    grid = (B // tile_b, C // tile_c, HW_pad // tile_hw)

    gamma = params["bn_weight"].reshape(1, C).astype(jnp.float32)
    beta = params["bn_bias"].reshape(1, C).astype(jnp.float32)
    rmean = params["bn_running_mean"].reshape(1, C).astype(jnp.float32)
    rvar = params["bn_running_var"].reshape(1, C).astype(jnp.float32)

    vec_spec = pl.BlockSpec((1, tile_c), lambda b, c, k: (0, c))
    kernel = functools.partial(_pool_bn_eval_kernel, 1.0 / float(HW), n_chunks)
    return pl.pallas_call(
        kernel,
        out_shape=jax.ShapeDtypeStruct((B, C), jnp.float32),
        grid=grid,
        in_specs=[pl.BlockSpec((tile_b, tile_c, tile_hw),
                               lambda b, c, k: (b, c, k)),
                  vec_spec, vec_spec, vec_spec, vec_spec],
        out_specs=pl.BlockSpec((tile_b, tile_c), lambda b, c, k: (b, c)),
        scratch_shapes=[pltpu.VMEM((tile_b, tile_c, 128), jnp.float32)],
        compiler_params=pltpu.CompilerParams(
            dimension_semantics=("parallel", "parallel", "arbitrary"),
            vmem_limit_bytes=vmem_limit),
    )(x, gamma, beta, rmean, rvar)


def bn_classifier_train_pallas(gfeat, params, *, use_bn=True):
    """Training head on pooled features: batch-stat BN + classifier logits."""
    B, C = gfeat.shape
    wcls = params["classifier_w_t_pad"]              # (C, ncls_pad) bf16
    ncls_pad = wcls.shape[1]
    num_classes = params["classifier_w"].shape[0]

    tile_n = 128
    t = 128
    while t <= min(ncls_pad, 512):
        if ncls_pad % t == 0:
            tile_n = t
        t += 128
    grid = (ncls_pad // tile_n,)

    gamma = params["bn_weight"].reshape(1, C).astype(jnp.float32)
    beta = params["bn_bias"].reshape(1, C).astype(jnp.float32)

    vmem_limit, _ = _vmem_budget()
    kernel = functools.partial(_bn_cls_train_kernel, 1.0 / float(B), use_bn)
    score = pl.pallas_call(
        kernel,
        out_shape=jax.ShapeDtypeStruct((B, ncls_pad), jnp.float32),
        grid=grid,
        in_specs=[pl.BlockSpec((B, C), lambda j: (0, 0)),
                  pl.BlockSpec((1, C), lambda j: (0, 0)),
                  pl.BlockSpec((1, C), lambda j: (0, 0)),
                  pl.BlockSpec((C, tile_n), lambda j: (0, j))],
        out_specs=pl.BlockSpec((B, tile_n), lambda j: (0, j)),
        scratch_shapes=[pltpu.VMEM((B, C), jnp.bfloat16)],
        compiler_params=pltpu.CompilerParams(
            dimension_semantics=("arbitrary",),
            vmem_limit_bytes=vmem_limit),
    )(gfeat, gamma, beta, wcls)
    return score[:, :num_classes]


def backbone_forward(x_feat_nchw, params, *, training=False, neck="bnneck",
                     neck_feat="after", label=None, domains=None):
    """Mirrors Backbone.forward for the head part.

    # TODO(synk): self.base(x) runs upstream; x_feat_nchw is its NCHW output.
    """
    if training:
        global_feat = global_avg_pool_pallas(x_feat_nchw)
        cls_score = bn_classifier_train_pallas(
            global_feat, params, use_bn=(neck == "bnneck"))
        # TODO(synk): per-domain classifiers need a torch.nonzero-style
        # data-dependent gather over `domains`; not lowered to Pallas.
        # TODO(synk): BatchNorm1d running-stat momentum updates not emitted.
        cls_score_ = [None for _ in params.get("dom_classifiers", [])]
        return cls_score, global_feat, label, cls_score_

    if neck == "bnneck" and neck_feat == "after":
        return pool_bn_eval_pallas(x_feat_nchw, params)
    # neck == 'no' or neck_feat == 'before': raw pooled feature is returned.
    return global_avg_pool_pallas(x_feat_nchw)


def init_params(key, in_planes=512, num_classes=64):
    """Parameter init mirroring Backbone.__init__.

    classifier: weights_init_classifier -> normal(std=0.001), bias=False.
    bottleneck BatchNorm1d: weights_init_kaiming -> weight=1, bias=0.
    The classifier weight is also stored pre-transposed / class-padded / bf16
    once, so the forward pass does no per-step transpose/pad/cast work.
    """
    w_cls = 0.001 * jax.random.normal(key, (num_classes, in_planes),
                                      dtype=jnp.float32)
    ncls_pad = _round_up(num_classes, 128)
    w_t_pad = jnp.pad(w_cls.T, ((0, 0), (0, ncls_pad - num_classes)))
    return {
        "classifier_w": w_cls,
        "classifier_w_t_pad": w_t_pad.astype(jnp.bfloat16),
        "bn_weight": jnp.ones((in_planes,), jnp.float32),
        "bn_bias": jnp.zeros((in_planes,), jnp.float32),
        "bn_running_mean": jnp.zeros((in_planes,), jnp.float32),
        "bn_running_var": jnp.ones((in_planes,), jnp.float32),
    }


if __name__ == "__main__":
    key = jax.random.PRNGKey(0)
    k_x, k_w = jax.random.split(key)

    B, C, H, W = 2, 512, 14, 14        # in_planes=512 (resnet18/34); HW=196
    num_classes = 64

    # Backbone (self.base) output feature map, NCHW, streamed in native bf16
    # (halves the dominant HBM read vs forcing f32).
    x_feat = jax.random.normal(k_x, (B, C, H, W),
                               dtype=jnp.float32).astype(jnp.bfloat16)
    params = init_params(k_w, in_planes=C, num_classes=num_classes)

    # f32 references computed on the same bf16 feature map.
    xf = x_feat.astype(jnp.float32).reshape(B, C, -1)
    gf_ref = jnp.mean(xf, axis=-1)
    feat_ev_ref = ((gf_ref - params["bn_running_mean"])
                   * jax.lax.rsqrt(params["bn_running_var"] + BN_EPS)
                   * params["bn_weight"] + params["bn_bias"])

    # ---- Eval path (neck='bnneck', neck_feat='after') -> BN'd feat. ----
    feat = jax.block_until_ready(
        backbone_forward(x_feat, params, training=False,
                         neck="bnneck", neck_feat="after"))
    assert feat.shape == (B, C)
    assert jnp.allclose(feat, feat_ev_ref, atol=1e-4, rtol=1e-4)

    # ---- Eval path (neck='no') -> raw pooled feature. ----
    gfeat = jax.block_until_ready(
        backbone_forward(x_feat, params, training=False, neck="no"))
    assert gfeat.shape == (B, C)
    assert jnp.allclose(gfeat, gf_ref, atol=1e-4, rtol=1e-4)

    # ---- Training path (batch-stat BN + classifier MXU matmul). ----
    cls_score, global_feat, _, _ = backbone_forward(
        x_feat, params, training=True, label=None, domains=None)
    cls_score = jax.block_until_ready(cls_score)
    assert cls_score.shape == (B, num_classes)
    assert global_feat.shape == (B, C)
    assert jnp.allclose(global_feat, gf_ref, atol=1e-4, rtol=1e-4)

    mu = jnp.mean(gf_ref, axis=0, keepdims=True)
    var = jnp.mean((gf_ref - mu) ** 2, axis=0, keepdims=True)
    feat_tr_ref = ((gf_ref - mu) * jax.lax.rsqrt(var + BN_EPS)
                   * params["bn_weight"] + params["bn_bias"])
    score_ref = feat_tr_ref @ params["classifier_w"].T
    # bf16 feat + bf16 classifier weight on the MXU -> loose tolerance.
    assert jnp.allclose(cls_score, score_ref, atol=3e-3, rtol=5e-2)

    print("KERNEL_OK")
</pallas_src>

<mosaic_0001>
module attributes {stable_mosaic.version = 11 : i64} {
  func.func @_pool_bn_eval_kernel(%arg0: i32, %arg1: i32, %arg2: i32, %arg3: memref<2x256x256xbf16, #tpu.memory_space<vmem>>, %arg4: memref<1x256xf32, #tpu.memory_space<vmem>>, %arg5: memref<1x256xf32, #tpu.memory_space<vmem>>, %arg6: memref<1x256xf32, #tpu.memory_space<vmem>>, %arg7: memref<1x256xf32, #tpu.memory_space<vmem>>, %arg8: memref<2x256xf32, #tpu.memory_space<vmem>>, %arg9: memref<2x256x128xf32, #tpu.memory_space<vmem>>) attributes {dimension_semantics = [#tpu.dimension_semantics<parallel>, #tpu.dimension_semantics<parallel>, #tpu.dimension_semantics<arbitrary>], iteration_bounds = array<i64: 1, 2, 1>, scalar_prefetch = 0 : i64, scratch_operands = 1 : i64, tpu.core_type = #tpu.core_type<tc>, window_params = [{transform_indices = @transform_0, window_bounds = array<i64: 2, 256, 256>}, {transform_indices = @transform_1, window_bounds = array<i64: 1, 256>}, {transform_indices = @transform_2, window_bounds = array<i64: 1, 256>}, {transform_indices = @transform_3, window_bounds = array<i64: 1, 256>}, {transform_indices = @transform_4, window_bounds = array<i64: 1, 256>}, {transform_indices = @transform_5, window_bounds = array<i64: 2, 256>}]} {
    %c0_i32 = arith.constant 0 : i32
    %0 = arith.cmpi eq, %arg2, %c0_i32 : i32
    %1 = arith.extui %0 : i1 to i32
    %c0_i32_0 = arith.constant 0 : i32
    %2 = arith.cmpi ne, %1, %c0_i32_0 : i32
    scf.if %2 {
      %cst = arith.constant 0.000000e+00 : f32
      %14 = vector.broadcast %cst : f32 to vector<2x256x128xf32>
      %c0_11 = arith.constant 0 : index
      %c0_12 = arith.constant 0 : index
      %c0_13 = arith.constant 0 : index
      %15 = vector.load %arg9[%c0_11, %c0_12, %c0_13] : memref<2x256x128xf32, #tpu.memory_space<vmem>>, vector<2x256x128xf32>
      tpu.vector_store %arg9[%c0_11, %c0_12, %c0_13], %14 {strides = array<i32>} : memref<2x256x128xf32, #tpu.memory_space<vmem>>, vector<2x256x128xf32>,
    } else {
    }
    %c0 = arith.constant 0 : index
    %c0_1 = arith.constant 0 : index
    %c0_2 = arith.constant 0 : index
    %3 = vector.load %arg3[%c0, %c0_1, %c0_2] : memref<2x256x256xbf16, #tpu.memory_space<vmem>>, vector<2x256x256xbf16>
    %4 = arith.extf %3 : vector<2x256x256xbf16> to vector<2x256x256xf32>
    %c0_3 = arith.constant 0 : index
    %c0_4 = arith.constant 0 : index
    %c0_5 = arith.constant 0 : index
    %5 = vector.load %arg9[%c0_3, %c0_4, %c0_5] : memref<2x256x128xf32, #tpu.memory_space<vmem>>, vector<2x256x128xf32>
    %6 = vector.extract_strided_slice %4 {offsets = [0, 0, 0], sizes = [2, 256, 128], strides = [1, 1, 1]} : vector<2x256x256xf32> to vector<2x256x128xf32>
    %7 = arith.addf %5, %6 : vector<2x256x128xf32>
    %8 = vector.extract_strided_slice %4 {offsets = [0, 0, 128], sizes = [2, 256, 128], strides = [1, 1, 1]} : vector<2x256x256xf32> to vector<2x256x128xf32>
    %9 = arith.addf %7, %8 : vector<2x256x128xf32>
    %c0_6 = arith.constant 0 : index
    %c0_7 = arith.constant 0 : index
    %c0_8 = arith.constant 0 : index
    %10 = vector.load %arg9[%c0_6, %c0_7, %c0_8] : memref<2x256x128xf32, #tpu.memory_space<vmem>>, vector<2x256x128xf32>
    tpu.vector_store %arg9[%c0_6, %c0_7, %c0_8], %9 {strides = array<i32>} : memref<2x256x128xf32, #tpu.memory_space<vmem>>, vector<2x256x128xf32>,
    %c0_i32_9 = arith.constant 0 : i32
    %11 = arith.cmpi eq, %arg2, %c0_i32_9 : i32
    %12 = arith.extui %11 : i1 to i32
    %c0_i32_10 = arith.constant 0 : i32
    %13 = arith.cmpi ne, %12, %c0_i32_10 : i32
    scf.if %13 {
      %c0_11 = arith.constant 0 : index
      %c0_12 = arith.constant 0 : index
      %c0_13 = arith.constant 0 : index
      %14 = vector.load %arg9[%c0_11, %c0_12, %c0_13] : memref<2x256x128xf32, #tpu.memory_space<vmem>>, vector<2x256x128xf32>
      %cst = arith.constant dense<0.000000e+00> : vector<2x256xf32>
      %15 = vector.multi_reduction <add>, %14, %cst [2] : vector<2x256x128xf32> to vector<2x256xf32>
      %cst_14 = arith.constant 0.00510204071 : f32
      %16 = vector.broadcast %cst_14 : f32 to vector<2x256xf32>
      %17 = arith.mulf %15, %16 : vector<2x256xf32>
      %c0_15 = arith.constant 0 : index
      %c0_16 = arith.constant 0 : index
      %18 = vector.load %arg7[%c0_15, %c0_16] : memref<1x256xf32, #tpu.memory_space<vmem>>, vector<1x256xf32>
      %cst_17 = arith.constant 9.99999974E-6 : f32
      %19 = vector.broadcast %cst_17 : f32 to vector<1x256xf32>
      %20 = arith.addf %18, %19 : vector<1x256xf32>
      %21 = math.rsqrt %20 : vector<1x256xf32>
      %c0_18 = arith.constant 0 : index
      %c0_19 = arith.constant 0 : index
      %22 = vector.load %arg6[%c0_18, %c0_19] : memref<1x256xf32, #tpu.memory_space<vmem>>, vector<1x256xf32>
      %23 = vector.broadcast %22 : vector<1x256xf32> to vector<2x256xf32>
      %24 = arith.subf %17, %23 : vector<2x256xf32>
      %25 = vector.broadcast %21 : vector<1x256xf32> to vector<2x256xf32>
      %26 = arith.mulf %24, %25 : vector<2x256xf32>
      %c0_20 = arith.constant 0 : index
      %c0_21 = arith.constant 0 : index
      %27 = vector.load %arg4[%c0_20, %c0_21] : memref<1x256xf32, #tpu.memory_space<vmem>>, vector<1x256xf32>
      %28 = vector.broadcast %27 : vector<1x256xf32> to vector<2x256xf32>
      %29 = arith.mulf %26, %28 : vector<2x256xf32>
      %c0_22 = arith.constant 0 : index
      %c0_23 = arith.constant 0 : index
      %30 = vector.load %arg5[%c0_22, %c0_23] : memref<1x256xf32, #tpu.memory_space<vmem>>, vector<1x256xf32>
      %31 = vector.broadcast %30 : vector<1x256xf32> to vector<2x256xf32>
      %32 = arith.addf %29, %31 : vector<2x256xf32>
      %c0_24 = arith.constant 0 : index
      %c0_25 = arith.constant 0 : index
      %33 = vector.load %arg8[%c0_24, %c0_25] : memref<2x256xf32, #tpu.memory_space<vmem>>, vector<2x256xf32>
      tpu.vector_store %arg8[%c0_24, %c0_25], %32 {strides = array<i32>} : memref<2x256xf32, #tpu.memory_space<vmem>>, vector<2x256xf32>,
    } else {
    }
    return
  }
  func.func @transform_0(%arg0: i32, %arg1: i32, %arg2: i32) -> (i32, i32, i32) {
    %c0_i32 = arith.constant 0 : i32
    return %arg0, %arg1, %arg2 : i32, i32, i32
  }
  func.func @transform_1(%arg0: i32, %arg1: i32, %arg2: i32) -> (i32, i32) {
    %c0_i32 = arith.constant 0 : i32
    %c0_i32_0 = arith.constant 0 : i32
    return %c0_i32, %arg1 : i32, i32
  }
  func.func @transform_2(%arg0: i32, %arg1: i32, %arg2: i32) -> (i32, i32) {
    %c0_i32 = arith.constant 0 : i32
    %c0_i32_0 = arith.constant 0 : i32
    return %c0_i32, %arg1 : i32, i32
  }
  func.func @transform_3(%arg0: i32, %arg1: i32, %arg2: i32) -> (i32, i32) {
    %c0_i32 = arith.constant 0 : i32
    %c0_i32_0 = arith.constant 0 : i32
    return %c0_i32, %arg1 : i32, i32
  }
  func.func @transform_4(%arg0: i32, %arg1: i32, %arg2: i32) -> (i32, i32) {
    %c0_i32 = arith.constant 0 : i32
    %c0_i32_0 = arith.constant 0 : i32
    return %c0_i32, %arg1 : i32, i32
  }
  func.func @transform_5(%arg0: i32, %arg1: i32, %arg2: i32) -> (i32, i32) {
    %c0_i32 = arith.constant 0 : i32
    return %arg0, %arg1 : i32, i32
  }
}

</mosaic_0001>

<bundles_post_ra>
// kernel: tpu_custom_call.1
= control target key start
LH: loop header
LB: loop body
LE: loop exit
PB: predicated region body
PF: predicated region fallthrough
CT: control target
= control target key end

     0   :  { %s7741_s0 = inlined_call_operand.hbm [shape: bf16[2,512,256], index: 0, kind: input, shape index: {}]   ;;  %s7742_s1 = inlined_call_operand.hbm [shape: f32[1,512], index: 1, kind: input, shape index: {}]   ;;  %s7743_s2 = inlined_call_operand.vmem [shape: f32[1,512], index: 2, kind: input, shape index: {}]   ;;  %s7744_s3 = inlined_call_operand.vmem [shape: f32[1,512], index: 3, kind: input, shape index: {}]   ;;  %s7745_s4 = inlined_call_operand.vmem [shape: f32[1,512], index: 4, kind: input, shape index: {}]   ;;  %s7746_s5 = inlined_call_operand.hbm [shape: f32[2,512], index: 5, kind: output, shape index: {}]  }
   0x1   :  { %7915 = sst [smem:[#allocation147_spill]] %s7741_s0 }
   0x2   :  { %10 = vsyncpa [#allocation4], 0 }
   0x3   :  { %12 = vsyncpa [#allocation4 + $0x1], 0 }
   0x4   :  { %13 = vsyncpa [#allocation7], 0 }
   0x5   :  { %15 = vsyncpa [#allocation7 + $0x1], 0 }
   0x6   :  { %16 = vsyncpa [#allocation5], 0 }
   0x7   :  { %18 = vsyncpa [#allocation5 + $0x1], 0  ;;  %s5317_s18 = smov 0   ;;  %s5319_s19 = smov 0  }
   0x8   :  { %s5321_s20 = smov 0   ;;  %s5323_s21 = smov 0  }
   0x9   :  { %s5325_s22 = smov 0   ;;  %s5327_s23 = smov 0  }
   0xa LB: > { %s5053_s24 = sadd.s32 4294967295, %s5275_s23   ;;  %s5054_s25 = sadd.s32 4294967294, %s5275_s23   ;;  %s5275_s23 = sphi %s5327_s23, %s24_s23   ;;  %s5271_s22 = sphi %s5325_s22, %s8481_s22   ;;  %s5267_s21 = sphi %s5323_s21, %s8480_s21   ;;  %s5263_s20 = sphi %s5321_s20, %s8479_s20   ;;  %s5259_s19 = sphi %s5319_s19, %s8478_s19   ;;  %s5255_s18 = sphi %s5317_s18, %s8477_s18  }
   0xb   : > { %s39_s26 = sadd.s32 1, %s5271_s22  ;;  %s54_s27 = sadd.s32 1, %s5263_s20 }
   0xc   : > { %p41_p0 = scmp.ge.s32.totalorder %s39_s26, 2  ;;  %p61_p1 = scmp.ne.s32.totalorder %s5263_s20, %s5259_s19 }
   0xd   : > { %p62_p2 = scmp.eq.s32.totalorder %s5275_s23, 0  ;;  %p67_p3 = scmp.ne.s32.totalorder %s5259_s19, %s5255_s18 }
   0xe   : > { %s8483_s26 = smov (%p41_p0, %s39_s26), 0  ;;  %p68_p5 = scmp.eq.s32.totalorder %s5053_s24, 0 }
   0xf   : > { %7916 = sst [smem:[#allocation15_spill]] %s8483_s26  ;;  %p5358_p4 = por %p62_p2, %p61_p1 }
  0x10   : > { %s48_s29 = ssub.s32 %s5271_s22, %s8483_s26  ;;  %p197_p6 = scmp.eq.s32.totalorder %s5053_s24, 1 }
  0x11   : > { %p52_p7 = scmp.eq.s32.totalorder %s48_s29, 0  ;;  %p5364_p8 = por %p68_p5, %p67_p3 }
  0x12   : > { %p5368_p9 = por %p197_p6, %p61_p1  ;;  %p203_p10 = scmp.eq.s32.totalorder %s5054_s25, 1 }
  0x13   : > { %s7918_s30 = scalar_select %p5364_p8, 1, 0 }
  0x14   : > { %s7919_s6 = scalar_select %p5368_p9, 1, 0 }
  0x15   : > { %s5373_s7 = scalar_select %p52_p7, %s5263_s20, %s54_s27  }
  0x16   : > { %p5375_p11 = por %p203_p10, %p67_p3  ;;  %p7748_p12 = scmp.ge.s32.totalorder %s5275_s23, 2 }
  0x18   : > { %s7920_s8 = scalar_select %p5375_p11, 1, 0 }
  0x19   : > { %219 = sbr.rel (%p7748_p12) target bundleno = 70 (0x46), region = 16 }
  0x20   : > { %s5383_s9 = sand.u32 1, %s5263_s20   ;;  %s5080_s10 = sshll.u32 %s5271_s22, 12 }
  0x21   : > { %s5057_s11 = sshll.u32 %s5383_s9, 9  ;;  %s7921_s0 = sld [smem:[#allocation147_spill]] }
  0x22   : > { %s5083_s15 = scalar_select %p5358_p4, [#allocation0], [#allocation11] }
  0x23   : > { %s227_s16 = scalar_lea.vmem [#allocation3], %s5057_s11  ;;  %s5277_s25 = smov 8192  }
  0x24   : > { %s252_s17 = sshll.u32 %s227_s16, 4  ;;  %s244_s24 = sld [smem:[%s5083_s15]]   ;;  %s253_s17 = int_to_ptr.vmem [resolvable:$true] %s252_s17 }
  0x25   : > { %5084 = sst [smem:[#allocation10]] (%p5358_p4), %s5277_s25  ;;  %s5278_s27 = smov 4096  }
  0x26   : > { %5085 = sst [smem:[#allocation10 + $0x1]] (%p5358_p4), %s5278_s27  ;;  %s5279_s29 = smov 32  }
  0x27   : > { %s239_s14 = scalar_lea.hbm %s7921_s0, %s5080_s10  ;;  %5086 = sst [smem:[#allocation10 + $0x2]] (%p5358_p4), %s5279_s29 }
  0x28   : > { %s5280_s12 = smov 128   ;;  %s5281_s11 = smov 8  }
  0x29   : > { %5087 = sst [smem:[#allocation10 + $0x3]] (%p5358_p4), %s5280_s12  ;;  %s224_s15 = scalar_lea.sflag [#allocation4], %s5383_s9 }
  0x2a   : > { %5088 = sst [smem:[#allocation10 + $0x4]] (%p5358_p4), %s5280_s12  ;;  %s5061_s10 = sshll.u32 %s244_s24, 26 }
  0x2b   : > { %5089 = sst [smem:[#allocation10 + $0x5]] (%p5358_p4), %s5281_s11  ;;  %s5062_s13 = sadd.s32 134217728, %s5061_s10 }
  0x2c   : > { %s5282_s16 = smov [#allocation9]   ;;  %s5063_s25 = sshll.u32 %s5383_s9, 1 }
  0x2d   : > { %5090 = dma.general (%p5358_p4), %s239_s14, 8192, %s253_s17, %s224_s15, %s5282_s16, [#allocation10], %s5062_s13, 0  }
  0x2e   : > { %s5081_s27 = sshll.u32 %s5271_s22, 5  ;;  %s279_s24 = scalar_lea.vmem [#allocation6], %s5063_s25 }
  0x2f   : > { %s5412_s26 = scalar_lea.hbm %s7742_s1, %s5081_s27  ;;  %s287_s12 = sshll.u32 %s279_s24, 4  ;;  %s288_s12 = int_to_ptr.vmem [resolvable:$true] %s287_s12 }
  0x30   : > { %s276_s10 = scalar_lea.sflag [#allocation7], %s5383_s9  ;;  %s5161_s14 = scalar_lea.hbm %s5412_s26, 32 }
  0x31   : > { %p5162_p13 = scmp.ne.s32.totalorder %s5412_s26, %s5161_s14  ;;  %s5165_s13 = scalar_lea.hbm %s7742_s1, 64 }
  0x32   : > { %p5166_p2 = scmp.lt.u32.totalorder %s5412_s26, %s7742_s1  ;;  %p5167_p3 = scmp.lt.u32.totalorder %s5165_s13, %s5161_s14 }
  0x33   : > { %p5163_p0 = pnand %p5162_p13, %p5358_p4  ;;  %p5169_p6 = scmp.lt.u32.totalorder %s5161_s14, %s5412_s26 }
  0x34   : > { %p5168_p5 = por %p5167_p3, %p5166_p2 }
  0x35   : > { %p5164_p1 = pneg %p5163_p0 }
  0x36   : > { %p5170_p7 = por %p5169_p6, %p5168_p5 }
  0x38   : > { %p5171_p10 = pnand %p5170_p7, %p5164_p1 }
  0x3a   : > { %5174 = shalt.err (!%p5171_p10)
}
  0x3b   : > { %s5175_s9 = scalar_lea.vmem %s288_s12, 32  ;;  %s5283_s16 = smov [#allocation6]  }
  0x3c   : > { %p5176_p12 = scmp.ne.s32.totalorder %s288_s12, %s5175_s9  ;;  %s5179_s25 = sshll.u32 %s5283_s16, 4  ;;  %s5180_s25 = int_to_ptr.vmem [resolvable:$false] %s5179_s25 }
  0x3d   : > { %s5181_s27 = scalar_lea.vmem %s5180_s25, 64  ;;  %p5182_p11 = scmp.lt.s32.totalorder %s288_s12, %s5180_s25 }
  0x3e   : > { %p5177_p13 = pnand %p5176_p12, %p5358_p4  ;;  %p5183_p9 = scmp.lt.s32.totalorder %s5181_s27, %s5175_s9 }
  0x40   : > { %p5178_p0 = pneg %p5177_p13  ;;  %p5184_p8 = por %p5183_p9, %p5182_p11 }
  0x42   : > { %p5185_p2 = pnand %p5184_p8, %p5178_p0 }
  0x44   : > { %5188 = shalt.err (!%p5185_p2)
}
  0x45   : > { %5091 = dma.hbm_to_vmem [thread:$0]  (%p5358_p4), %s5412_s26, 32, %s288_s12, %s276_s10  }
  0x46 PF: > { %p5066_p1 = scmp.ge.s32.totalorder %s5275_s23, 1  ;;  %p316_p3 = scmp.lt.s32.totalorder %s5275_s23, 3 }
  0x48   : > { %p317_p12 = pnand %p5066_p1, %p316_p3 }
  0x4a   : > { %320 = sbr.rel (%p317_p12) target bundleno = 958 (0x3be), region = 40 }
  0x51   : > { %s5435_s29 = sand.u32 1, %s5259_s19   ;;  %p7922_p8 = scmp.ne.s32.totalorder %s7918_s30, 0 }
  0x52   : > { %s5067_s24 = sshll.u32 %s5435_s29, 9  ;;  %s323_s14 = scalar_lea.sflag [#allocation4], %s5435_s29 }
  0x53   : > { %s5439_s17 = scalar_lea.vmem [#allocation3], %s5067_s24 }
  0x54   : > { %5242 = dma.done.wait (%p7922_p8), %s323_s14, 8192  }
  0x55   : > { %5244 = vsyncadd (%p7922_p8), %s323_s14, 4294959104  ;;  %s5068_s26 = sshll.u32 %s5435_s29, 1  ;;  %s332_s28 = scalar_lea.sflag [#allocation7], %s5435_s29 }
  0x56   : > { %s5447_s12 = scalar_lea.vmem [#allocation6], %s5068_s26 }
  0x57   : > { %5246 = dma.done.wait (%p7922_p8), %s332_s28, 32  }
  0x58   : > { %5248 = vsyncadd (%p7922_p8), %s332_s28, 4294967264  ;;  %v469_v0 = vld [vmem:[%s5439_s17 + $0x10] sm:$0xff]  ;;  %v467_v1 = vld [vmem:[%s5439_s17] sm:$0xff]  ;;  %s5070_s30 = sshll.u32 %s5267_s21, 1  ;;  %vm4547_vm0 = vcmask 130112   ;;  %vm4554_vm1 = vcmask 195712  }
  0x59   : > { %v470_v2 = vld [vmem:[%s5439_s17 + $0x18] sm:$0xff]  ;;  %v535_v3 = vunpack.c.l.bf16 %v469_v0  ;;  %v536_v4 = vunpack.c.h.bf16 %v469_v0  ;;  %v531_v5 = vunpack.c.l.bf16 %v467_v1  ;;  %v532_v6 = vunpack.c.h.bf16 %v467_v1  ;;  %v468_v7 = vld [vmem:[%s5439_s17 + $0x8] sm:$0xff]  ;;  %v471_v13 = vld [vmem:[%s5439_s17 + $0x20] sm:$0xff]  ;;  %p384_p4 = scmp.lt.s32.totalorder %s5070_s30, 3  ;;  %s5069_s24 = sshll.u32 %s5435_s29, 2 }
  0x5a   : > { %v472_v8 = vld [vmem:[%s5439_s17 + $0x28] sm:$0xff]  ;;  %v537_v9 = vunpack.c.l.bf16 %v470_v2  ;;  %v538_v10 = vunpack.c.h.bf16 %v470_v2  ;;  %v533_v11 = vunpack.c.l.bf16 %v468_v7  ;;  %v534_v12 = vunpack.c.h.bf16 %v468_v7  ;;  %v474_v22 = vld [vmem:[%s5439_s17 + $0x38] sm:$0xff]  ;;  %v473_v23 = vld [vmem:[%s5439_s17 + $0x30] sm:$0xff]  ;;  %s5082_s14 = sshll.u32 %s5267_s21, 6  ;;  %s4898_s21 = scalar_lea.sflag [#allocation5], %s5435_s29 }
  0x5b   : > { %v789_v14 = vadd.f32 %v536_v4, %v535_v3  ;;  %v787_v15 = vadd.f32 %v532_v6, %v531_v5  ;;  %v541_v16 = vunpack.c.l.bf16 %v472_v8  ;;  %v542_v17 = vunpack.c.h.bf16 %v472_v8  ;;  %v476_v30 = vld [vmem:[%s5439_s17 + $0x48] sm:$0xff]  ;;  %v475_v31 = vld [vmem:[%s5439_s17 + $0x40] sm:$0xff]  ;;  %v478_v38 = vld [vmem:[%s5439_s17 + $0x58] sm:$0xff]  ;;  %s8485_s30 = smov (!%p384_p4, %s5070_s30), 3  ;;  %p8473_p11 = scmp.ne.s32.totalorder %s7919_s6, 0 }
  0x5c   : > { %v790_v18 = vadd.f32 %v538_v10, %v537_v9  ;;  %v788_v19 = vadd.f32 %v534_v12, %v533_v11  ;;  %v539_v20 = vunpack.c.l.bf16 %v471_v13  ;;  %v540_v21 = vunpack.c.h.bf16 %v471_v13  ;;  %v477_v39 = vld [vmem:[%s5439_s17 + $0x50] sm:$0xff]  ;;  %v480_v46 = vld [vmem:[%s5439_s17 + $0x68] sm:$0xff]  ;;  %v479_v47 = vld [vmem:[%s5439_s17 + $0x60] sm:$0xff]  ;;  %s391_s13 = scalar_lea.vmem %s7744_s3, %s8485_s30  ;;  %s396_s9 = scalar_lea.vmem %s7745_s4, %s8485_s30 }
  0x5d   : > { %986 = vadd.xlane.f32.xlu1 %v789_v14  ;;  %982 = vadd.xlane.f32.xlu0 %v787_v15  ;;  %v792_v24 = vadd.f32 %v542_v17, %v541_v16  ;;  %v545_v25 = vunpack.c.l.bf16 %v474_v22  ;;  %v546_v27 = vunpack.c.h.bf16 %v474_v22  ;;  %v543_v28 = vunpack.c.l.bf16 %v473_v23  ;;  %v482_v54 = vld [vmem:[%s5439_s17 + $0x78] sm:$0xff]  ;;  %v481_v55 = vld [vmem:[%s5439_s17 + $0x70] sm:$0xff]  ;;  %v484_v62 = vld [vmem:[%s5439_s17 + $0x88] sm:$0xff]  ;;  %s386_s27 = scalar_lea.vmem %s7743_s2, %s8485_s30  ;;  %s7692_s30 = scalar_lea.hbm %s7746_s5, %s5082_s14 }
  0x5e   : > { %v791_v26 = vadd.f32 %v540_v21, %v539_v20  ;;  %v544_v29 = vunpack.c.h.bf16 %v473_v23  ;;  %v549_v32 = vunpack.c.l.bf16 %v476_v30  ;;  %v550_v33 = vunpack.c.h.bf16 %v476_v30  ;;  %v483_v63 = vld [vmem:[%s5439_s17 + $0x80] sm:$0xff]  ;;  %v486_v6 = vld [vmem:[%s5439_s17 + $0x98] sm:$0xff]  ;;  %v485_v7 = vld [vmem:[%s5439_s17 + $0x90] sm:$0xff]  ;;  %s5286_s11 = smov [#allocation8]  }
  0x5f   : > { %v794_v34 = vadd.f32 %v546_v27, %v545_v25  ;;  %v547_v36 = vunpack.c.l.bf16 %v475_v31  ;;  %v548_v37 = vunpack.c.h.bf16 %v475_v31  ;;  %v553_v41 = vunpack.c.l.bf16 %v478_v38  ;;  %v488_v14 = vld [vmem:[%s5439_s17 + $0xa8] sm:$0xff]  ;;  %v487_v15 = vld [vmem:[%s5439_s17 + $0xa0] sm:$0xff]  ;;  %v490_v22 = vld [vmem:[%s5439_s17 + $0xb8] sm:$0xff] }
  0x60   : > { %v793_v35 = vadd.f32 %v544_v29, %v543_v28  ;;  %v796_v40 = vadd.f32 %v550_v33, %v549_v32  ;;  %v554_v43 = vunpack.c.h.bf16 %v478_v38  ;;  %v551_v44 = vunpack.c.l.bf16 %v477_v39  ;;  %v489_v23 = vld [vmem:[%s5439_s17 + $0xb0] sm:$0xff]  ;;  %v492_v30 = vld [vmem:[%s5439_s17 + $0xc8] sm:$0xff]  ;;  %v491_v31 = vld [vmem:[%s5439_s17 + $0xc0] sm:$0xff] }
  0x61   : > { %988 = vadd.xlane.f32.xlu1 %v790_v18  ;;  %984 = vadd.xlane.f32.xlu0 %v788_v19  ;;  %v795_v42 = vadd.f32 %v548_v37, %v547_v36  ;;  %v552_v45 = vunpack.c.h.bf16 %v477_v39  ;;  %v557_v48 = vunpack.c.l.bf16 %v480_v46  ;;  %v558_v49 = vunpack.c.h.bf16 %v480_v46  ;;  %v494_v38 = vld [vmem:[%s5439_s17 + $0xd8] sm:$0xff]  ;;  %v493_v39 = vld [vmem:[%s5439_s17 + $0xd0] sm:$0xff]  ;;  %v496_v46 = vld [vmem:[%s5439_s17 + $0xe8] sm:$0xff] }
  0x62   : > { %v798_v50 = vadd.f32 %v554_v43, %v553_v41  ;;  %v555_v52 = vunpack.c.l.bf16 %v479_v47  ;;  %v556_v53 = vunpack.c.h.bf16 %v479_v47  ;;  %v561_v57 = vunpack.c.l.bf16 %v482_v54  ;;  %v495_v47 = vld [vmem:[%s5439_s17 + $0xe0] sm:$0xff] }
  0x63   : > { %v797_v51 = vadd.f32 %v552_v45, %v551_v44  ;;  %v800_v56 = vadd.f32 %v558_v49, %v557_v48  ;;  %v562_v59 = vunpack.c.h.bf16 %v482_v54  ;;  %v559_v60 = vunpack.c.l.bf16 %v481_v55  ;;  %v498_v54 = vld [vmem:[%s5439_s17 + $0xf8] sm:$0xff] }
  0x64   : > { %v799_v58 = vadd.f32 %v556_v53, %v555_v52  ;;  %v560_v61 = vunpack.c.h.bf16 %v481_v55  ;;  %v565_v0 = vunpack.c.l.bf16 %v484_v62  ;;  %v566_v1 = vunpack.c.h.bf16 %v484_v62  ;;  %v497_v55 = vld [vmem:[%s5439_s17 + $0xf0] sm:$0xff]  ;;  %v500_v62 = vld [vmem:[%s5439_s17 + $0x108] sm:$0xff] }
  0x65   : > { %992 = vadd.xlane.f32.xlu1 %v792_v24  ;;  %990 = vadd.xlane.f32.xlu0 %v791_v26  ;;  %v802_v2 = vadd.f32 %v562_v59, %v561_v57  ;;  %v563_v4 = vunpack.c.l.bf16 %v483_v63  ;;  %v564_v5 = vunpack.c.h.bf16 %v483_v63  ;;  %v569_v9 = vunpack.c.l.bf16 %v486_v6  ;;  %v499_v63 = vld [vmem:[%s5439_s17 + $0x100] sm:$0xff] }
  0x66   : > { %v801_v3 = vadd.f32 %v560_v61, %v559_v60  ;;  %v804_v8 = vadd.f32 %v566_v1, %v565_v0  ;;  %v570_v11 = vunpack.c.h.bf16 %v486_v6  ;;  %v567_v12 = vunpack.c.l.bf16 %v485_v7  ;;  %v502_v6 = vld [vmem:[%s5439_s17 + $0x118] sm:$0xff] }
  0x67   : > { %v803_v10 = vadd.f32 %v564_v5, %v563_v4  ;;  %v568_v13 = vunpack.c.h.bf16 %v485_v7  ;;  %v573_v16 = vunpack.c.l.bf16 %v488_v14  ;;  %v574_v17 = vunpack.c.h.bf16 %v488_v14  ;;  %v501_v7 = vld [vmem:[%s5439_s17 + $0x110] sm:$0xff]  ;;  %v504_v14 = vld [vmem:[%s5439_s17 + $0x128] sm:$0xff] }
  0x68   : > { %v806_v18 = vadd.f32 %v570_v11, %v569_v9  ;;  %v571_v20 = vunpack.c.l.bf16 %v487_v15  ;;  %v572_v21 = vunpack.c.h.bf16 %v487_v15  ;;  %v577_v25 = vunpack.c.l.bf16 %v490_v22  ;;  %v503_v15 = vld [vmem:[%s5439_s17 + $0x120] sm:$0xff] }
  0x69   : > { %996 = vadd.xlane.f32.xlu1 %v794_v34  ;;  %994 = vadd.xlane.f32.xlu0 %v793_v35  ;;  %v805_v19 = vadd.f32 %v568_v13, %v567_v12  ;;  %v808_v24 = vadd.f32 %v574_v17, %v573_v16  ;;  %v578_v27 = vunpack.c.h.bf16 %v490_v22  ;;  %v575_v28 = vunpack.c.l.bf16 %v489_v23  ;;  %v506_v22 = vld [vmem:[%s5439_s17 + $0x138] sm:$0xff] }
  0x6a   : > { %v807_v26 = vadd.f32 %v572_v21, %v571_v20  ;;  %v576_v29 = vunpack.c.h.bf16 %v489_v23  ;;  %v581_v32 = vunpack.c.l.bf16 %v492_v30  ;;  %v582_v33 = vunpack.c.h.bf16 %v492_v30  ;;  %v505_v23 = vld [vmem:[%s5439_s17 + $0x130] sm:$0xff]  ;;  %v508_v30 = vld [vmem:[%s5439_s17 + $0x148] sm:$0xff] }
  0x6b   : > { %v810_v34 = vadd.f32 %v578_v27, %v577_v25  ;;  %v579_v36 = vunpack.c.l.bf16 %v491_v31  ;;  %v580_v37 = vunpack.c.h.bf16 %v491_v31  ;;  %v585_v41 = vunpack.c.l.bf16 %v494_v38  ;;  %v507_v31 = vld [vmem:[%s5439_s17 + $0x140] sm:$0xff] }
  0x6c   : > { %v809_v35 = vadd.f32 %v576_v29, %v575_v28  ;;  %v586_v43 = vunpack.c.h.bf16 %v494_v38  ;;  %v583_v44 = vunpack.c.l.bf16 %v493_v39  ;;  %v584_v45 = vunpack.c.h.bf16 %v493_v39  ;;  %v510_v38 = vld [vmem:[%s5439_s17 + $0x158] sm:$0xff]  ;;  %v509_v39 = vld [vmem:[%s5439_s17 + $0x150] sm:$0xff] }
  0x6d   : > { %1000 = vadd.xlane.f32.xlu1 %v796_v40  ;;  %998 = vadd.xlane.f32.xlu0 %v795_v42  ;;  %v812_v40 = vadd.f32 %v582_v33, %v581_v32  ;;  %v811_v42 = vadd.f32 %v580_v37, %v579_v36  ;;  %v589_v48 = vunpack.c.l.bf16 %v496_v46  ;;  %v590_v49 = vunpack.c.h.bf16 %v496_v46  ;;  %v512_v46 = vld [vmem:[%s5439_s17 + $0x168] sm:$0xff] }
  0x6e   : > { %v587_v52 = vunpack.c.l.bf16 %v495_v47  ;;  %v588_v53 = vunpack.c.h.bf16 %v495_v47  ;;  %v593_v57 = vunpack.c.l.bf16 %v498_v54  ;;  %v594_v59 = vunpack.c.h.bf16 %v498_v54  ;;  %v511_v47 = vld [vmem:[%s5439_s17 + $0x160] sm:$0xff]  ;;  %v514_v54 = vld [vmem:[%s5439_s17 + $0x178] sm:$0xff] }
  0x6f   : > { %v591_v60 = vunpack.c.l.bf16 %v497_v55  ;;  %v592_v61 = vunpack.c.h.bf16 %v497_v55  ;;  %v597_v0 = vunpack.c.l.bf16 %v500_v62  ;;  %v598_v1 = vunpack.c.h.bf16 %v500_v62  ;;  %v513_v55 = vld [vmem:[%s5439_s17 + $0x170] sm:$0xff]  ;;  %v516_v62 = vld [vmem:[%s5439_s17 + $0x188] sm:$0xff] }
  0x70   : > { %v595_v4 = vunpack.c.l.bf16 %v499_v63  ;;  %v596_v5 = vunpack.c.h.bf16 %v499_v63  ;;  %v601_v9 = vunpack.c.l.bf16 %v502_v6  ;;  %v602_v11 = vunpack.c.h.bf16 %v502_v6  ;;  %v515_v63 = vld [vmem:[%s5439_s17 + $0x180] sm:$0xff]  ;;  %v518_v6 = vld [vmem:[%s5439_s17 + $0x198] sm:$0xff] }
  0x71   : > { %1004 = vadd.xlane.f32.xlu1 %v798_v50  ;;  %1002 = vadd.xlane.f32.xlu0 %v797_v51  ;;  %v814_v50 = vadd.f32 %v586_v43, %v585_v41  ;;  %v813_v51 = vadd.f32 %v584_v45, %v583_v44  ;;  %v599_v12 = vunpack.c.l.bf16 %v501_v7  ;;  %v600_v13 = vunpack.c.h.bf16 %v501_v7  ;;  %v517_v7 = vld [vmem:[%s5439_s17 + $0x190] sm:$0xff] }
  0x72   : > { %v605_v16 = vunpack.c.l.bf16 %v504_v14  ;;  %v606_v17 = vunpack.c.h.bf16 %v504_v14  ;;  %v603_v20 = vunpack.c.l.bf16 %v503_v15  ;;  %v604_v21 = vunpack.c.h.bf16 %v503_v15  ;;  %v520_v14 = vld [vmem:[%s5439_s17 + $0x1a8] sm:$0xff]  ;;  %v519_v15 = vld [vmem:[%s5439_s17 + $0x1a0] sm:$0xff] }
  0x73   : > { %v609_v25 = vunpack.c.l.bf16 %v506_v22  ;;  %v610_v27 = vunpack.c.h.bf16 %v506_v22  ;;  %v607_v28 = vunpack.c.l.bf16 %v505_v23  ;;  %v608_v29 = vunpack.c.h.bf16 %v505_v23  ;;  %v522_v22 = vld [vmem:[%s5439_s17 + $0x1b8] sm:$0xff]  ;;  %v521_v23 = vld [vmem:[%s5439_s17 + $0x1b0] sm:$0xff] }
  0x74   : > { %v613_v32 = vunpack.c.l.bf16 %v508_v30  ;;  %v614_v33 = vunpack.c.h.bf16 %v508_v30  ;;  %v611_v36 = vunpack.c.l.bf16 %v507_v31  ;;  %v612_v37 = vunpack.c.h.bf16 %v507_v31  ;;  %v524_v30 = vld [vmem:[%s5439_s17 + $0x1c8] sm:$0xff]  ;;  %v523_v31 = vld [vmem:[%s5439_s17 + $0x1c0] sm:$0xff] }
  0x75   : > { %1008 = vadd.xlane.f32.xlu1 %v800_v56  ;;  %1006 = vadd.xlane.f32.xlu0 %v799_v58  ;;  %v816_v56 = vadd.f32 %v590_v49, %v589_v48  ;;  %v815_v58 = vadd.f32 %v588_v53, %v587_v52  ;;  %v617_v41 = vunpack.c.l.bf16 %v510_v38  ;;  %v618_v43 = vunpack.c.h.bf16 %v510_v38  ;;  %v526_v38 = vld [vmem:[%s5439_s17 + $0x1d8] sm:$0xff] }
  0x76   : > { %v615_v44 = vunpack.c.l.bf16 %v509_v39  ;;  %v616_v45 = vunpack.c.h.bf16 %v509_v39  ;;  %v621_v48 = vunpack.c.l.bf16 %v512_v46  ;;  %v622_v49 = vunpack.c.h.bf16 %v512_v46  ;;  %v525_v39 = vld [vmem:[%s5439_s17 + $0x1d0] sm:$0xff]  ;;  %v528_v46 = vld [vmem:[%s5439_s17 + $0x1e8] sm:$0xff] }
  0x77   : > { %v619_v52 = vunpack.c.l.bf16 %v511_v47  ;;  %v620_v53 = vunpack.c.h.bf16 %v511_v47  ;;  %v527_v47 = vld [vmem:[%s5439_s17 + $0x1e0] sm:$0xff]  ;;  %vm4561_vm2 = vcmask 261312   ;;  %vm4568_vm3 = vcmask 326912  }
  0x78   : > { %vm4575_vm4 = vcmask 392512   ;;  %vm4582_vm5 = vcmask 458112   ;;  %vm4589_vm6 = vcmask 523712   ;;  %vm4596_vm7 = vcmask 589312  }
  0x79   : > { %1012 = vadd.xlane.f32.xlu1 %v802_v2  ;;  %1010 = vadd.xlane.f32.xlu0 %v801_v3  ;;  %v818_v2 = vadd.f32 %v594_v59, %v593_v57  ;;  %v817_v3 = vadd.f32 %v592_v61, %v591_v60  ;;  %v625_v57 = vunpack.c.l.bf16 %v514_v54  ;;  %v626_v59 = vunpack.c.h.bf16 %v514_v54  ;;  %v530_v54 = vld [vmem:[%s5439_s17 + $0x1f8] sm:$0xff] }
  0x7a   : > { %v623_v60 = vunpack.c.l.bf16 %v513_v55  ;;  %v624_v61 = vunpack.c.h.bf16 %v513_v55  ;;  %v529_v55 = vld [vmem:[%s5439_s17 + $0x1f0] sm:$0xff]  ;;  %vm4603_vm8 = vcmask 654912   ;;  %vm4610_vm9 = vcmask 720512   ;;  %s378_s17 = scalar_lea.vmem [#allocation8], %s5069_s24 }
  0x7b   : > { %vm4617_vm10 = vcmask 786112   ;;  %vm4624_vm11 = vcmask 851712   ;;  %vm4631_vm12 = vcmask 917312   ;;  %vm4638_vm13 = vcmask 982912   ;;  %s4914_s26 = sshll.u32 %s378_s17, 4  ;;  %s7694_s26 = int_to_ptr.vmem [resolvable:$true] %s4914_s26 }
  0x7c   : > { %vm4645_vm14 = vcmask 1048512   ;;  %vm4884_vm15 = vcmask 1041409   ;;  %s5189_s10 = scalar_lea.vmem %s7694_s26, 64 }
  0x7d   : > { %1016 = vadd.xlane.f32.xlu1 %v804_v8  ;;  %1014 = vadd.xlane.f32.xlu0 %v803_v10  ;;  %v820_v8 = vadd.f32 %v598_v1, %v597_v0  ;;  %v819_v10 = vadd.f32 %v596_v5, %v595_v4  ;;  %v629_v0 = vunpack.c.l.bf16 %v516_v62  ;;  %v630_v1 = vunpack.c.h.bf16 %v516_v62  ;;  %p5190_p9 = scmp.ne.s32.totalorder %s7694_s26, %s5189_s10 }
  0x7e   : > { %v627_v4 = vunpack.c.l.bf16 %v515_v63  ;;  %v628_v5 = vunpack.c.h.bf16 %v515_v63 }
  0x7f   : > { %p5191_p5 = pnand %p5190_p9, %p8473_p11 }
  0x81   : > { %1020 = vadd.xlane.f32.xlu1 %v806_v18  ;;  %1018 = vadd.xlane.f32.xlu0 %v805_v19  ;;  %v822_v18 = vadd.f32 %v602_v11, %v601_v9  ;;  %v821_v19 = vadd.f32 %v600_v13, %v599_v12  ;;  %v633_v9 = vunpack.c.l.bf16 %v518_v6  ;;  %v634_v11 = vunpack.c.h.bf16 %v518_v6  ;;  %p5192_p6 = pneg %p5191_p5 }
  0x82   : > { %v631_v12 = vunpack.c.l.bf16 %v517_v7  ;;  %v632_v13 = vunpack.c.h.bf16 %v517_v7 }
  0x85   : > { %1024 = vadd.xlane.f32.xlu1 %v808_v24  ;;  %1022 = vadd.xlane.f32.xlu0 %v807_v26  ;;  %v824_v24 = vadd.f32 %v606_v17, %v605_v16  ;;  %v823_v26 = vadd.f32 %v604_v21, %v603_v20  ;;  %v637_v16 = vunpack.c.l.bf16 %v520_v14  ;;  %v638_v17 = vunpack.c.h.bf16 %v520_v14 }
  0x86   : > { %v635_v20 = vunpack.c.l.bf16 %v519_v15  ;;  %v636_v21 = vunpack.c.h.bf16 %v519_v15 }
  0x89   : > { %1028 = vadd.xlane.f32.xlu1 %v810_v34  ;;  %1026 = vadd.xlane.f32.xlu0 %v809_v35  ;;  %v826_v34 = vadd.f32 %v610_v27, %v609_v25  ;;  %v825_v35 = vadd.f32 %v608_v29, %v607_v28  ;;  %v641_v25 = vunpack.c.l.bf16 %v522_v22  ;;  %v642_v27 = vunpack.c.h.bf16 %v522_v22 }
  0x8a   : > { %v639_v28 = vunpack.c.l.bf16 %v521_v23  ;;  %v640_v29 = vunpack.c.h.bf16 %v521_v23 }
  0x8d   : > { %1032 = vadd.xlane.f32.xlu1 %v812_v40  ;;  %1030 = vadd.xlane.f32.xlu0 %v811_v42  ;;  %v828_v40 = vadd.f32 %v614_v33, %v613_v32  ;;  %v827_v42 = vadd.f32 %v612_v37, %v611_v36  ;;  %v645_v32 = vunpack.c.l.bf16 %v524_v30  ;;  %v646_v33 = vunpack.c.h.bf16 %v524_v30 }
  0x8e   : > { %v643_v36 = vunpack.c.l.bf16 %v523_v31  ;;  %v644_v37 = vunpack.c.h.bf16 %v523_v31 }
  0x91   : > { %1036 = vadd.xlane.f32.xlu1 %v814_v50  ;;  %1034 = vadd.xlane.f32.xlu0 %v813_v51  ;;  %v830_v50 = vadd.f32 %v618_v43, %v617_v41  ;;  %v829_v51 = vadd.f32 %v616_v45, %v615_v44  ;;  %v649_v41 = vunpack.c.l.bf16 %v526_v38  ;;  %v650_v43 = vunpack.c.h.bf16 %v526_v38 }
  0x92   : > { %v647_v44 = vunpack.c.l.bf16 %v525_v39  ;;  %v648_v45 = vunpack.c.h.bf16 %v525_v39 }
  0x95   : > { %1040 = vadd.xlane.f32.xlu1 %v816_v56  ;;  %1038 = vadd.xlane.f32.xlu0 %v815_v58  ;;  %v832_v56 = vadd.f32 %v622_v49, %v621_v48  ;;  %v831_v58 = vadd.f32 %v620_v53, %v619_v52  ;;  %v653_v48 = vunpack.c.l.bf16 %v528_v46  ;;  %v654_v49 = vunpack.c.h.bf16 %v528_v46 }
  0x96   : > { %v651_v52 = vunpack.c.l.bf16 %v527_v47  ;;  %v652_v53 = vunpack.c.h.bf16 %v527_v47 }
  0x99   : > { %1044 = vadd.xlane.f32.xlu1 %v818_v2  ;;  %1042 = vadd.xlane.f32.xlu0 %v817_v3  ;;  %v834_v2 = vadd.f32 %v626_v59, %v625_v57  ;;  %v833_v3 = vadd.f32 %v624_v61, %v623_v60  ;;  %v657_v57 = vunpack.c.l.bf16 %v530_v54  ;;  %v658_v59 = vunpack.c.h.bf16 %v530_v54 }
  0x9a   : > { %v655_v60 = vunpack.c.l.bf16 %v529_v55  ;;  %v656_v61 = vunpack.c.h.bf16 %v529_v55 }
  0x9b   : > { %v850_v62 = vadd.f32 %v658_v59, %v657_v57 }
  0x9c   : > { %v849_v63 = vadd.f32 %v656_v61, %v655_v60 }
  0x9d   : > { %1048 = vadd.xlane.f32.xlu1 %v820_v8  ;;  %1046 = vadd.xlane.f32.xlu0 %v819_v10  ;;  %v836_v8 = vadd.f32 %v630_v1, %v629_v0  ;;  %v835_v10 = vadd.f32 %v628_v5, %v627_v4  ;;  %v7751_v0 = vlaneseq }
  0x9f   : > { %v5521_v1 = vshrl.u32 %v7751_v0, 7 }
  0xa1   : > { %1052 = vadd.xlane.f32.xlu1 %v822_v18  ;;  %1050 = vadd.xlane.f32.xlu0 %v821_v19  ;;  %v838_v18 = vadd.f32 %v634_v11, %v633_v9  ;;  %v837_v19 = vadd.f32 %v632_v13, %v631_v12  ;;  %7923 = vst [vmem:[#allocation16_spill] sm:$0xff] %v5521_v1 }
  0xa5   : > { %1056 = vadd.xlane.f32.xlu1 %v824_v24  ;;  %1054 = vadd.xlane.f32.xlu0 %v823_v26  ;;  %v840_v24 = vadd.f32 %v638_v17, %v637_v16  ;;  %v839_v26 = vadd.f32 %v636_v21, %v635_v20 }
  0xa9   : > { %1060 = vadd.xlane.f32.xlu1 %v826_v34  ;;  %1058 = vadd.xlane.f32.xlu0 %v825_v35  ;;  %v842_v34 = vadd.f32 %v642_v27, %v641_v25  ;;  %v841_v35 = vadd.f32 %v640_v29, %v639_v28  ;;  %v1174_v29 = vld [vmem:[%s396_s9] sm:$0x3] }
  0xad   : > { %1064 = vadd.xlane.f32.xlu1 %v828_v40  ;;  %1062 = vadd.xlane.f32.xlu0 %v827_v42  ;;  %v844_v40 = vadd.f32 %v646_v33, %v645_v32  ;;  %v843_v42 = vadd.f32 %v644_v37, %v643_v36  ;;  %v1175_v32 = vadd.f32 1e-05, %v1174_v29 }
  0xaf   : > { %5159 = vrsqrt.f32 %v1175_v32 }
  0xb1   : > { %1068 = vadd.xlane.f32.xlu1 %v830_v50  ;;  %1066 = vadd.xlane.f32.xlu0 %v829_v51  ;;  %v846_v50 = vadd.f32 %v650_v43, %v649_v41  ;;  %v845_v51 = vadd.f32 %v648_v45, %v647_v44 }
  0xb5   : > { %1072 = vadd.xlane.f32.xlu1 %v832_v56  ;;  %1070 = vadd.xlane.f32.xlu0 %v831_v58  ;;  %v848_v56 = vadd.f32 %v654_v49, %v653_v48  ;;  %v847_v58 = vadd.f32 %v652_v53, %v651_v52 }
  0xb9   : > { %1076 = vadd.xlane.f32.xlu1 %v834_v2  ;;  %1074 = vadd.xlane.f32.xlu0 %v833_v3  ;;  %v5528_v2 = vsub.s32 0, %v5521_v1  ;;  %v1177_v3 = vld [vmem:[%s391_s13] sm:$0x3]  ;;  %v5160_v39 = vpop.eup %5159  ;;  %s5193_s13 = sshll.u32 %s5286_s11, 4  ;;  %s5194_s13 = int_to_ptr.vmem [resolvable:$false] %s5193_s13 }
  0xba   : > { %s5195_s0 = scalar_lea.vmem %s5194_s13, 128  ;;  %p5196_p7 = scmp.lt.s32.totalorder %s7694_s26, %s5194_s13 }
  0xbb   : > { %v1182_v4 = vrot.slane %v1177_v3, %v5528_v2  ;;  %p5197_p10 = scmp.lt.s32.totalorder %s5195_s0, %s5189_s10 }
  0xbd   : > { %1080 = vadd.xlane.f32.xlu1 %v836_v8  ;;  %1078 = vadd.xlane.f32.xlu0 %v835_v10  ;;  %p5198_p13 = por %p5197_p10, %p5196_p7 }
  0xbf   : > { %p5199_p0 = pnand %p5198_p13, %p5192_p6 }
  0xc1   : > { %1084 = vadd.xlane.f32.xlu1 %v838_v18  ;;  %1082 = vadd.xlane.f32.xlu0 %v837_v19  ;;  %v5560_v19 = vsub.s32 1, %v5521_v1 }
  0xc3   : > { %v1186_v22 = vrot.slane %v1177_v3, %v5560_v19  ;;  %v1417_v59 = vrot.slane %v5160_v39, %v5560_v19 }
  0xc5   : > { %1088 = vadd.xlane.f32.xlu1 %v840_v24  ;;  %1086 = vadd.xlane.f32.xlu0 %v839_v26 }
  0xc9   : > { %1092 = vadd.xlane.f32.xlu1 %v842_v34  ;;  %1090 = vadd.xlane.f32.xlu0 %v841_v35 }
  0xcd   : > { %1096 = vadd.xlane.f32.xlu1 %v844_v40  ;;  %1094 = vadd.xlane.f32.xlu0 %v843_v42  ;;  %v1413_v42 = vrot.slane %v5160_v39, %v5528_v2 }
  0xd1   : > { %1100 = vadd.xlane.f32.xlu1 %v846_v50  ;;  %1098 = vadd.xlane.f32.xlu0 %v845_v51 }
  0xd5   : > { %1104 = vadd.xlane.f32.xlu1 %v848_v56  ;;  %1102 = vadd.xlane.f32.xlu0 %v847_v58 }
  0xd9   : > { %1108 = vadd.xlane.f32.xlu1 %v850_v62  ;;  %1106 = vadd.xlane.f32.xlu0 %v849_v63 }
  0xea   : > { %v5531_v5 = vpop.xlane.xlu1 %986  ;;  %v5533_v6 = vpop.xlane.xlu0 %982  ;;  %1192 = vbcast.lane.b32.xlu1 %v1182_v4, 264 }
  0xee   : > { %v5535_v7 = vpop.xlane.xlu1 %988  ;;  %v5537_v8 = vpop.xlane.xlu0 %984  ;;  %1196 = vbcast.lane.b32.xlu1 %v1182_v4, 272 }
  0xef   : > { %1188 = vbcast.lane.b32.xlu0 %v1182_v4, 256 }
  0xf2   : > { %v5539_v9 = vpop.xlane.xlu1 %992  ;;  %v5541_v10 = vpop.xlane.xlu0 %990  ;;  %1200 = vbcast.lane.b32.xlu1 %v1182_v4, 280 }
  0xf3   : > { %1204 = vbcast.lane.b32.xlu0 %v1182_v4, 288 }
  0xf6   : > { %v5543_v11 = vpop.xlane.xlu1 %996  ;;  %v5545_v12 = vpop.xlane.xlu0 %994  ;;  %1208 = vbcast.lane.b32.xlu1 %v1182_v4, 296 }
  0xf7   : > { %1212 = vbcast.lane.b32.xlu0 %v1182_v4, 304 }
  0xfa   : > { %v5547_v13 = vpop.xlane.xlu1 %1000  ;;  %v5549_v14 = vpop.xlane.xlu0 %998  ;;  %1216 = vbcast.lane.b32.xlu1 %v1182_v4, 312 }
  0xfb   : > { %1220 = vbcast.lane.b32.xlu0 %v1182_v4, 320 }
  0xfe   : > { %v5551_v15 = vpop.xlane.xlu1 %1004  ;;  %v5553_v16 = vpop.xlane.xlu0 %1002  ;;  %1224 = vbcast.lane.b32.xlu1 %v1182_v4, 328 }
  0xff   : > { %1228 = vbcast.lane.b32.xlu0 %v1182_v4, 336 }
 0x102   : > { %v5555_v17 = vpop.xlane.xlu1 %1008  ;;  %v5557_v18 = vpop.xlane.xlu0 %1006  ;;  %1232 = vbcast.lane.b32.xlu1 %v1182_v4, 344 }
 0x103   : > { %1236 = vbcast.lane.b32.xlu0 %v1182_v4, 352 }
 0x106   : > { %v5562_v20 = vpop.xlane.xlu1 %1012  ;;  %v5564_v21 = vpop.xlane.xlu0 %1010  ;;  %1240 = vbcast.lane.b32.xlu1 %v1182_v4, 360 }
 0x107   : > { %1244 = vbcast.lane.b32.xlu0 %v1182_v4, 368 }
 0x10a   : > { %v5567_v23 = vpop.xlane.xlu1 %1016  ;;  %v5569_v24 = vpop.xlane.xlu0 %1014  ;;  %1248 = vbcast.lane.b32.xlu1 %v1182_v4, 376 }
 0x10b   : > { %1251 = vbcast.lane.b32.xlu0 %v1186_v22, 256 }
 0x10e   : > { %v5571_v25 = vpop.xlane.xlu1 %1020  ;;  %v5573_v26 = vpop.xlane.xlu0 %1018  ;;  %1255 = vbcast.lane.b32.xlu1 %v1186_v22, 264 }
 0x10f   : > { %1259 = vbcast.lane.b32.xlu0 %v1186_v22, 272 }
 0x112   : > { %v5579_v27 = vpop.xlane.xlu1 %1024  ;;  %v5581_v28 = vpop.xlane.xlu0 %1022  ;;  %1263 = vbcast.lane.b32.xlu1 %v1186_v22, 280 }
 0x113   : > { %1267 = vbcast.lane.b32.xlu0 %v1186_v22, 288 }
 0x116   : > { %v5583_v30 = vpop.xlane.xlu1 %1028  ;;  %v5585_v31 = vpop.xlane.xlu0 %1026  ;;  %1271 = vbcast.lane.b32.xlu1 %v1186_v22, 296 }
 0x117   : > { %1275 = vbcast.lane.b32.xlu0 %v1186_v22, 304 }
 0x11a   : > { %v5587_v33 = vpop.xlane.xlu1 %1032  ;;  %v5589_v34 = vpop.xlane.xlu0 %1030  ;;  %1279 = vbcast.lane.b32.xlu1 %v1186_v22, 312 }
 0x11b   : > { %1283 = vbcast.lane.b32.xlu0 %v1186_v22, 320 }
 0x11e   : > { %v5591_v35 = vpop.xlane.xlu1 %1036  ;;  %v5593_v36 = vpop.xlane.xlu0 %1034  ;;  %1287 = vbcast.lane.b32.xlu1 %v1186_v22, 328 }
 0x11f   : > { %1291 = vbcast.lane.b32.xlu0 %v1186_v22, 336 }
 0x122   : > { %v5595_v37 = vpop.xlane.xlu1 %1040  ;;  %v5597_v38 = vpop.xlane.xlu0 %1038  ;;  %1295 = vbcast.lane.b32.xlu1 %v1186_v22, 344 }
 0x123   : > { %1299 = vbcast.lane.b32.xlu0 %v1186_v22, 352 }
 0x126   : > { %v5599_v40 = vpop.xlane.xlu1 %1044  ;;  %v5601_v41 = vpop.xlane.xlu0 %1042  ;;  %1303 = vbcast.lane.b32.xlu1 %v1186_v22, 360 }
 0x127   : > { %1307 = vbcast.lane.b32.xlu0 %v1186_v22, 368 }
 0x12a   : > { %v5604_v43 = vpop.xlane.xlu1 %1048  ;;  %v5606_v44 = vpop.xlane.xlu0 %1046  ;;  %1311 = vbcast.lane.b32.xlu1 %v1186_v22, 376 }
 0x12b   : > { %1419 = vbcast.lane.b32.xlu0 %v1413_v42, 256 }
 0x12e   : > { %v5608_v45 = vpop.xlane.xlu1 %1052  ;;  %v5610_v46 = vpop.xlane.xlu0 %1050  ;;  %1423 = vbcast.lane.b32.xlu1 %v1413_v42, 264 }
 0x12f   : > { %1427 = vbcast.lane.b32.xlu0 %v1413_v42, 272 }
 0x132   : > { %v5612_v47 = vpop.xlane.xlu1 %1056  ;;  %v5614_v48 = vpop.xlane.xlu0 %1054  ;;  %1431 = vbcast.lane.b32.xlu1 %v1413_v42, 280 }
 0x133   : > { %1435 = vbcast.lane.b32.xlu0 %v1413_v42, 288 }
 0x136   : > { %v5616_v49 = vpop.xlane.xlu1 %1060  ;;  %v5618_v50 = vpop.xlane.xlu0 %1058  ;;  %1439 = vbcast.lane.b32.xlu1 %v1413_v42, 296 }
 0x137   : > { %1443 = vbcast.lane.b32.xlu0 %v1413_v42, 304 }
 0x13a   : > { %v5620_v51 = vpop.xlane.xlu1 %1064  ;;  %v5622_v52 = vpop.xlane.xlu0 %1062  ;;  %1447 = vbcast.lane.b32.xlu1 %v1413_v42, 312 }
 0x13b   : > { %1451 = vbcast.lane.b32.xlu0 %v1413_v42, 320 }
 0x13e   : > { %v5624_v53 = vpop.xlane.xlu1 %1068  ;;  %v5626_v54 = vpop.xlane.xlu0 %1066  ;;  %1455 = vbcast.lane.b32.xlu1 %v1413_v42, 328 }
 0x13f   : > { %1459 = vbcast.lane.b32.xlu0 %v1413_v42, 336 }
 0x142   : > { %v5628_v55 = vpop.xlane.xlu1 %1072  ;;  %v5630_v56 = vpop.xlane.xlu0 %1070  ;;  %1463 = vbcast.lane.b32.xlu1 %v1413_v42, 344 }
 0x143   : > { %1467 = vbcast.lane.b32.xlu0 %v1413_v42, 352 }
 0x146   : > { %v5632_v57 = vpop.xlane.xlu1 %1076  ;;  %v5634_v58 = vpop.xlane.xlu0 %1074  ;;  %1471 = vbcast.lane.b32.xlu1 %v1413_v42, 360 }
 0x147   : > { %1475 = vbcast.lane.b32.xlu0 %v1413_v42, 368 }
 0x14a   : > { %v5637_v60 = vpop.xlane.xlu1 %1080  ;;  %v5639_v61 = vpop.xlane.xlu0 %1078  ;;  %1479 = vbcast.lane.b32.xlu1 %v1413_v42, 376 }
 0x14b   : > { %1482 = vbcast.lane.b32.xlu0 %v1417_v59, 256 }
 0x14e   : > { %v5641_v62 = vpop.xlane.xlu1 %1084  ;;  %v5643_v63 = vpop.xlane.xlu0 %1082  ;;  %1486 = vbcast.lane.b32.xlu1 %v1417_v59, 264 }
 0x14f   : > { %7924 = vst [vmem:[#allocation17_spill] sm:$0xff] %v5643_v63  ;;  %1490 = vbcast.lane.b32.xlu0 %v1417_v59, 272 }
 0x152   : > { %v5645_v3 = vpop.xlane.xlu1 %1088  ;;  %v5647_v4 = vpop.xlane.xlu0 %1086  ;;  %1494 = vbcast.lane.b32.xlu1 %v1417_v59, 280 }
 0x153   : > { %7925 = vst [vmem:[#allocation18_spill] sm:$0xff] %v5645_v3  ;;  %7926 = vst [vmem:[#allocation19_spill] sm:$0xff] %v5647_v4  ;;  %1498 = vbcast.lane.b32.xlu0 %v1417_v59, 288 }
 0x156   : > { %v5649_v22 = vpop.xlane.xlu1 %1092  ;;  %v5651_v29 = vpop.xlane.xlu0 %1090  ;;  %1502 = vbcast.lane.b32.xlu1 %v1417_v59, 296 }
 0x157   : > { %7927 = vst [vmem:[#allocation20_spill] sm:$0xff] %v5649_v22  ;;  %7928 = vst [vmem:[#allocation21_spill] sm:$0xff] %v5651_v29  ;;  %1506 = vbcast.lane.b32.xlu0 %v1417_v59, 304  ;;  %v1640_v29 = vld [vmem:[%s5447_s12] sm:$0x3] }
 0x15a   : > { %v5653_v32 = vpop.xlane.xlu1 %1096  ;;  %v5655_v39 = vpop.xlane.xlu0 %1094  ;;  %1510 = vbcast.lane.b32.xlu1 %v1417_v59, 312 }
 0x15b   : > { %7929 = vst [vmem:[#allocation22_spill] sm:$0xff] %v5653_v32  ;;  %7930 = vst [vmem:[#allocation23_spill] sm:$0xff] %v5655_v39  ;;  %1514 = vbcast.lane.b32.xlu0 %v1417_v59, 320  ;;  %v1645_v39 = vrot.slane %v1640_v29, %v5528_v2 }
 0x15e   : > { %v5657_v42 = vpop.xlane.xlu1 %1100  ;;  %v5659_v0 = vpop.xlane.xlu0 %1098  ;;  %1518 = vbcast.lane.b32.xlu1 %v1417_v59, 328 }
 0x15f   : > { %7931 = vst [vmem:[#allocation24_spill] sm:$0xff] %v5657_v42  ;;  %7932 = vst [vmem:[#allocation25_spill] sm:$0xff] %v5659_v0  ;;  %1522 = vbcast.lane.b32.xlu0 %v1417_v59, 336 }
 0x162   : > { %v5661_v1 = vpop.xlane.xlu1 %1104  ;;  %v5663_v22 = vpop.xlane.xlu0 %1102  ;;  %1526 = vbcast.lane.b32.xlu1 %v1417_v59, 344 }
 0x163   : > { %7933 = vst [vmem:[#allocation26_spill] sm:$0xff] %v5661_v1  ;;  %7934 = vst [vmem:[#allocation27_spill] sm:$0xff] %v5663_v22  ;;  %1530 = vbcast.lane.b32.xlu0 %v1417_v59, 352 }
 0x166   : > { %v5666_v4 = vpop.xlane.xlu1 %1108  ;;  %v5668_v32 = vpop.xlane.xlu0 %1106  ;;  %1534 = vbcast.lane.b32.xlu1 %v1417_v59, 360 }
 0x167   : > { %7935 = vst [vmem:[#allocation28_spill] sm:$0xff] %v5666_v4  ;;  %7936 = vst [vmem:[#allocation29_spill] sm:$0xff] %v5668_v32  ;;  %1538 = vbcast.lane.b32.xlu0 %v1417_v59, 368 }
 0x16a   : > { %v5671_v42 = vpop.permute.xlu1 %1192  ;;  %v5673_v0 = vpop.permute.xlu0 %1188  ;;  %1542 = vbcast.lane.b32.xlu1 %v1417_v59, 376 }
 0x16b   : > { %7937 = vst [vmem:[#allocation30_spill] sm:$0xff] %v5671_v42  ;;  %7938 = vst [vmem:[#allocation31_spill] sm:$0xff] %v5673_v0  ;;  %1651 = vbcast.lane.b32.xlu0 %v1645_v39, 256 }
 0x16e   : > { %v5675_v1 = vpop.permute.xlu1 %1196  ;;  %v5677_v22 = vpop.permute.xlu0 %1204  ;;  %1655 = vbcast.lane.b32.xlu1 %v1645_v39, 264 }
 0x16f   : > { %7939 = vst [vmem:[#allocation32_spill] sm:$0xff] %v5675_v1  ;;  %7940 = vst [vmem:[#allocation33_spill] sm:$0xff] %v5677_v22  ;;  %1659 = vbcast.lane.b32.xlu0 %v1645_v39, 272 }
 0x172   : > { %v5679_v3 = vpop.permute.xlu1 %1200  ;;  %v5681_v4 = vpop.permute.xlu0 %1212  ;;  %1663 = vbcast.lane.b32.xlu1 %v1645_v39, 280 }
 0x173   : > { %7941 = vst [vmem:[#allocation34_spill] sm:$0xff] %v5679_v3  ;;  %7942 = vst [vmem:[#allocation35_spill] sm:$0xff] %v5681_v4  ;;  %1667 = vbcast.lane.b32.xlu0 %v1645_v39, 288 }
 0x176   : > { %v5683_v32 = vpop.permute.xlu1 %1208  ;;  %v5685_v63 = vpop.permute.xlu0 %1220  ;;  %1671 = vbcast.lane.b32.xlu1 %v1645_v39, 296 }
 0x177   : > { %7943 = vst [vmem:[#allocation36_spill] sm:$0xff] %v5683_v32  ;;  %7944 = vst [vmem:[#allocation37_spill] sm:$0xff] %v5685_v63  ;;  %1675 = vbcast.lane.b32.xlu0 %v1645_v39, 304 }
 0x17a   : > { %v5687_v59 = vpop.permute.xlu1 %1216  ;;  %v5689_v0 = vpop.permute.xlu0 %1228  ;;  %1679 = vbcast.lane.b32.xlu1 %v1645_v39, 312 }
 0x17b   : > { %7945 = vst [vmem:[#allocation38_spill] sm:$0xff] %v5687_v59  ;;  %7946 = vst [vmem:[#allocation39_spill] sm:$0xff] %v5689_v0  ;;  %1683 = vbcast.lane.b32.xlu0 %v1645_v39, 320  ;;  %v1649_v0 = vrot.slane %v1640_v29, %v5560_v19 }
 0x17e   : > { %v5691_v22 = vpop.permute.xlu1 %1224  ;;  %v5693_v1 = vpop.permute.xlu0 %1236  ;;  %1687 = vbcast.lane.b32.xlu1 %v1645_v39, 328  ;;  %v8086_v42 = vld [vmem:[#allocation36_spill] sm:$0xff] }
 0x17f   : > { %7947 = vst [vmem:[#allocation40_spill] sm:$0xff] %v5691_v22  ;;  %7948 = vst [vmem:[#allocation41_spill] sm:$0xff] %v5693_v1  ;;  %1691 = vbcast.lane.b32.xlu0 %v1645_v39, 336 }
 0x182   : > { %v5695_v4 = vpop.permute.xlu1 %1232  ;;  %v5697_v3 = vpop.permute.xlu0 %1244  ;;  %1695 = vbcast.lane.b32.xlu1 %v1645_v39, 344 }
 0x183   : > { %7949 = vst [vmem:[#allocation42_spill] sm:$0xff] %v5695_v4  ;;  %7950 = vst [vmem:[#allocation43_spill] sm:$0xff] %v5697_v3  ;;  %1699 = vbcast.lane.b32.xlu0 %v1645_v39, 352 }
 0x186   : > { %v5699_v63 = vpop.permute.xlu1 %1240  ;;  %v5701_v32 = vpop.permute.xlu0 %1251  ;;  %1703 = vbcast.lane.b32.xlu1 %v1645_v39, 360 }
 0x187   : > { %7951 = vst [vmem:[#allocation44_spill] sm:$0xff] %v5699_v63  ;;  %7952 = vst [vmem:[#allocation45_spill] sm:$0xff] %v5701_v32  ;;  %1707 = vbcast.lane.b32.xlu0 %v1645_v39, 368 }
 0x18a   : > { %v5704_v59 = vpop.permute.xlu1 %1248  ;;  %v5706_v22 = vpop.permute.xlu0 %1259  ;;  %1711 = vbcast.lane.b32.xlu1 %v1645_v39, 376 }
 0x18b   : > { %7953 = vst [vmem:[#allocation46_spill] sm:$0xff] %v5704_v59  ;;  %7954 = vst [vmem:[#allocation47_spill] sm:$0xff] %v5706_v22  ;;  %1714 = vbcast.lane.b32.xlu0 %v1649_v0, 256 }
 0x18e   : > { %v5708_v1 = vpop.permute.xlu1 %1255  ;;  %v5710_v4 = vpop.permute.xlu0 %1267  ;;  %1718 = vbcast.lane.b32.xlu1 %v1649_v0, 264 }
 0x18f   : > { %7955 = vst [vmem:[#allocation48_spill] sm:$0xff] %v5708_v1  ;;  %7956 = vst [vmem:[#allocation49_spill] sm:$0xff] %v5710_v4  ;;  %1722 = vbcast.lane.b32.xlu0 %v1649_v0, 272 }
 0x192   : > { %v5712_v3 = vpop.permute.xlu1 %1263  ;;  %v5714_v32 = vpop.permute.xlu0 %1275  ;;  %1726 = vbcast.lane.b32.xlu1 %v1649_v0, 280 }
 0x193   : > { %7957 = vst [vmem:[#allocation50_spill] sm:$0xff] %v5712_v3  ;;  %7958 = vst [vmem:[#allocation51_spill] sm:$0xff] %v5714_v32  ;;  %1730 = vbcast.lane.b32.xlu0 %v1649_v0, 288 }
 0x196   : > { %v5716_v29 = vpop.permute.xlu1 %1271  ;;  %v5718_v59 = vpop.permute.xlu0 %1283  ;;  %1734 = vbcast.lane.b32.xlu1 %v1649_v0, 296 }
 0x197   : > { %7959 = vst [vmem:[#allocation52_spill] sm:$0xff] %v5716_v29  ;;  %7960 = vst [vmem:[#allocation53_spill] sm:$0xff] %v5718_v59  ;;  %1738 = vbcast.lane.b32.xlu0 %v1649_v0, 304 }
 0x19a   : > { %v5720_v39 = vpop.permute.xlu1 %1279  ;;  %v5722_v1 = vpop.permute.xlu0 %1291  ;;  %1742 = vbcast.lane.b32.xlu1 %v1649_v0, 312 }
 0x19b   : > { %7961 = vst [vmem:[#allocation54_spill] sm:$0xff] %v5720_v39  ;;  %7962 = vst [vmem:[#allocation55_spill] sm:$0xff] %v5722_v1  ;;  %1746 = vbcast.lane.b32.xlu0 %v1649_v0, 320  ;;  %v1872_v39 = vld [vmem:[%s386_s27] sm:$0x3] }
 0x19e   : > { %v5724_v4 = vpop.permute.xlu1 %1287  ;;  %v5726_v3 = vpop.permute.xlu0 %1299  ;;  %1750 = vbcast.lane.b32.xlu1 %v1649_v0, 328 }
 0x19f   : > { %7963 = vst [vmem:[#allocation56_spill] sm:$0xff] %v5724_v4  ;;  %7964 = vst [vmem:[#allocation57_spill] sm:$0xff] %v5726_v3  ;;  %1754 = vbcast.lane.b32.xlu0 %v1649_v0, 336  ;;  %v1877_v3 = vrot.slane %v1872_v39, %v5528_v2 }
 0x1a2   : > { %v5732_v29 = vpop.permute.xlu1 %1295  ;;  %v5734_v59 = vpop.permute.xlu0 %1307  ;;  %1758 = vbcast.lane.b32.xlu1 %v1649_v0, 344 }
 0x1a3   : > { %7965 = vst [vmem:[#allocation58_spill] sm:$0xff] %v5732_v29  ;;  %7966 = vst [vmem:[#allocation59_spill] sm:$0xff] %v5734_v59  ;;  %1762 = vbcast.lane.b32.xlu0 %v1649_v0, 352 }
 0x1a6   : > { %v5736_v1 = vpop.permute.xlu1 %1303  ;;  %v5738_v32 = vpop.permute.xlu0 %1419  ;;  %1766 = vbcast.lane.b32.xlu1 %v1649_v0, 360 }
 0x1a7   : > { %7967 = vst [vmem:[#allocation60_spill] sm:$0xff] %v5736_v1  ;;  %7968 = vst [vmem:[#allocation61_spill] sm:$0xff] %v5738_v32  ;;  %1770 = vbcast.lane.b32.xlu0 %v1649_v0, 368 }
 0x1aa   : > { %v5741_v4 = vpop.permute.xlu1 %1311  ;;  %v5743_v22 = vpop.permute.xlu0 %1427  ;;  %1774 = vbcast.lane.b32.xlu1 %v1649_v0, 376 }
 0x1ab   : > { %7969 = vst [vmem:[#allocation62_spill] sm:$0xff] %v5741_v4  ;;  %7970 = vst [vmem:[#allocation63_spill] sm:$0xff] %v5743_v22  ;;  %1883 = vbcast.lane.b32.xlu0 %v1877_v3, 256  ;;  %v8063_v4 = vld [vmem:[#allocation22_spill] sm:$0xff] }
 0x1ae   : > { %v5745_v29 = vpop.permute.xlu1 %1423  ;;  %v5747_v59 = vpop.permute.xlu0 %1435  ;;  %1887 = vbcast.lane.b32.xlu1 %v1877_v3, 264 }
 0x1af   : > { %7971 = vst [vmem:[#allocation64_spill] sm:$0xff] %v5745_v29  ;;  %7972 = vst [vmem:[#allocation65_spill] sm:$0xff] %v5747_v59  ;;  %1891 = vbcast.lane.b32.xlu0 %v1877_v3, 272  ;;  %v5284_v59 = vmov 0  }
 0x1b0   : > { %5157 = vset.pattern.permute.xlu0 %v5284_v59  ;;  %5158 = vset.pattern.permute.xlu1 %v5284_v59  ;;  %v1881_v59 = vrot.slane %v1872_v39, %v5560_v19 }
 0x1b2   : > { %v5749_v63 = vpop.permute.xlu1 %1431  ;;  %v5751_v1 = vpop.permute.xlu0 %1443  ;;  %1895 = vbcast.lane.b32.xlu1 %v1877_v3, 280 }
 0x1b3   : > { %7973 = vst [vmem:[#allocation66_spill] sm:$0xff] %v5749_v63  ;;  %7974 = vst [vmem:[#allocation67_spill] sm:$0xff] %v5751_v1  ;;  %1899 = vbcast.lane.b32.xlu0 %v1877_v3, 288 }
 0x1b6   : > { %v5753_v32 = vpop.permute.xlu1 %1439  ;;  %v5755_v2 = vpop.permute.xlu0 %1451  ;;  %1903 = vbcast.lane.b32.xlu1 %v1877_v3, 296 }
 0x1b7   : > { %7975 = vst [vmem:[#allocation68_spill] sm:$0xff] %v5753_v32  ;;  %7976 = vst [vmem:[#allocation69_spill] sm:$0xff] %v5755_v2  ;;  %1907 = vbcast.lane.b32.xlu0 %v1877_v3, 304 }
 0x1ba   : > { %v5757_v0 = vpop.permute.xlu1 %1447  ;;  %v5759_v22 = vpop.permute.xlu0 %1459  ;;  %1911 = vbcast.lane.b32.xlu1 %v1877_v3, 312 }
 0x1bb   : > { %7977 = vst [vmem:[#allocation70_spill] sm:$0xff] %v5757_v0  ;;  %7978 = vst [vmem:[#allocation71_spill] sm:$0xff] %v5759_v22  ;;  %1915 = vbcast.lane.b32.xlu0 %v1877_v3, 320 }
 0x1be   : > { %v5761_v63 = vpop.permute.xlu1 %1455  ;;  %v5763_v1 = vpop.permute.xlu0 %1467  ;;  %1919 = vbcast.lane.b32.xlu1 %v1877_v3, 328 }
 0x1bf   : > { %7979 = vst [vmem:[#allocation72_spill] sm:$0xff] %v5761_v63  ;;  %7980 = vst [vmem:[#allocation73_spill] sm:$0xff] %v5763_v1  ;;  %1923 = vbcast.lane.b32.xlu0 %v1877_v3, 336 }
 0x1c2   : > { %v5765_v32 = vpop.permute.xlu1 %1463  ;;  %v5767_v2 = vpop.permute.xlu0 %1475  ;;  %1927 = vbcast.lane.b32.xlu1 %v1877_v3, 344 }
 0x1c3   : > { %7981 = vst [vmem:[#allocation74_spill] sm:$0xff] %v5765_v32  ;;  %7982 = vst [vmem:[#allocation75_spill] sm:$0xff] %v5767_v2  ;;  %1931 = vbcast.lane.b32.xlu0 %v1877_v3, 352 }
 0x1c6   : > { %v5769_v0 = vpop.permute.xlu1 %1471  ;;  %v5771_v22 = vpop.permute.xlu0 %1482  ;;  %1935 = vbcast.lane.b32.xlu1 %v1877_v3, 360 }
 0x1c7   : > { %7983 = vst [vmem:[#allocation76_spill] sm:$0xff] %v5769_v0  ;;  %7984 = vst [vmem:[#allocation77_spill] sm:$0xff] %v5771_v22  ;;  %1939 = vbcast.lane.b32.xlu0 %v1877_v3, 368 }
 0x1ca   : > { %v5774_v29 = vpop.permute.xlu1 %1479  ;;  %v5776_v63 = vpop.permute.xlu0 %1490  ;;  %1943 = vbcast.lane.b32.xlu1 %v1877_v3, 376 }
 0x1cb   : > { %7985 = vst [vmem:[#allocation78_spill] sm:$0xff] %v5774_v29  ;;  %7986 = vst [vmem:[#allocation79_spill] sm:$0xff] %v5776_v63  ;;  %1946 = vbcast.lane.b32.xlu0 %v1881_v59, 256 }
 0x1ce   : > { %v5778_v1 = vpop.permute.xlu1 %1486  ;;  %v5780_v32 = vpop.permute.xlu0 %1498  ;;  %1950 = vbcast.lane.b32.xlu1 %v1881_v59, 264 }
 0x1cf   : > { %7987 = vst [vmem:[#allocation80_spill] sm:$0xff] %v5778_v1  ;;  %7988 = vst [vmem:[#allocation81_spill] sm:$0xff] %v5780_v32  ;;  %1954 = vbcast.lane.b32.xlu0 %v1881_v59, 272 }
 0x1d2   : > { %v5782_v2 = vpop.permute.xlu1 %1494  ;;  %v5784_v0 = vpop.permute.xlu0 %1506  ;;  %1958 = vbcast.lane.b32.xlu1 %v1881_v59, 280 }
 0x1d3   : > { %7989 = vst [vmem:[#allocation82_spill] sm:$0xff] %v5782_v2  ;;  %7990 = vst [vmem:[#allocation83_spill] sm:$0xff] %v5784_v0  ;;  %1962 = vbcast.lane.b32.xlu0 %v1881_v59, 288 }
 0x1d6   : > { %v5786_v22 = vpop.permute.xlu1 %1502  ;;  %v5788_v19 = vpop.permute.xlu0 %1514  ;;  %1966 = vbcast.lane.b32.xlu1 %v1881_v59, 296 }
 0x1d7   : > { %7991 = vst [vmem:[#allocation84_spill] sm:$0xff] %v5786_v22  ;;  %7992 = vst [vmem:[#allocation85_spill] sm:$0xff] %v5788_v19  ;;  %1970 = vbcast.lane.b32.xlu0 %v1881_v59, 304 }
 0x1da   : > { %v5790_v3 = vpop.permute.xlu1 %1510  ;;  %v5792_v39 = vpop.permute.xlu0 %1522  ;;  %1974 = vbcast.lane.b32.xlu1 %v1881_v59, 312 }
 0x1db   : > { %7993 = vst [vmem:[#allocation86_spill] sm:$0xff] %v5790_v3  ;;  %7994 = vst [vmem:[#allocation87_spill] sm:$0xff] %v5792_v39  ;;  %1978 = vbcast.lane.b32.xlu0 %v1881_v59, 320 }
 0x1de   : > { %v5794_v32 = vpop.permute.xlu1 %1518  ;;  %v5796_v1 = vpop.permute.xlu0 %1530  ;;  %1982 = vbcast.lane.b32.xlu1 %v1881_v59, 328 }
 0x1df   : > { %7995 = vst [vmem:[#allocation88_spill] sm:$0xff] %v5794_v32  ;;  %7996 = vst [vmem:[#allocation89_spill] sm:$0xff] %v5796_v1  ;;  %1986 = vbcast.lane.b32.xlu0 %v1881_v59, 336 }
 0x1e2   : > { %v5798_v0 = vpop.permute.xlu1 %1526  ;;  %v5800_v2 = vpop.permute.xlu0 %1538  ;;  %1990 = vbcast.lane.b32.xlu1 %v1881_v59, 344 }
 0x1e3   : > { %7997 = vst [vmem:[#allocation90_spill] sm:$0xff] %v5798_v0  ;;  %7998 = vst [vmem:[#allocation91_spill] sm:$0xff] %v5800_v2  ;;  %1994 = vbcast.lane.b32.xlu0 %v1881_v59, 352 }
 0x1e6   : > { %v5802_v19 = vpop.permute.xlu1 %1534  ;;  %v5804_v22 = vpop.permute.xlu0 %1651  ;;  %1998 = vbcast.lane.b32.xlu1 %v1881_v59, 360 }
 0x1e7   : > { %7999 = vst [vmem:[#allocation92_spill] sm:$0xff] %v5802_v19  ;;  %8000 = vst [vmem:[#allocation93_spill] sm:$0xff] %v5804_v22  ;;  %2002 = vbcast.lane.b32.xlu0 %v1881_v59, 368 }
 0x1ea   : > { %v5806_v39 = vpop.permute.xlu1 %1542  ;;  %v5808_v3 = vpop.permute.xlu0 %1659  ;;  %2006 = vbcast.lane.b32.xlu1 %v1881_v59, 376 }
 0x1eb   : > { %8001 = vst [vmem:[#allocation94_spill] sm:$0xff] %v5806_v39  ;;  %8002 = vst [vmem:[#allocation95_spill] sm:$0xff] %v5808_v3 }
 0x1ee   : > { %v5810_v1 = vpop.permute.xlu1 %1655  ;;  %v5812_v32 = vpop.permute.xlu0 %1667 }
 0x1ef   : > { %8003 = vst [vmem:[#allocation96_spill] sm:$0xff] %v5810_v1  ;;  %8004 = vst [vmem:[#allocation97_spill] sm:$0xff] %v5812_v32 }
 0x1f2   : > { %v5814_v0 = vpop.permute.xlu1 %1663  ;;  %v5816_v2 = vpop.permute.xlu0 %1675 }
 0x1f3   : > { %8005 = vst [vmem:[#allocation98_spill] sm:$0xff] %v5814_v0  ;;  %8006 = vst [vmem:[#allocation99_spill] sm:$0xff] %v5816_v2  ;;  %v8059_v2 = vld [vmem:[#allocation20_spill] sm:$0xff] }
 0x1f6   : > { %v5818_v63 = vpop.permute.xlu1 %1671  ;;  %v5820_v19 = vpop.permute.xlu0 %1683 }
 0x1f7   : > { %8007 = vst [vmem:[#allocation100_spill] sm:$0xff] %v5818_v63  ;;  %8008 = vst [vmem:[#allocation101_spill] sm:$0xff] %v5820_v19  ;;  %v5839_v63 = vmul.f32 0.0051020407, %v5531_v5  ;;  %v5842_v19 = vmul.f32 0.0051020407, %v5533_v6 }
 0x1f8   : > { %v5860_v5 = vmul.f32 0.0051020407, %v5545_v12  ;;  %v5863_v6 = vmul.f32 0.0051020407, %v5547_v13  ;;  %v5882_v12 = vmul.f32 0.0051020407, %v5557_v18 }
 0x1f9   : > { %v5885_v13 = vmul.f32 0.0051020407, %v5562_v20  ;;  %v5903_v18 = vmul.f32 0.0051020407, %v5579_v27  ;;  %v5906_v20 = vmul.f32 0.0051020407, %v5581_v28 }
 0x1fa   : > { %v5822_v29 = vpop.permute.xlu1 %1679  ;;  %v5824_v22 = vpop.permute.xlu0 %1691  ;;  %8021 = vst [vmem:[#allocation114_spill] sm:$0xff] %v5860_v5  ;;  %v5925_v27 = vmul.f32 0.0051020407, %v5591_v35  ;;  %v5928_v28 = vmul.f32 0.0051020407, %v5593_v36  ;;  %v8089_v5 = vld [vmem:[#allocation39_spill] sm:$0xff] }
 0x1fb   : > { %8009 = vst [vmem:[#allocation102_spill] sm:$0xff] %v5822_v29  ;;  %8010 = vst [vmem:[#allocation103_spill] sm:$0xff] %v5824_v22  ;;  %v5845_v22 = vmul.f32 0.0051020407, %v5535_v7  ;;  %v5866_v7 = vmul.f32 0.0051020407, %v5549_v14 }
 0x1fc   : > { %v5888_v14 = vmul.f32 0.0051020407, %v5564_v21  ;;  %8030 = vst [vmem:[#allocation123_spill] sm:$0xff] %v5903_v18  ;;  %8031 = vst [vmem:[#allocation124_spill] sm:$0xff] %v5906_v20  ;;  %v5946_v35 = vmul.f32 0.0051020407, %v5606_v44 }
 0x1fd   : > { %8017 = vst [vmem:[#allocation110_spill] sm:$0xff] %v5845_v22  ;;  %8022 = vst [vmem:[#allocation115_spill] sm:$0xff] %v5866_v7  ;;  %v5968_v44 = vmul.f32 0.0051020407, %v5618_v50  ;;  %v8057_v29 = vld [vmem:[#allocation19_spill] sm:$0xff]  ;;  %v8088_v22 = vld [vmem:[#allocation38_spill] sm:$0xff] }
 0x1fe   : > { %v5826_v39 = vpop.permute.xlu1 %1687  ;;  %v5828_v3 = vpop.permute.xlu0 %1699  ;;  %8037 = vst [vmem:[#allocation130_spill] sm:$0xff] %v5925_v27  ;;  %8038 = vst [vmem:[#allocation131_spill] sm:$0xff] %v5928_v28  ;;  %v8091_v7 = vld [vmem:[#allocation41_spill] sm:$0xff] }
 0x1ff   : > { %8011 = vst [vmem:[#allocation104_spill] sm:$0xff] %v5826_v39  ;;  %8012 = vst [vmem:[#allocation105_spill] sm:$0xff] %v5828_v3  ;;  %v5848_v39 = vmul.f32 0.0051020407, %v5537_v8  ;;  %v8105_v20 = vld [vmem:[#allocation53_spill] sm:$0xff] }
 0x201   : > { %8018 = vst [vmem:[#allocation111_spill] sm:$0xff] %v5848_v39  ;;  %v8083_v39 = vld [vmem:[#allocation34_spill] sm:$0xff] }
 0x202   : > { %v5830_v59 = vpop.permute.xlu1 %1695  ;;  %v5832_v1 = vpop.permute.xlu0 %1707 }
 0x203   : > { %8013 = vst [vmem:[#allocation106_spill] sm:$0xff] %v5830_v59  ;;  %8014 = vst [vmem:[#allocation107_spill] sm:$0xff] %v5832_v1  ;;  %v5851_v59 = vmul.f32 0.0051020407, %v5539_v9  ;;  %v5854_v1 = vmul.f32 0.0051020407, %v5541_v10 }
 0x204   : > { %v5873_v9 = vmul.f32 0.0051020407, %v5551_v15  ;;  %v5876_v10 = vmul.f32 0.0051020407, %v5553_v16  ;;  %v5894_v15 = vmul.f32 0.0051020407, %v5569_v24 }
 0x205   : > { %8019 = vst [vmem:[#allocation112_spill] sm:$0xff] %v5851_v59  ;;  %v5897_v16 = vmul.f32 0.0051020407, %v5571_v25  ;;  %v5916_v24 = vmul.f32 0.0051020407, %v5585_v31  ;;  %v8090_v59 = vld [vmem:[#allocation40_spill] sm:$0xff] }
 0x206   : > { %v5834_v32 = vpop.permute.xlu1 %1703  ;;  %v5836_v0 = vpop.permute.xlu0 %1714  ;;  %8025 = vst [vmem:[#allocation118_spill] sm:$0xff] %v5873_v9  ;;  %8028 = vst [vmem:[#allocation121_spill] sm:$0xff] %v5894_v15  ;;  %v5919_v25 = vmul.f32 0.0051020407, %v5587_v33  ;;  %v5937_v31 = vmul.f32 0.0051020407, %v5599_v40 }
 0x207   : > { %8015 = vst [vmem:[#allocation108_spill] sm:$0xff] %v5834_v32  ;;  %8016 = vst [vmem:[#allocation109_spill] sm:$0xff] %v5836_v0  ;;  %v5857_v0 = vmul.f32 0.0051020407, %v5543_v11  ;;  %v5879_v11 = vmul.f32 0.0051020407, %v5555_v17 }
 0x208   : > { %v5900_v17 = vmul.f32 0.0051020407, %v5573_v26  ;;  %8035 = vst [vmem:[#allocation128_spill] sm:$0xff] %v5919_v25  ;;  %v5922_v26 = vmul.f32 0.0051020407, %v5589_v34  ;;  %8041 = vst [vmem:[#allocation134_spill] sm:$0xff] %v5937_v31 }
 0x209   : > { %8020 = vst [vmem:[#allocation113_spill] sm:$0xff] %v5857_v0  ;;  %8026 = vst [vmem:[#allocation119_spill] sm:$0xff] %v5879_v11  ;;  %v5940_v33 = vmul.f32 0.0051020407, %v5601_v41  ;;  %v5943_v34 = vmul.f32 0.0051020407, %v5604_v43 }
 0x20a   : > { %v5868_v8 = vpop.permute.xlu1 %1711  ;;  %v5870_v32 = vpop.permute.xlu0 %1722  ;;  %8029 = vst [vmem:[#allocation122_spill] sm:$0xff] %v5900_v17  ;;  %8036 = vst [vmem:[#allocation129_spill] sm:$0xff] %v5922_v26  ;;  %v5959_v40 = vmul.f32 0.0051020407, %v5612_v47  ;;  %v5962_v41 = vmul.f32 0.0051020407, %v5614_v48 }
 0x20b   : > { %8023 = vst [vmem:[#allocation116_spill] sm:$0xff] %v5868_v8  ;;  %8024 = vst [vmem:[#allocation117_spill] sm:$0xff] %v5870_v32  ;;  %v5891_v32 = vmul.f32 0.0051020407, %v5567_v23  ;;  %v5913_v23 = vmul.f32 0.0051020407, %v5583_v30 }
 0x20c   : > { %v5934_v30 = vmul.f32 0.0051020407, %v5597_v38  ;;  %8042 = vst [vmem:[#allocation135_spill] sm:$0xff] %v5940_v33  ;;  %8043 = vst [vmem:[#allocation136_spill] sm:$0xff] %v5943_v34  ;;  %v5956_v38 = vmul.f32 0.0051020407, %v5610_v46 }
 0x20d   : > { %8027 = vst [vmem:[#allocation120_spill] sm:$0xff] %v5891_v32  ;;  %8034 = vst [vmem:[#allocation127_spill] sm:$0xff] %v5913_v23  ;;  %v5965_v43 = vmul.f32 0.0051020407, %v5616_v49  ;;  %v5977_v46 = vmul.f32 0.0051020407, %v5624_v53 }
 0x20e   : > { %v5908_v21 = vpop.permute.xlu1 %1718  ;;  %v5910_v8 = vpop.permute.xlu0 %1730  ;;  %8040 = vst [vmem:[#allocation133_spill] sm:$0xff] %v5934_v30  ;;  %8046 = vst [vmem:[#allocation139_spill] sm:$0xff] %v5962_v41  ;;  %v5980_v47 = vmul.f32 0.0051020407, %v5626_v54  ;;  %v5983_v48 = vmul.f32 0.0051020407, %v5628_v55 }
 0x20f   : > { %8032 = vst [vmem:[#allocation125_spill] sm:$0xff] %v5908_v21  ;;  %8033 = vst [vmem:[#allocation126_spill] sm:$0xff] %v5910_v8  ;;  %v5931_v8 = vmul.f32 0.0051020407, %v5595_v37  ;;  %v5953_v37 = vmul.f32 0.0051020407, %v5608_v45 }
 0x210   : > { %v5974_v45 = vmul.f32 0.0051020407, %v5622_v52  ;;  %8048 = vst [vmem:[#allocation141_spill] sm:$0xff] %v5980_v47  ;;  %v5986_v49 = vmul.f32 0.0051020407, %v5630_v56  ;;  %v8061_v31 = vld [vmem:[#allocation21_spill] sm:$0xff] }
 0x211   : > { %8039 = vst [vmem:[#allocation132_spill] sm:$0xff] %v5931_v8  ;;  %v5994_v52 = vmul.f32 0.0051020407, %v5634_v58  ;;  %v5997_v53 = vmul.f32 0.0051020407, %v5637_v60  ;;  %v8065_v8 = vld [vmem:[#allocation23_spill] sm:$0xff] }
 0x212   : > { %v5948_v36 = vpop.permute.xlu1 %1726  ;;  %v5950_v21 = vpop.permute.xlu0 %1738  ;;  %8049 = vst [vmem:[#allocation142_spill] sm:$0xff] %v5986_v49  ;;  %v6000_v54 = vmul.f32 0.0051020407, %v5639_v61  ;;  %v6003_v55 = vmul.f32 0.0051020407, %v5641_v62  ;;  %v8067_v33 = vld [vmem:[#allocation24_spill] sm:$0xff] }
 0x213   : > { %8044 = vst [vmem:[#allocation137_spill] sm:$0xff] %v5948_v36  ;;  %8045 = vst [vmem:[#allocation138_spill] sm:$0xff] %v5950_v21  ;;  %v5971_v21 = vmul.f32 0.0051020407, %v5620_v51  ;;  %v5991_v51 = vmul.f32 0.0051020407, %v5632_v57 }
 0x214   : > { %8052 = vst [vmem:[#allocation145_spill] sm:$0xff] %v5994_v52  ;;  %v8053_v36 = vld [vmem:[#allocation17_spill] sm:$0xff]  ;;  %v6014_v58 = vmul.f32 0.0051020407, %v8057_v29  ;;  %v6017_v60 = vmul.f32 0.0051020407, %v8059_v2 }
 0x215   : > { %8047 = vst [vmem:[#allocation140_spill] sm:$0xff] %v5971_v21  ;;  %8051 = vst [vmem:[#allocation144_spill] sm:$0xff] %v5991_v51  ;;  %v6006_v56 = vmul.f32 0.0051020407, %v8053_v36  ;;  %v6020_v61 = vmul.f32 0.0051020407, %v8061_v31 }
 0x216   : > { %v5988_v50 = vpop.permute.xlu0 %1746  ;;  %v6008_v3 = vpop.permute.xlu1 %1734  ;;  %8058 = vst [vmem:[#allocation19_spill] sm:$0xff] %v6014_v58  ;;  %8060 = vst [vmem:[#allocation20_spill] sm:$0xff] %v6017_v60  ;;  %v6023_v62 = vmul.f32 0.0051020407, %v8063_v4  ;;  %v6026_v36 = vmul.f32 0.0051020407, %v8065_v8 }
 0x217   : > { %8050 = vst [vmem:[#allocation143_spill] sm:$0xff] %v5988_v50  ;;  %8054 = vst [vmem:[#allocation17_spill] sm:$0xff] %v6008_v3  ;;  %v8055_v50 = vld [vmem:[#allocation18_spill] sm:$0xff]  ;;  %v6029_v3 = vmul.f32 0.0051020407, %v8067_v33  ;;  %v8073_v2 = vld [vmem:[#allocation27_spill] sm:$0xff] }
 0x218   : > { %v6011_v57 = vmul.f32 0.0051020407, %v8055_v50  ;;  %8062 = vst [vmem:[#allocation21_spill] sm:$0xff] %v6020_v61  ;;  %8064 = vst [vmem:[#allocation22_spill] sm:$0xff] %v6023_v62  ;;  %v8069_v50 = vld [vmem:[#allocation25_spill] sm:$0xff]  ;;  %v8071_v29 = vld [vmem:[#allocation26_spill] sm:$0xff] }
 0x219   : > { %8066 = vst [vmem:[#allocation23_spill] sm:$0xff] %v6026_v36  ;;  %8068 = vst [vmem:[#allocation24_spill] sm:$0xff] %v6029_v3  ;;  %v6032_v27 = vmul.f32 0.0051020407, %v8069_v50  ;;  %v6035_v30 = vmul.f32 0.0051020407, %v8071_v29 }
 0x21a   : > { %8056 = vst [vmem:[#allocation18_spill] sm:$0xff] %v6011_v57  ;;  %v6038_v25 = vmul.f32 0.0051020407, %v8073_v2  ;;  %v8075_v31 = vld [vmem:[#allocation28_spill] sm:$0xff]  ;;  %v8077_v4 = vld [vmem:[#allocation29_spill] sm:$0xff]  ;;  %v6048_v33 = vpop.permute.xlu0 %1754  ;;  %v8080_v3 = vld [vmem:[#allocation31_spill] sm:$0xff]  ;;  %v6066_v34 = vpop.permute.xlu1 %1742 }
 0x21b   : > { %8070 = vst [vmem:[#allocation25_spill] sm:$0xff] %v6032_v27  ;;  %8072 = vst [vmem:[#allocation26_spill] sm:$0xff] %v6035_v30  ;;  %v6041_v28 = vmul.f32 0.0051020407, %v8075_v31  ;;  %v6044_v62 = vmul.f32 0.0051020407, %v8077_v4 }
 0x21c   : > { %8074 = vst [vmem:[#allocation27_spill] sm:$0xff] %v6038_v25  ;;  %8079 = vst [vmem:[#allocation146_spill] sm:$0xff] %v6048_v33  ;;  %v8081_v30 = vld [vmem:[#allocation32_spill] sm:$0xff]  ;;  %v8085_v29 = vld [vmem:[#allocation35_spill] sm:$0xff]  ;;  %v5285_v11 = vmov 1983009808   ;;  %v8126_v33 = vsub.f32 %v5946_v35, %v8080_v3 }
 0x21d   : > { %8076 = vst [vmem:[#allocation28_spill] sm:$0xff] %v6041_v28  ;;  %8078 = vst [vmem:[#allocation29_spill] sm:$0xff] %v6044_v62  ;;  %v8082_v28 = vld [vmem:[#allocation33_spill] sm:$0xff]  ;;  %v8093_v31 = vld [vmem:[#allocation42_spill] sm:$0xff]  ;;  %v2170_v47 = vunpack.c.l.s4 %v5285_v11 }
 0x21e   : > { %8084 = vst [vmem:[#allocation31_spill] sm:$0xff] %v6066_v34  ;;  %v8087_v41 = vld [vmem:[#allocation37_spill] sm:$0xff]  ;;  %v6098_v0 = vpop.permute.xlu0 %1762  ;;  %v8095_v21 = vld [vmem:[#allocation44_spill] sm:$0xff]  ;;  %v6116_v9 = vpop.permute.xlu1 %1750  ;;  %v8098_v8 = vld [vmem:[#allocation46_spill] sm:$0xff] }
 0x21f   : > { %8092 = vst [vmem:[#allocation32_spill] sm:$0xff] %v6098_v0  ;;  %v8096_v49 = vld [vmem:[#allocation45_spill] sm:$0xff]  ;;  %8097 = vst [vmem:[#allocation33_spill] sm:$0xff] %v6116_v9  ;;  %v8099_v52 = vld [vmem:[#allocation47_spill] sm:$0xff]  ;;  %v2171_v61 = vunpack.c.0.s8 %v2170_v47  ;;  %v8124_v47 = vsub.f32 %v5842_v19, %v8080_v3  ;;  %v8131_v19 = vsub.f32 %v5839_v63, %v8081_v30  ;;  %v8134_v3 = vsub.f32 %v5956_v38, %v8081_v30 }
 0x220   : > { %v8100_v0 = vld [vmem:[#allocation48_spill] sm:$0xff]  ;;  %v8101_v9 = vld [vmem:[#allocation49_spill] sm:$0xff]  ;;  %v8102_v51 = vld [vmem:[#allocation50_spill] sm:$0xff] }
 0x221   : > { %v8107_v34 = vld [vmem:[#allocation54_spill] sm:$0xff]  ;;  %v8111_v50 = vld [vmem:[#allocation128_spill] sm:$0xff]  ;;  %v8114_v36 = vld [vmem:[#allocation57_spill] sm:$0xff] }
 0x222   : > { %v6148_v58 = vpop.permute.xlu0 %1770  ;;  %v6164_v11 = vpop.permute.xlu1 %1758  ;;  %v8116_v15 = vld [vmem:[#allocation58_spill] sm:$0xff]  ;;  %v8125_v25 = vld [vmem:[#allocation61_spill] sm:$0xff]  ;;  %v8129_v62 = vld [vmem:[#allocation16_spill] sm:$0xff] }
 0x223   : > { %8106 = vst [vmem:[#allocation34_spill] sm:$0xff] %v6148_v58  ;;  %8113 = vst [vmem:[#allocation35_spill] sm:$0xff] %v6164_v11  ;;  %v8117_v60 = vld [vmem:[#allocation130_spill] sm:$0xff]  ;;  %v8121_v58 = vld [vmem:[#allocation60_spill] sm:$0xff]  ;;  %v1576_v18 = vmul.f32 %v8125_v25, %v8124_v47  ;;  %v6190_v4 = vmul.f32 %v8125_v25, %v8126_v33  ;;  %v6195_v27 = vsub.s32 %v2171_v61, %v8129_v62 }
 0x224   : > { %v8122_v11 = vld [vmem:[#allocation132_spill] sm:$0xff]  ;;  %v8127_v26 = vld [vmem:[#allocation62_spill] sm:$0xff]  ;;  %v8132_v23 = vld [vmem:[#allocation63_spill] sm:$0xff] }
 0x225   : > { %v6203_v47 = vmul.f32 %v8132_v23, %v8131_v19  ;;  %v6209_v25 = vmul.f32 %v8132_v23, %v8134_v3  ;;  %v8136_v35 = vld [vmem:[#allocation111_spill] sm:$0xff]  ;;  %v8137_v33 = vld [vmem:[#allocation30_spill] sm:$0xff]  ;;  %v8139_v61 = vld [vmem:[#allocation64_spill] sm:$0xff]  ;;  %v8143_v19 = vsub.f32 %v5854_v1, %v8082_v28  ;;  %v8151_v1 = vsub.f32 %v5953_v37, %v8083_v39 }
 0x226   : > { %v8138_v32 = vsub.f32 %v8136_v35, %v8137_v33  ;;  %v6215_v17 = vpop.permute.xlu0 %1883  ;;  %v8141_v2 = vld [vmem:[#allocation136_spill] sm:$0xff]  ;;  %v8144_v30 = vld [vmem:[#allocation65_spill] sm:$0xff]  ;;  %v8145_v23 = vld [vmem:[#allocation139_spill] sm:$0xff] }
 0x227   : > { %8133 = vst [vmem:[#allocation36_spill] sm:$0xff] %v6203_v47  ;;  %8135 = vst [vmem:[#allocation37_spill] sm:$0xff] %v6209_v25  ;;  %v8142_v57 = vsub.f32 %v8141_v2, %v8137_v33  ;;  %v6227_v38 = vmul.f32 %v8144_v30, %v8143_v19  ;;  %v8146_v3 = vsub.f32 %v8145_v23, %v8082_v28  ;;  %v8148_v47 = vld [vmem:[#allocation110_spill] sm:$0xff]  ;;  %v8154_v23 = vld [vmem:[#allocation67_spill] sm:$0xff] }
 0x228   : > { %v1577_v62 = vmul.f32 %v8139_v61, %v8138_v32  ;;  %8140 = vst [vmem:[#allocation38_spill] sm:$0xff] %v6215_v17  ;;  %v8147_v32 = vld [vmem:[#allocation93_spill] sm:$0xff]  ;;  %v8149_v2 = vsub.f32 %v8148_v47, %v8083_v39  ;;  %v8150_v33 = vld [vmem:[#allocation66_spill] sm:$0xff]  ;;  %v8159_v37 = vld [vmem:[#allocation68_spill] sm:$0xff] }
 0x229   : > { %v6221_v63 = vmul.f32 %v8139_v61, %v8142_v57  ;;  %v6233_v35 = vmul.f32 %v8144_v30, %v8146_v3  ;;  %v1808_v25 = vmul.f32 %v8147_v32, %v1576_v18  ;;  %v6246_v61 = vmul.f32 %v8150_v33, %v8151_v1  ;;  %v8152_v19 = vld [vmem:[#allocation114_spill] sm:$0xff]  ;;  %v6260_v3 = vpop.permute.xlu1 %1766 }
 0x22a   : > { %v6240_v57 = vmul.f32 %v8150_v33, %v8149_v2  ;;  %v8153_v28 = vsub.f32 %v8152_v19, %v8085_v29  ;;  %v8155_v18 = vsub.f32 %v5968_v44, %v8085_v29  ;;  %8156 = vst [vmem:[#allocation39_spill] sm:$0xff] %v6260_v3  ;;  %v8157_v2 = vld [vmem:[#allocation112_spill] sm:$0xff]  ;;  %v8160_v1 = vsub.f32 %v5959_v40, %v8086_v42  ;;  %v8163_v29 = vld [vmem:[#allocation69_spill] sm:$0xff]  ;;  %v8167_v40 = vld [vmem:[#allocation70_spill] sm:$0xff] }
 0x22b   : > { %v8158_v39 = vsub.f32 %v8157_v2, %v8086_v42  ;;  %v8164_v2 = vsub.f32 %v5974_v45, %v8087_v41  ;;  %v8165_v3 = vld [vmem:[#allocation113_spill] sm:$0xff] }
 0x22c   : > { %v6252_v30 = vmul.f32 %v8154_v23, %v8153_v28  ;;  %v6258_v47 = vmul.f32 %v8154_v23, %v8155_v18  ;;  %v6272_v19 = vmul.f32 %v8159_v37, %v8160_v1  ;;  %v8161_v28 = vld [vmem:[#allocation115_spill] sm:$0xff]  ;;  %v2040_v18 = vadd.f32 %v6215_v17, %v1808_v25  ;;  %v8171_v45 = vld [vmem:[#allocation141_spill] sm:$0xff]  ;;  %v8183_v17 = vld [vmem:[#allocation74_spill] sm:$0xff] }
 0x22d   : > { %v6266_v33 = vmul.f32 %v8159_v37, %v8158_v39  ;;  %v8162_v44 = vsub.f32 %v8161_v28, %v8087_v41  ;;  %v6285_v39 = vmul.f32 %v8163_v29, %v8164_v2  ;;  %v8166_v42 = vsub.f32 %v8165_v3, %v8088_v22 }
 0x22e   : > { %v8168_v1 = vsub.f32 %v5965_v43, %v8088_v22  ;;  %v8169_v25 = vsub.f32 %v5876_v10, %v8089_v5  ;;  %v8173_v2 = vsub.f32 %v5863_v6, %v8090_v59  ;;  %v8175_v43 = vld [vmem:[#allocation140_spill] sm:$0xff] }
 0x22f   : > { %v6278_v23 = vmul.f32 %v8163_v29, %v8162_v44  ;;  %v6291_v37 = vmul.f32 %v8167_v40, %v8166_v42  ;;  %v8170_v44 = vld [vmem:[#allocation71_spill] sm:$0xff]  ;;  %v8172_v29 = vsub.f32 %v8171_v45, %v8089_v5  ;;  %v8174_v42 = vld [vmem:[#allocation72_spill] sm:$0xff] }
 0x230   : > { %v6297_v28 = vmul.f32 %v8167_v40, %v8168_v1  ;;  %v6303_v41 = vmul.f32 %v8170_v44, %v8169_v25  ;;  %v6315_v22 = vmul.f32 %v8174_v42, %v8173_v2  ;;  %v8176_v40 = vsub.f32 %v8175_v43, %v8090_v59  ;;  %v8178_v25 = vld [vmem:[#allocation73_spill] sm:$0xff]  ;;  %v8186_v43 = vld [vmem:[#allocation43_spill] sm:$0xff] }
 0x231   : > { %v6309_v3 = vmul.f32 %v8170_v44, %v8172_v29  ;;  %v8177_v1 = vsub.f32 %v5882_v12, %v8091_v7  ;;  %v8179_v44 = vld [vmem:[#allocation142_spill] sm:$0xff] }
 0x232   : > { %v6321_v10 = vmul.f32 %v8174_v42, %v8176_v40  ;;  %v8180_v45 = vsub.f32 %v8179_v44, %v8091_v7  ;;  %v8181_v29 = vld [vmem:[#allocation118_spill] sm:$0xff]  ;;  %v8185_v42 = vsub.f32 %v5977_v46, %v8093_v31  ;;  %v8187_v40 = vsub.f32 %v5888_v14, %v8186_v43 }
 0x233   : > { %v6327_v5 = vmul.f32 %v8178_v25, %v8177_v1  ;;  %v8182_v2 = vsub.f32 %v8181_v29, %v8093_v31  ;;  %v8188_v1 = vld [vmem:[#allocation75_spill] sm:$0xff]  ;;  %v2168_v31 = vcombine.high %v2040_v18, %v2040_v18 }
 0x234   : > { %v6333_v6 = vmul.f32 %v8178_v25, %v8180_v45  ;;  %v6345_v12 = vmul.f32 %v8183_v17, %v8185_v42  ;;  %v6351_v7 = vmul.f32 %v8188_v1, %v8187_v40  ;;  %v8189_v25 = vld [vmem:[#allocation145_spill] sm:$0xff]  ;;  %v8191_v29 = vld [vmem:[#allocation119_spill] sm:$0xff] }
 0x235   : > { %v6339_v59 = vmul.f32 %v8183_v17, %v8182_v2  ;;  %v8190_v44 = vsub.f32 %v8189_v25, %v8186_v43  ;;  %v8192_v2 = vsub.f32 %v8191_v29, %v8095_v21  ;;  %v8194_v17 = vsub.f32 %v5983_v48, %v8095_v21  ;;  %v8195_v42 = vld [vmem:[#allocation121_spill] sm:$0xff]  ;;  %v8200_v21 = vld [vmem:[#allocation78_spill] sm:$0xff] }
 0x236   : > { %v8196_v40 = vsub.f32 %v8195_v42, %v8096_v49  ;;  %v8197_v43 = vld [vmem:[#allocation77_spill] sm:$0xff]  ;;  %v8199_v29 = vsub.f32 %v5885_v13, %v8098_v8  ;;  %v6395_v42 = vpop.permute.xlu1 %1774  ;;  %v8208_v13 = vsub.f32 %v6006_v56, %v8099_v52  ;;  %v8216_v56 = vld [vmem:[#allocation19_spill] sm:$0xff] }
 0x237   : > { %8184 = vst [vmem:[#allocation40_spill] sm:$0xff] %v6339_v59  ;;  %v6357_v45 = vmul.f32 %v8188_v1, %v8190_v44  ;;  %v8193_v59 = vld [vmem:[#allocation76_spill] sm:$0xff]  ;;  %v8198_v1 = vsub.f32 %v6000_v54, %v8096_v49  ;;  %8203 = vst [vmem:[#allocation41_spill] sm:$0xff] %v6395_v42  ;;  %v8206_v54 = vld [vmem:[#allocation79_spill] sm:$0xff] }
 0x238   : > { %v6363_v46 = vmul.f32 %v8193_v59, %v8192_v2  ;;  %v6369_v14 = vmul.f32 %v8193_v59, %v8194_v17  ;;  %v6375_v25 = vmul.f32 %v8197_v43, %v8196_v40  ;;  %v6387_v48 = vmul.f32 %v8200_v21, %v8199_v29  ;;  %v8201_v59 = vld [vmem:[#allocation144_spill] sm:$0xff]  ;;  %v8204_v40 = vld [vmem:[#allocation122_spill] sm:$0xff] }
 0x239   : > { %v6381_v44 = vmul.f32 %v8197_v43, %v8198_v1  ;;  %v8202_v2 = vsub.f32 %v8201_v59, %v8098_v8  ;;  %v8205_v49 = vsub.f32 %v8204_v40, %v8099_v52  ;;  %v6407_v1 = vmul.f32 %v8206_v54, %v8208_v13  ;;  %v8209_v29 = vld [vmem:[#allocation120_spill] sm:$0xff] }
 0x23a   : > { %v8210_v8 = vsub.f32 %v8209_v29, %v8100_v0  ;;  %v8211_v59 = vld [vmem:[#allocation80_spill] sm:$0xff]  ;;  %v8218_v29 = vsub.f32 %v5897_v16, %v8102_v51 }
 0x23b   : > { %v6393_v17 = vmul.f32 %v8200_v21, %v8202_v2  ;;  %v6401_v43 = vmul.f32 %v8206_v54, %v8205_v49  ;;  %v8212_v2 = vsub.f32 %v5997_v53, %v8100_v0  ;;  %v8213_v49 = vld [vmem:[#allocation124_spill] sm:$0xff]  ;;  %v8217_v54 = vsub.f32 %v8216_v56, %v8101_v9 }
 0x23c   : > { %v6413_v21 = vmul.f32 %v8211_v59, %v8210_v8  ;;  %v8214_v42 = vsub.f32 %v8213_v49, %v8101_v9  ;;  %v8219_v8 = vld [vmem:[#allocation82_spill] sm:$0xff]  ;;  %v8220_v53 = vsub.f32 %v6003_v55, %v8102_v51  ;;  %v8224_v49 = vld [vmem:[#allocation83_spill] sm:$0xff]  ;;  %v8230_v55 = vld [vmem:[#allocation52_spill] sm:$0xff] }
 0x23d   : > { %8207 = vst [vmem:[#allocation42_spill] sm:$0xff] %v6401_v43  ;;  %v6419_v40 = vmul.f32 %v8211_v59, %v8212_v2  ;;  %v8215_v43 = vld [vmem:[#allocation81_spill] sm:$0xff]  ;;  %v6437_v0 = vmul.f32 %v8219_v8, %v8218_v29  ;;  %v2182_v29 = vrot.slane %v2168_v31, %v6195_v27  ;;  %v8229_v51 = vld [vmem:[#allocation123_spill] sm:$0xff] }
 0x23e   : > { %v6425_v52 = vmul.f32 %v8215_v43, %v8214_v42  ;;  %v6431_v13 = vmul.f32 %v8215_v43, %v8217_v54  ;;  %v6443_v59 = vmul.f32 %v8219_v8, %v8220_v53  ;;  %v8222_v42 = vld [vmem:[#allocation51_spill] sm:$0xff]  ;;  %v8226_v43 = vld [vmem:[#allocation21_spill] sm:$0xff]  ;;  %v2175_v54 = vrot.slane %v2040_v18, %v6195_v27  ;;  %v8232_v53 = vld [vmem:[#allocation84_spill] sm:$0xff] }
 0x23f   : > { %v8223_v2 = vsub.f32 %v5916_v24, %v8222_v42  ;;  %v8227_v56 = vsub.f32 %v8226_v43, %v8222_v42  ;;  %v8231_v8 = vsub.f32 %v8229_v51, %v8230_v55  ;;  %v8234_v24 = vld [vmem:[#allocation18_spill] sm:$0xff]  ;;  %v8237_v42 = vld [vmem:[#allocation129_spill] sm:$0xff]  ;;  %v8241_v18 = vld [vmem:[#allocation23_spill] sm:$0xff] }
 0x240   : > { %8221 = vst [vmem:[#allocation44_spill] sm:$0xff] %v6443_v59  ;;  %v8239_v43 = vld [vmem:[#allocation85_spill] sm:$0xff]  ;;  %v8242_v31 = vsub.f32 %v8241_v18, %v8105_v20 }
 0x241   : > { %v6449_v9 = vmul.f32 %v8224_v49, %v8223_v2  ;;  %v6455_v16 = vmul.f32 %v8224_v49, %v8227_v56  ;;  %v6463_v59 = vmul.f32 %v8232_v53, %v8231_v8  ;;  %v8235_v2 = vsub.f32 %v8234_v24, %v8230_v55  ;;  %v8243_v8 = vld [vmem:[#allocation127_spill] sm:$0xff] }
 0x242   : > { %v8238_v49 = vsub.f32 %v8237_v42, %v8105_v20  ;;  %v6481_v51 = vmul.f32 %v8239_v43, %v8242_v31  ;;  %v8249_v42 = vld [vmem:[#allocation131_spill] sm:$0xff] }
 0x243   : > { %8225 = vst [vmem:[#allocation45_spill] sm:$0xff] %v6449_v9  ;;  %8228 = vst [vmem:[#allocation46_spill] sm:$0xff] %v6455_v16  ;;  %v6469_v9 = vmul.f32 %v8232_v53, %v8235_v2  ;;  %v8245_v16 = vld [vmem:[#allocation86_spill] sm:$0xff]  ;;  %v8247_v53 = vld [vmem:[#allocation20_spill] sm:$0xff] }
 0x244   : > { %8233 = vst [vmem:[#allocation47_spill] sm:$0xff] %v6463_v59  ;;  %v6475_v56 = vmul.f32 %v8239_v43, %v8238_v49  ;;  %v8244_v59 = vsub.f32 %v8243_v8, %v8107_v34  ;;  %v8248_v24 = vsub.f32 %v8247_v53, %v8107_v34  ;;  %v8250_v49 = vld [vmem:[#allocation55_spill] sm:$0xff]  ;;  %v8254_v43 = vld [vmem:[#allocation25_spill] sm:$0xff] }
 0x245   : > { %8236 = vst [vmem:[#allocation48_spill] sm:$0xff] %v6469_v9  ;;  %v8252_v9 = vld [vmem:[#allocation87_spill] sm:$0xff]  ;;  %v8255_v18 = vsub.f32 %v8254_v43, %v8250_v49 }
 0x246   : > { %8240 = vst [vmem:[#allocation49_spill] sm:$0xff] %v6475_v56  ;;  %v6487_v55 = vmul.f32 %v8245_v16, %v8244_v59  ;;  %v6493_v2 = vmul.f32 %v8245_v16, %v8248_v24  ;;  %v8251_v56 = vsub.f32 %v8249_v42, %v8250_v49  ;;  %v8257_v59 = vld [vmem:[#allocation56_spill] sm:$0xff]  ;;  %v8261_v16 = vld [vmem:[#allocation22_spill] sm:$0xff] }
 0x247   : > { %v6505_v31 = vmul.f32 %v8252_v9, %v8255_v18  ;;  %v8258_v8 = vsub.f32 %v8111_v50, %v8257_v59  ;;  %v8262_v53 = vsub.f32 %v8261_v16, %v8257_v59  ;;  %v6531_v18 = vpop.permute.xlu1 %1887  ;;  %v8271_v59 = vsub.f32 %v8117_v60, %v8116_v15  ;;  %v8274_v16 = vld [vmem:[#allocation96_spill] sm:$0xff]  ;;  %v8281_v60 = vld [vmem:[#allocation29_spill] sm:$0xff] }
 0x248   : > { %8246 = vst [vmem:[#allocation50_spill] sm:$0xff] %v6487_v55  ;;  %v6499_v20 = vmul.f32 %v8252_v9, %v8251_v56  ;;  %v8259_v55 = vld [vmem:[#allocation88_spill] sm:$0xff]  ;;  %v8264_v56 = vld [vmem:[#allocation133_spill] sm:$0xff]  ;;  %v8268_v9 = vld [vmem:[#allocation27_spill] sm:$0xff] }
 0x249   : > { %8256 = vst [vmem:[#allocation54_spill] sm:$0xff] %v6505_v31  ;;  %v6511_v34 = vmul.f32 %v8259_v55, %v8258_v8  ;;  %v6517_v24 = vmul.f32 %v8259_v55, %v8262_v53  ;;  %v8265_v42 = vsub.f32 %v8264_v56, %v8114_v36  ;;  %v8269_v43 = vsub.f32 %v8268_v9, %v8114_v36  ;;  %v8272_v8 = vld [vmem:[#allocation90_spill] sm:$0xff]  ;;  %v8278_v9 = vld [vmem:[#allocation59_spill] sm:$0xff]  ;;  %v8284_v31 = vld [vmem:[#allocation92_spill] sm:$0xff] }
 0x24a   : > { %8253 = vst [vmem:[#allocation53_spill] sm:$0xff] %v6499_v20  ;;  %v8266_v20 = vld [vmem:[#allocation89_spill] sm:$0xff]  ;;  %v6537_v55 = vmul.f32 %v8272_v8, %v8271_v59  ;;  %v1809_v53 = vmul.f32 %v8274_v16, %v1577_v62  ;;  %v2183_v56 = vcombine.high %v2175_v54, %v2175_v54  ;;  %v8282_v59 = vsub.f32 %v8281_v60, %v8278_v9 }
 0x24b   : > { %8260 = vst [vmem:[#allocation128_spill] sm:$0xff] %v6511_v34  ;;  %8263 = vst [vmem:[#allocation57_spill] sm:$0xff] %v6517_v24  ;;  %v6523_v49 = vmul.f32 %v8266_v20, %v8265_v42  ;;  %v6529_v50 = vmul.f32 %v8266_v20, %v8269_v43  ;;  %v2184_v24 = vcombine.high %v2182_v29, %v2182_v29  ;;  %v8275_v42 = vld [vmem:[#allocation24_spill] sm:$0xff]  ;;  %v8277_v20 = vld [vmem:[#allocation135_spill] sm:$0xff] }
 0x24c   : > { %8273 = vst [vmem:[#allocation60_spill] sm:$0xff] %v6537_v55  ;;  %v8279_v43 = vsub.f32 %v8277_v20, %v8278_v9  ;;  %v8283_v62 = vsub.f32 %v8122_v11, %v8121_v58  ;;  %v1840_v20 = vmul.f32 %v8147_v32, %v6190_v4  ;;  %v2041_v11 = vadd.f32 %v6531_v18, %v1809_v53 }
 0x24d   : > { %8267 = vst [vmem:[#allocation58_spill] sm:$0xff] %v6523_v49  ;;  %8270 = vst [vmem:[#allocation130_spill] sm:$0xff] %v6529_v50  ;;  %v8276_v49 = vsub.f32 %v8275_v42, %v8116_v15  ;;  %v8280_v50 = vld [vmem:[#allocation91_spill] sm:$0xff]  ;;  %v6593_v32 = vmul.f32 %v8274_v16, %v6221_v63 }
 0x24e   : > { %v6550_v34 = vmul.f32 %v8280_v50, %v8279_v43  ;;  %v6556_v55 = vmul.f32 %v8280_v50, %v8282_v59  ;;  %v6562_v15 = vmul.f32 %v8284_v31, %v8283_v62  ;;  %v8288_v43 = vld [vmem:[#allocation134_spill] sm:$0xff]  ;;  %v8291_v59 = vld [vmem:[#allocation28_spill] sm:$0xff]  ;;  %v8298_v63 = vld [vmem:[#allocation99_spill] sm:$0xff] }
 0x24f   : > { %v6544_v36 = vmul.f32 %v8272_v8, %v8276_v49  ;;  %v8286_v49 = vld [vmem:[#allocation26_spill] sm:$0xff]  ;;  %v8289_v9 = vsub.f32 %v8288_v43, %v8127_v26  ;;  %v8292_v62 = vsub.f32 %v8291_v59, %v8127_v26  ;;  %v8296_v43 = vld [vmem:[#allocation97_spill] sm:$0xff]  ;;  %v6611_v16 = vmul.f32 %v8298_v63, %v6252_v30 }
 0x250   : > { %8285 = vst [vmem:[#allocation132_spill] sm:$0xff] %v6562_v15  ;;  %v8287_v8 = vsub.f32 %v8286_v49, %v8121_v58  ;;  %v8290_v50 = vld [vmem:[#allocation94_spill] sm:$0xff]  ;;  %v8293_v58 = vld [vmem:[#allocation36_spill] sm:$0xff]  ;;  %v6597_v53 = vmul.f32 %v8296_v43, %v6227_v38  ;;  %v6601_v26 = vmul.f32 %v8296_v43, %v6233_v35  ;;  %v6615_v38 = vmul.f32 %v8298_v63, %v6258_v47 }
 0x251   : > { %v6576_v60 = vmul.f32 %v8290_v50, %v8289_v9  ;;  %v6583_v15 = vmul.f32 %v8290_v50, %v8292_v62  ;;  %v3256_v9 = vcombine.low %v2175_v54, %v2183_v56  ;;  %v3257_v50 = vcombine.low %v2182_v29, %v2184_v24  ;;  %v8297_v59 = vld [vmem:[#allocation98_spill] sm:$0xff]  ;;  %v8299_v35 = vld [vmem:[#allocation100_spill] sm:$0xff] }
 0x252   : > { %v6568_v42 = vmul.f32 %v8284_v31, %v8287_v8  ;;  %v8294_v31 = vld [vmem:[#allocation95_spill] sm:$0xff]  ;;  %v8295_v8 = vld [vmem:[#allocation37_spill] sm:$0xff]  ;;  %v1811_v62 = vmul.f32 %v8297_v59, %v6240_v57  ;;  %v6623_v54 = vmul.f32 %v8299_v35, %v6272_v19  ;;  %v2185_v29 = vcombine.high %v2041_v11, %v2041_v11  ;;  %v8301_v47 = vld [vmem:[#allocation102_spill] sm:$0xff] }
 0x253   : > { %v1810_v49 = vmul.f32 %v8294_v31, %v8293_v58  ;;  %v6589_v4 = vmul.f32 %v8294_v31, %v8295_v8  ;;  %v6607_v58 = vmul.f32 %v8297_v59, %v6246_v61  ;;  %v6619_v31 = vmul.f32 %v8299_v35, %v6266_v33  ;;  %v8300_v57 = vld [vmem:[#allocation101_spill] sm:$0xff]  ;;  %v8302_v19 = vld [vmem:[#allocation103_spill] sm:$0xff]  ;;  %v8303_v8 = vld [vmem:[#allocation104_spill] sm:$0xff] }
 0x254   : > { %v6627_v61 = vmul.f32 %v8300_v57, %v6278_v23  ;;  %v6631_v30 = vmul.f32 %v8300_v57, %v6285_v39  ;;  %v6635_v24 = vmul.f32 %v8301_v47, %v6291_v37  ;;  %v6639_v33 = vmul.f32 %v8301_v47, %v6297_v28  ;;  %v8304_v59 = vld [vmem:[#allocation105_spill] sm:$0xff]  ;;  %v8305_v63 = vld [vmem:[#allocation40_spill] sm:$0xff]  ;;  %v8306_v35 = vld [vmem:[#allocation106_spill] sm:$0xff]  ;;  %v6671_v57 = vpop.permute.xlu1 %1895 }
 0x255   : > { %v6643_v56 = vmul.f32 %v8302_v19, %v6303_v41  ;;  %v6647_v23 = vmul.f32 %v8302_v19, %v6309_v3  ;;  %v6651_v39 = vmul.f32 %v8303_v8, %v6315_v22  ;;  %v3264_v43 = vrot.slane %v3256_v9, %v6195_v27  ;;  %v8308_v19 = vld [vmem:[#allocation108_spill] sm:$0xff] }
 0x256   : > { %v3271_v37 = vrot.slane %v3257_v50, %v6195_v27  ;;  %v6657_v28 = vmul.f32 %v8303_v8, %v6321_v10  ;;  %v6661_v41 = vmul.f32 %v8304_v59, %v6327_v5  ;;  %v6665_v3 = vmul.f32 %v8304_v59, %v6333_v6  ;;  %v8307_v10 = vld [vmem:[#allocation107_spill] sm:$0xff] }
 0x257   : > { %v6669_v22 = vmul.f32 %v8306_v35, %v8305_v63  ;;  %v6675_v9 = vmul.f32 %v8306_v35, %v6345_v12  ;;  %v6679_v50 = vmul.f32 %v8307_v10, %v6351_v7  ;;  %v2199_v5 = vrot.slane %v2185_v29, %v6195_v27  ;;  %v8309_v12 = vld [vmem:[#allocation109_spill] sm:$0xff]  ;;  %v8310_v29 = vld [vmem:[#allocation116_spill] sm:$0xff] }
 0x258   : > { %v3272_v47 = vcombine.low %v3264_v43, %v3271_v37  ;;  %v6684_v6 = vmul.f32 %v8307_v10, %v6357_v45  ;;  %v6688_v8 = vmul.f32 %v8308_v19, %v6363_v46  ;;  %v6692_v59 = vmul.f32 %v8308_v19, %v6369_v14  ;;  %v8312_v37 = vld [vmem:[#allocation42_spill] sm:$0xff] }
 0x259   : > { %v6696_v63 = vmul.f32 %v8309_v12, %v6375_v25  ;;  %v6700_v7 = vmul.f32 %v8309_v12, %v6381_v44  ;;  %v6704_v45 = vmul.f32 %v8310_v29, %v6387_v48  ;;  %v2192_v43 = vrot.slane %v2041_v11, %v6195_v27  ;;  %v8313_v25 = vld [vmem:[#allocation117_spill] sm:$0xff]  ;;  %v1892_v11 = vpop.permute.xlu0 %1891 }
 0x25a   : > { %v2043_v46 = vadd.f32 %v6671_v57, %v1811_v62  ;;  %4345 = vperm.xlu0 %5157, %v3272_v47   ;;  %v6710_v14 = vmul.f32 %v8310_v29, %v6393_v17  ;;  %v6714_v35 = vmul.f32 %v8313_v25, %v8312_v37  ;;  %v6718_v44 = vmul.f32 %v8313_v25, %v6407_v1  ;;  %v8316_v48 = vld [vmem:[#allocation125_spill] sm:$0xff]  ;;  %v8318_v17 = vld [vmem:[#allocation126_spill] sm:$0xff] }
 0x25b   : > { %v6722_v10 = vmul.f32 %v8316_v48, %v6413_v21  ;;  %v6726_v62 = vmul.f32 %v8316_v48, %v6419_v40  ;;  %v6730_v47 = vmul.f32 %v8318_v17, %v6425_v52  ;;  %v6734_v19 = vmul.f32 %v8318_v17, %v6431_v13  ;;  %v8321_v1 = vld [vmem:[#allocation137_spill] sm:$0xff]  ;;  %v8323_v21 = vld [vmem:[#allocation44_spill] sm:$0xff]  ;;  %v8326_v40 = vld [vmem:[#allocation138_spill] sm:$0xff] }
 0x25c   : > { %8311 = vst [vmem:[#allocation61_spill] sm:$0xff] %v6710_v14  ;;  %8314 = vst [vmem:[#allocation62_spill] sm:$0xff] %v6714_v35  ;;  %v2201_v12 = vcombine.high %v2199_v5, %v2199_v5  ;;  %v6738_v29 = vmul.f32 %v8321_v1, %v6437_v0  ;;  %v6742_v37 = vmul.f32 %v8321_v1, %v8323_v21  ;;  %v8325_v25 = vld [vmem:[#allocation45_spill] sm:$0xff] }
 0x25d   : > { %8315 = vst [vmem:[#allocation63_spill] sm:$0xff] %v6718_v44  ;;  %8317 = vst [vmem:[#allocation111_spill] sm:$0xff] %v6726_v62  ;;  %v6746_v48 = vmul.f32 %v8326_v40, %v8325_v25  ;;  %v8328_v62 = vld [vmem:[#allocation38_spill] sm:$0xff]  ;;  %v2042_v13 = vadd.f32 %v1892_v11, %v1810_v49  ;;  %v2200_v17 = vcombine.high %v2192_v43, %v2192_v43  ;;  %v8331_v44 = vld [vmem:[#allocation47_spill] sm:$0xff] }
 0x25e   : > { %8319 = vst [vmem:[#allocation30_spill] sm:$0xff] %v6730_v47  ;;  %8320 = vst [vmem:[#allocation64_spill] sm:$0xff] %v6734_v19  ;;  %v2072_v52 = vadd.f32 %v8328_v62, %v1840_v20  ;;  %v8329_v47 = vld [vmem:[#allocation46_spill] sm:$0xff]  ;;  %v2219_v19 = vcombine.high %v2043_v46, %v2043_v46  ;;  %v8332_v0 = vld [vmem:[#allocation17_spill] sm:$0xff] }
 0x25f   : > { %8322 = vst [vmem:[#allocation136_spill] sm:$0xff] %v6738_v29  ;;  %8324 = vst [vmem:[#allocation65_spill] sm:$0xff] %v6742_v37  ;;  %v6751_v14 = vmul.f32 %v8326_v40, %v8329_v47  ;;  %v6755_v35 = vmul.f32 %v8332_v0, %v8331_v44  ;;  %v8333_v29 = vld [vmem:[#allocation48_spill] sm:$0xff]  ;;  %v8335_v21 = vld [vmem:[#allocation49_spill] sm:$0xff] }
 0x260   : > { %8327 = vst [vmem:[#allocation139_spill] sm:$0xff] %v6746_v48  ;;  %v6759_v1 = vmul.f32 %v8332_v0, %v8333_v29  ;;  %v8336_v25 = vld [vmem:[#allocation143_spill] sm:$0xff]  ;;  %v8339_v62 = vld [vmem:[#allocation50_spill] sm:$0xff]  ;;  %v8343_v40 = vld [vmem:[#allocation53_spill] sm:$0xff]  ;;  %v3274_v0 = vcombine.low %v2199_v5, %v2201_v12  ;;  %v3273_v5 = vcombine.low %v2192_v43, %v2200_v17  ;;  %v2233_v12 = vrot.slane %v2219_v19, %v6195_v27 }
 0x261   : > { %8330 = vst [vmem:[#allocation93_spill] sm:$0xff] %v6751_v14  ;;  %v6763_v37 = vmul.f32 %v8336_v25, %v8335_v21  ;;  %v6767_v20 = vmul.f32 %v8336_v25, %v6481_v51  ;;  %v8340_v49 = vld [vmem:[#allocation31_spill] sm:$0xff]  ;;  %v8344_v14 = vld [vmem:[#allocation146_spill] sm:$0xff]  ;;  %v8349_v51 = vld [vmem:[#allocation33_spill] sm:$0xff] }
 0x262   : > { %8334 = vst [vmem:[#allocation110_spill] sm:$0xff] %v6759_v1  ;;  %v6771_v47 = vmul.f32 %v8340_v49, %v8339_v62  ;;  %v6775_v44 = vmul.f32 %v8340_v49, %v6493_v2  ;;  %v6779_v29 = vmul.f32 %v8344_v14, %v8343_v40  ;;  %v8346_v1 = vld [vmem:[#allocation54_spill] sm:$0xff]  ;;  %v1900_v2 = vpop.permute.xlu0 %1899  ;;  %v6793_v49 = vpop.permute.xlu1 %1903  ;;  %v2074_v40 = vadd.f32 %v1892_v11, %v6589_v4  ;;  %v8358_v19 = vld [vmem:[#allocation60_spill] sm:$0xff]  ;;  %v8359_v17 = vld [vmem:[#allocation35_spill] sm:$0xff] }
 0x263   : > { %8337 = vst [vmem:[#allocation66_spill] sm:$0xff] %v6763_v37  ;;  %8338 = vst [vmem:[#allocation114_spill] sm:$0xff] %v6767_v20  ;;  %v6783_v21 = vmul.f32 %v8344_v14, %v8346_v1  ;;  %v8348_v37 = vld [vmem:[#allocation128_spill] sm:$0xff]  ;;  %v8351_v20 = vld [vmem:[#allocation57_spill] sm:$0xff]  ;;  %v2226_v4 = vrot.slane %v2043_v46, %v6195_v27  ;;  %v2045_v43 = vadd.f32 %v6793_v49, %v6619_v31 }
 0x264   : > { %8341 = vst [vmem:[#allocation67_spill] sm:$0xff] %v6771_v47  ;;  %8342 = vst [vmem:[#allocation112_spill] sm:$0xff] %v6775_v44  ;;  %v6787_v25 = vmul.f32 %v8349_v51, %v8348_v37  ;;  %v6791_v62 = vmul.f32 %v8349_v51, %v8351_v20  ;;  %v2712_v47 = vcombine.high %v2072_v52, %v2072_v52  ;;  %v8353_v14 = vld [vmem:[#allocation58_spill] sm:$0xff]  ;;  %v8354_v1 = vld [vmem:[#allocation32_spill] sm:$0xff] }
 0x265   : > { %8345 = vst [vmem:[#allocation68_spill] sm:$0xff] %v6779_v29  ;;  %8347 = vst [vmem:[#allocation115_spill] sm:$0xff] %v6783_v21  ;;  %v2202_v44 = vcombine.high %v2042_v13, %v2042_v13  ;;  %v6799_v21 = vmul.f32 %v8354_v1, %v8353_v14  ;;  %v8356_v37 = vld [vmem:[#allocation130_spill] sm:$0xff]  ;;  %v2719_v20 = vrot.slane %v2072_v52, %v6195_v27  ;;  %v8369_v48 = vld [vmem:[#allocation41_spill] sm:$0xff] }
 0x266   : > { %8350 = vst [vmem:[#allocation69_spill] sm:$0xff] %v6787_v25  ;;  %8352 = vst [vmem:[#allocation113_spill] sm:$0xff] %v6791_v62  ;;  %v6803_v29 = vmul.f32 %v8354_v1, %v8356_v37  ;;  %v2209_v51 = vrot.slane %v2042_v13, %v6195_v27  ;;  %v2044_v62 = vadd.f32 %v1900_v2, %v6597_v53  ;;  %v8362_v52 = vld [vmem:[#allocation34_spill] sm:$0xff] }
 0x267   : > { %8355 = vst [vmem:[#allocation70_spill] sm:$0xff] %v6799_v21  ;;  %v3288_v11 = vrot.slane %v3274_v0, %v6195_v27  ;;  %v6814_v14 = vmul.f32 %v8359_v17, %v8358_v19  ;;  %v6818_v1 = vmul.f32 %v8359_v17, %v6544_v36  ;;  %v6822_v13 = vmul.f32 %v8362_v52, %v6550_v34 }
 0x268   : > { %8357 = vst [vmem:[#allocation71_spill] sm:$0xff] %v6803_v29  ;;  %v2726_v53 = vrot.slane %v2712_v47, %v6195_v27  ;;  %v2216_v46 = vrot.slane %v2202_v44, %v6195_v27  ;;  %v2746_v37 = vcombine.high %v2074_v40, %v2074_v40  ;;  %v3281_v31 = vrot.slane %v3273_v5, %v6195_v27  ;;  %v8365_v44 = vld [vmem:[#allocation132_spill] sm:$0xff] }
 0x269   : > { %8360 = vst [vmem:[#allocation141_spill] sm:$0xff] %v6814_v14  ;;  %8361 = vst [vmem:[#allocation72_spill] sm:$0xff] %v6818_v1  ;;  %v2235_v0 = vcombine.high %v2233_v12, %v2233_v12  ;;  %v2727_v29 = vcombine.high %v2719_v20, %v2719_v20  ;;  %v2217_v21 = vcombine.high %v2209_v51, %v2209_v51 }
 0x26a   : > { %8363 = vst [vmem:[#allocation140_spill] sm:$0xff] %v6822_v13  ;;  %v2753_v19 = vrot.slane %v2074_v40, %v6195_v27  ;;  %v2073_v36 = vadd.f32 %v6531_v18, %v6593_v32  ;;  %v2236_v17 = vcombine.high %v2044_v62, %v2044_v62  ;;  %v2234_v1 = vcombine.high %v2226_v4, %v2226_v4  ;;  %v8366_v13 = vld [vmem:[#allocation39_spill] sm:$0xff] }
 0x26b   : > { %v2253_v14 = vcombine.high %v2045_v43, %v2045_v43  ;;  %v3289_v34 = vcombine.low %v3281_v31, %v3288_v11  ;;  %v6832_v47 = vmul.f32 %v8362_v52, %v6556_v55  ;;  %v6836_v25 = vmul.f32 %v8366_v13, %v8365_v44 }
 0x26c   : > { %v6840_v5 = vmul.f32 %v8366_v13, %v6568_v42  ;;  %v2728_v40 = vcombine.high %v2726_v53, %v2726_v53  ;;  %v6844_v18 = vmul.f32 %v8369_v48, %v6576_v60  ;;  %v2218_v32 = vcombine.high %v2216_v46, %v2216_v46 }
 0x26d   : > { %8364 = vst [vmem:[#allocation73_spill] sm:$0xff] %v6832_v47  ;;  %8367 = vst [vmem:[#allocation142_spill] sm:$0xff] %v6836_v25  ;;  %v2760_v11 = vrot.slane %v2746_v37, %v6195_v27  ;;  %v3308_v31 = vcombine.low %v2233_v12, %v2235_v0  ;;  %4348 = vperm.xlu1 %5158, %v3289_v34   ;;  %v6847_v55 = vcombine.low %v2719_v20, %v2727_v29  ;;  %v1908_v25 = vpop.permute.xlu0 %1907 }
 0x26e   : > { %8368 = vst [vmem:[#allocation118_spill] sm:$0xff] %v6840_v5  ;;  %8370 = vst [vmem:[#allocation74_spill] sm:$0xff] %v6844_v18  ;;  %v6851_v52 = vmul.f32 %v8369_v48, %v6583_v15  ;;  %v2761_v44 = vcombine.high %v2753_v19, %v2753_v19  ;;  %v3290_v47 = vcombine.low %v2209_v51, %v2217_v21  ;;  %v6855_v18 = vpop.permute.xlu1 %1911 }
 0x26f   : > { %v2729_v42 = vcombine.high %v2073_v36, %v2073_v36  ;;  %v2250_v13 = vrot.slane %v2236_v17, %v6195_v27  ;;  %v3307_v5 = vcombine.low %v2226_v4, %v2234_v1  ;;  %v2267_v60 = vrot.slane %v2253_v14, %v6195_v27 }
 0x270   : > { %v6857_v37 = vcombine.low %v2726_v53, %v2728_v40  ;;  %v2736_v29 = vrot.slane %v2073_v36, %v6195_v27  ;;  %v2076_v12 = vadd.f32 %v1900_v2, %v6601_v26  ;;  %v2243_v15 = vrot.slane %v2044_v62, %v6195_v27 }
 0x271   : > { %v2762_v48 = vcombine.high %v2760_v11, %v2760_v11  ;;  %v3291_v20 = vcombine.low %v2216_v46, %v2218_v32  ;;  %v2260_v21 = vrot.slane %v2045_v43, %v6195_v27  ;;  %v3322_v51 = vrot.slane %v3308_v31, %v6195_v27 }
 0x272   : > { %8371 = vst [vmem:[#allocation43_spill] sm:$0xff] %v6857_v37  ;;  %v3298_v4 = vrot.slane %v3290_v47, %v6195_v27  ;;  %v6865_v1 = vcombine.low %v2753_v19, %v2761_v44  ;;  %v2046_v14 = vadd.f32 %v1908_v25, %v6611_v16  ;;  %v2047_v53 = vadd.f32 %v6855_v18, %v6635_v24  ;;  %v6880_v37 = vpop.permute.xlu1 %1919 }
 0x273   : > { %v2743_v0 = vrot.slane %v2729_v42, %v6195_v27  ;;  %v2252_v26 = vcombine.high %v2250_v13, %v2250_v13  ;;  %v3315_v62 = vrot.slane %v3307_v5, %v6195_v27  ;;  %v2269_v2 = vcombine.high %v2267_v60, %v2267_v60 }
 0x274   : > { %v2744_v46 = vcombine.high %v2736_v29, %v2736_v29  ;;  %v2251_v36 = vcombine.high %v2243_v15, %v2243_v15  ;;  %v2780_v43 = vcombine.high %v2076_v12, %v2076_v12  ;;  %v2787_v17 = vrot.slane %v2076_v12, %v6195_v27 }
 0x275   : > { %v2075_v19 = vadd.f32 %v6671_v57, %v6607_v58  ;;  %v2268_v34 = vcombine.high %v2260_v21, %v2260_v21  ;;  %v3323_v47 = vcombine.low %v3315_v62, %v3322_v51  ;;  %v3305_v16 = vrot.slane %v3291_v20, %v6195_v27 }
 0x276   : > { %v6878_v40 = vcombine.low %v2760_v11, %v2762_v48  ;;  %v2270_v32 = vcombine.high %v2046_v14, %v2046_v14  ;;  %v2287_v5 = vcombine.high %v2047_v53, %v2047_v53  ;;  %v2745_v31 = vcombine.high %v2743_v0, %v2743_v0 }
 0x277   : > { %v3325_v44 = vcombine.low %v2250_v13, %v2252_v26  ;;  %v3342_v42 = vcombine.low %v2267_v60, %v2269_v2  ;;  %4354 = vperm.xlu0 %5157, %v3323_v47   ;;  %v3306_v12 = vcombine.low %v3298_v4, %v3305_v16  ;;  %v2794_v57 = vrot.slane %v2780_v43, %v6195_v27 }
 0x278   : > { %v2795_v20 = vcombine.high %v2787_v17, %v2787_v17  ;;  %v2078_v51 = vadd.f32 %v1908_v25, %v6615_v38  ;;  %v6886_v62 = vcombine.low %v2736_v29, %v2744_v46  ;;  %v3324_v11 = vcombine.low %v2243_v15, %v2251_v36  ;;  %v1916_v46 = vpop.permute.xlu0 %1915 }
 0x279   : > { %v2763_v48 = vcombine.high %v2075_v19, %v2075_v19  ;;  %v3341_v24 = vcombine.low %v2260_v21, %v2268_v34  ;;  %4351 = vperm.xlu1 %5158, %v3306_v12   ;;  %v2770_v13 = vrot.slane %v2075_v19, %v6195_v27  ;;  %v2284_v60 = vrot.slane %v2270_v32, %v6195_v27 }
 0x27a   : > { %v2301_v4 = vrot.slane %v2287_v5, %v6195_v27  ;;  %v2049_v26 = vadd.f32 %v6880_v37, %v6651_v39  ;;  %v6893_v2 = vcombine.low %v2743_v0, %v2745_v31  ;;  %v2277_v43 = vrot.slane %v2046_v14, %v6195_v27 }
 0x27b   : > { %v3356_v38 = vrot.slane %v3342_v42, %v6195_v27  ;;  %v3339_v25 = vrot.slane %v3325_v44, %v6195_v27  ;;  %v2796_v29 = vcombine.high %v2794_v57, %v2794_v57  ;;  %v6898_v15 = vcombine.low %v2787_v17, %v2795_v20 }
 0x27c   : > { %v2814_v21 = vcombine.high %v2078_v51, %v2078_v51  ;;  %v2294_v36 = vrot.slane %v2047_v53, %v6195_v27  ;;  %v3332_v19 = vrot.slane %v3324_v11, %v6195_v27  ;;  %v2777_v34 = vrot.slane %v2763_v48, %v6195_v27 }
 0x27d   : > { %v2821_v39 = vrot.slane %v2078_v51, %v6195_v27  ;;  %v3349_v0 = vrot.slane %v3341_v24, %v6195_v27  ;;  %v2778_v14 = vcombine.high %v2770_v13, %v2770_v13  ;;  %v2286_v47 = vcombine.high %v2284_v60, %v2284_v60 }
 0x27e   : > { %v2303_v16 = vcombine.high %v2301_v4, %v2301_v4  ;;  %v2321_v32 = vcombine.high %v2049_v26, %v2049_v26  ;;  %v2285_v5 = vcombine.high %v2277_v43, %v2277_v43  ;;  %v2048_v17 = vadd.f32 %v1916_v46, %v6627_v61 }
 0x27f   : > { %v3357_v31 = vcombine.low %v3349_v0, %v3356_v38  ;;  %v3340_v44 = vcombine.low %v3332_v19, %v3339_v25  ;;  %v2828_v42 = vrot.slane %v2814_v21, %v6195_v27  ;;  %v2077_v12 = vadd.f32 %v6793_v49, %v6623_v54  ;;  %v1924_v25 = vpop.permute.xlu0 %1923 }
 0x280   : > { %v2302_v20 = vcombine.high %v2294_v36, %v2294_v36  ;;  %v6911_v51 = vcombine.low %v2794_v57, %v2796_v29  ;;  %v2829_v11 = vcombine.high %v2821_v39, %v2821_v39  ;;  %v2779_v61 = vcombine.high %v2777_v34, %v2777_v34  ;;  %v6919_v57 = vpop.permute.xlu1 %1927 }
 0x281   : > { %4360 = vperm.xlu0 %5157, %v3357_v31   ;;  %4357 = vperm.xlu1 %5158, %v3340_v44   ;;  %v3359_v48 = vcombine.low %v2284_v60, %v2286_v47  ;;  %v3376_v38 = vcombine.low %v2301_v4, %v2303_v16  ;;  %v2335_v19 = vrot.slane %v2321_v32, %v6195_v27 }
 0x282   : > { %v6916_v0 = vcombine.low %v2770_v13, %v2778_v14  ;;  %v3358_v21 = vcombine.low %v2277_v43, %v2285_v5  ;;  %v2080_v54 = vadd.f32 %v1916_v46, %v6631_v30  ;;  %v2304_v49 = vcombine.high %v2048_v17, %v2048_v17 }
 0x283   : > { %v2830_v29 = vcombine.high %v2828_v42, %v2828_v42  ;;  %v2797_v58 = vcombine.high %v2077_v12, %v2077_v12  ;;  %v3375_v24 = vcombine.low %v2294_v36, %v2302_v20  ;;  %v2328_v31 = vrot.slane %v2049_v26, %v6195_v27 }
 0x284   : > { %v6922_v44 = vcombine.low %v2821_v39, %v2829_v11  ;;  %v2804_v60 = vrot.slane %v2077_v12, %v6195_v27  ;;  %v2311_v4 = vrot.slane %v2048_v17, %v6195_v27  ;;  %v2050_v13 = vadd.f32 %v1924_v25, %v6643_v56 }
 0x285   : > { %v2337_v14 = vcombine.high %v2335_v19, %v2335_v19  ;;  %v2051_v30 = vadd.f32 %v6919_v57, %v6669_v22  ;;  %v3390_v43 = vrot.slane %v3376_v38, %v6195_v27  ;;  %v3373_v46 = vrot.slane %v3359_v48, %v6195_v27 }
 0x286   : > { %8372 = vst [vmem:[#allocation75_spill] sm:$0xff] %v6922_v44  ;;  %v6931_v47 = vcombine.low %v2777_v34, %v2779_v61  ;;  %v3366_v26 = vrot.slane %v3358_v21, %v6195_v27  ;;  %v2318_v36 = vrot.slane %v2304_v49, %v6195_v27  ;;  %v2848_v39 = vcombine.high %v2080_v54, %v2080_v54 }
 0x287   : > { %v2811_v16 = vrot.slane %v2797_v58, %v6195_v27  ;;  %v2079_v56 = vadd.f32 %v6855_v18, %v6639_v33  ;;  %v3383_v32 = vrot.slane %v3375_v24, %v6195_v27  ;;  %v2336_v5 = vcombine.high %v2328_v31, %v2328_v31 }
 0x288   : > { %v2812_v22 = vcombine.high %v2804_v60, %v2804_v60  ;;  %v2319_v17 = vcombine.high %v2311_v4, %v2311_v4  ;;  %v2855_v12 = vrot.slane %v2080_v54, %v6195_v27  ;;  %v2338_v20 = vcombine.high %v2050_v13, %v2050_v13 }
 0x289   : > { %v3410_v34 = vcombine.low %v2335_v19, %v2337_v14  ;;  %v2355_v11 = vcombine.high %v2051_v30, %v2051_v30  ;;  %v3391_v61 = vcombine.low %v3383_v32, %v3390_v43  ;;  %v3374_v48 = vcombine.low %v3366_v26, %v3373_v46  ;;  %v1932_v46 = vpop.permute.xlu0 %1931  ;;  %v6949_v26 = vpop.permute.xlu1 %1935 }
 0x28a   : > { %v6942_v21 = vcombine.low %v2828_v42, %v2830_v29  ;;  %v2320_v58 = vcombine.high %v2318_v36, %v2318_v36  ;;  %v2862_v33 = vrot.slane %v2848_v39, %v6195_v27  ;;  %v2813_v24 = vcombine.high %v2811_v16, %v2811_v16 }
 0x28b   : > { %v3409_v49 = vcombine.low %v2328_v31, %v2336_v5  ;;  %4366 = vperm.xlu0 %5157, %v3391_v61   ;;  %4363 = vperm.xlu1 %5158, %v3374_v48   ;;  %v6947_v54 = vcombine.low %v2804_v60, %v2812_v22  ;;  %v2863_v19 = vcombine.high %v2855_v12, %v2855_v12 }
 0x28c   : > { %v3392_v14 = vcombine.low %v2311_v4, %v2319_v17  ;;  %v2831_v43 = vcombine.high %v2079_v56, %v2079_v56  ;;  %v2838_v42 = vrot.slane %v2079_v56, %v6195_v27  ;;  %v2352_v29 = vrot.slane %v2338_v20, %v6195_v27 }
 0x28d   : > { %v2369_v39 = vrot.slane %v2355_v11, %v6195_v27  ;;  %v3424_v32 = vrot.slane %v3410_v34, %v6195_v27  ;;  %v2864_v18 = vcombine.high %v2862_v33, %v2862_v33  ;;  %v3393_v31 = vcombine.low %v2318_v36, %v2320_v58  ;;  %v1940_v38 = vpop.permute.xlu0 %1939  ;;  %v6982_v44 = vpop.permute.xlu1 %1943 }
 0x28e   : > { %v2082_v5 = vadd.f32 %v1924_v25, %v6647_v23  ;;  %v2345_v60 = vrot.slane %v2050_v13, %v6195_v27  ;;  %v3417_v4 = vrot.slane %v3409_v49, %v6195_v27  ;;  %v2052_v22 = vadd.f32 %v1932_v46, %v6661_v41 }
 0x28f   : > { %v2362_v17 = vrot.slane %v2051_v30, %v6195_v27  ;;  %v2053_v56 = vadd.f32 %v6949_v26, %v6688_v8  ;;  %v6962_v20 = vcombine.low %v2811_v16, %v2813_v24  ;;  %v3400_v11 = vrot.slane %v3392_v14, %v6195_v27 }
 0x290   : > { %v6965_v34 = vcombine.low %v2855_v12, %v2863_v19  ;;  %v2845_v36 = vrot.slane %v2831_v43, %v6195_v27  ;;  %v2846_v23 = vcombine.high %v2838_v42, %v2838_v42  ;;  %v2354_v25 = vcombine.high %v2352_v29, %v2352_v29 }
 0x291   : > { %v2371_v13 = vcombine.high %v2369_v39, %v2369_v39  ;;  %v3425_v61 = vcombine.low %v3417_v4, %v3424_v32  ;;  %v2353_v48 = vcombine.high %v2345_v60, %v2345_v60  ;;  %v2882_v58 = vcombine.high %v2082_v5, %v2082_v5 }
 0x292   : > { %8373 = vst [vmem:[#allocation145_spill] sm:$0xff] %v6965_v34  ;;  %v2889_v41 = vrot.slane %v2082_v5, %v6195_v27  ;;  %v3407_v30 = vrot.slane %v3393_v31, %v6195_v27  ;;  %v2081_v8 = vadd.f32 %v6880_v37, %v6657_v28  ;;  %v2372_v16 = vcombine.high %v2052_v22, %v2052_v22 }
 0x293   : > { %v2370_v24 = vcombine.high %v2362_v17, %v2362_v17  ;;  %v2389_v49 = vcombine.high %v2053_v56, %v2053_v56  ;;  %4372 = vperm.xlu0 %5157, %v3425_v61   ;;  %v6974_v19 = vcombine.low %v2862_v33, %v2864_v18  ;;  %v2847_v14 = vcombine.high %v2845_v36, %v2845_v36 }
 0x294   : > { %v3408_v43 = vcombine.low %v3400_v11, %v3407_v30  ;;  %v6978_v5 = vcombine.low %v2838_v42, %v2846_v23  ;;  %v3427_v31 = vcombine.low %v2352_v29, %v2354_v25  ;;  %v3444_v4 = vcombine.low %v2369_v39, %v2371_v13 }
 0x295   : > { %8374 = vst [vmem:[#allocation119_spill] sm:$0xff] %v6974_v19  ;;  %v2896_v28 = vrot.slane %v2882_v58, %v6195_v27  ;;  %v2897_v37 = vcombine.high %v2889_v41, %v2889_v41  ;;  %v3426_v53 = vcombine.low %v2345_v60, %v2353_v48  ;;  %v2084_v61 = vadd.f32 %v1932_v46, %v6665_v3  ;;  %v8408_v19 = vld [vmem:[#allocation70_spill] sm:$0xff] }
 0x296   : > { %8375 = vst [vmem:[#allocation76_spill] sm:$0xff] %v6978_v5  ;;  %4369 = vperm.xlu1 %5158, %v3408_v43   ;;  %v2865_v33 = vcombine.high %v2081_v8, %v2081_v8  ;;  %v2386_v18 = vrot.slane %v2372_v16, %v6195_v27  ;;  %v3443_v11 = vcombine.low %v2362_v17, %v2370_v24 }
 0x297   : > { %v2403_v30 = vrot.slane %v2389_v49, %v6195_v27  ;;  %v6986_v42 = vcombine.low %v2845_v36, %v2847_v14  ;;  %v2872_v29 = vrot.slane %v2081_v8, %v6195_v27  ;;  %v2379_v39 = vrot.slane %v2052_v22, %v6195_v27 }
 0x298   : > { %v2054_v23 = vadd.f32 %v1940_v38, %v6679_v50  ;;  %v2396_v60 = vrot.slane %v2053_v56, %v6195_v27  ;;  %v2055_v3 = vadd.f32 %v6982_v44, %v6704_v45  ;;  %v3458_v46 = vrot.slane %v3444_v4, %v6195_v27 }
 0x299   : > { %v3441_v25 = vrot.slane %v3427_v31, %v6195_v27  ;;  %v2898_v17 = vcombine.high %v2896_v28, %v2896_v28  ;;  %v3434_v13 = vrot.slane %v3426_v53, %v6195_v27  ;;  %v6997_v36 = vcombine.low %v2889_v41, %v2897_v37 }
 0x29a   : > { %v2916_v48 = vcombine.high %v2084_v61, %v2084_v61  ;;  %v2879_v58 = vrot.slane %v2865_v33, %v6195_v27  ;;  %v2388_v22 = vcombine.high %v2386_v18, %v2386_v18  ;;  %v3451_v50 = vrot.slane %v3443_v11, %v6195_v27 }
 0x29b   : > { %8376 = vst [vmem:[#allocation121_spill] sm:$0xff] %v6997_v36  ;;  %v2405_v8 = vcombine.high %v2403_v30, %v2403_v30  ;;  %v2880_v56 = vcombine.high %v2872_v29, %v2872_v29  ;;  %v2387_v16 = vcombine.high %v2379_v39, %v2379_v39  ;;  %v2923_v45 = vrot.slane %v2084_v61, %v6195_v27 }
 0x29c   : > { %v2406_v24 = vcombine.high %v2054_v23, %v2054_v23  ;;  %v2404_v49 = vcombine.high %v2396_v60, %v2396_v60  ;;  %v2423_v14 = vcombine.high %v2055_v3, %v2055_v3  ;;  %v3459_v43 = vcombine.low %v3451_v50, %v3458_v46  ;;  %v1947_v50 = vpop.permute.xlu0 %1946 }
 0x29d   : > { %v3442_v31 = vcombine.low %v3434_v13, %v3441_v25  ;;  %v7004_v41 = vcombine.low %v2896_v28, %v2898_v17  ;;  %v2930_v4 = vrot.slane %v2916_v48, %v6195_v27  ;;  %v2083_v37 = vadd.f32 %v6919_v57, %v6675_v9  ;;  %v7016_v57 = vpop.permute.xlu1 %1950 }
 0x29e   : > { %v2881_v33 = vcombine.high %v2879_v58, %v2879_v58  ;;  %v3461_v11 = vcombine.low %v2386_v18, %v2388_v22  ;;  %v3478_v32 = vcombine.low %v2403_v30, %v2405_v8  ;;  %4378 = vperm.xlu0 %5157, %v3459_v43   ;;  %v7011_v46 = vcombine.low %v2872_v29, %v2880_v56 }
 0x29f   : > { %8377 = vst [vmem:[#allocation77_spill] sm:$0xff] %v7004_v41  ;;  %4375 = vperm.xlu1 %5158, %v3442_v31   ;;  %v2931_v25 = vcombine.high %v2923_v45, %v2923_v45  ;;  %v2086_v13 = vadd.f32 %v1940_v38, %v6684_v6  ;;  %v3460_v28 = vcombine.low %v2379_v39, %v2387_v16  ;;  %v8407_v41 = vld [vmem:[#allocation141_spill] sm:$0xff] }
 0x2a0   : > { %8378 = vst [vmem:[#allocation78_spill] sm:$0xff] %v7011_v46  ;;  %v2420_v17 = vrot.slane %v2406_v24, %v6195_v27  ;;  %v3477_v48 = vcombine.low %v2396_v60, %v2404_v49  ;;  %v2437_v9 = vrot.slane %v2423_v14, %v6195_v27  ;;  %v2932_v18 = vcombine.high %v2930_v4, %v2930_v4 }
 0x2a1   : > { %v2899_v30 = vcombine.high %v2083_v37, %v2083_v37  ;;  %v2906_v22 = vrot.slane %v2083_v37, %v6195_v27  ;;  %v2413_v8 = vrot.slane %v2054_v23, %v6195_v27  ;;  %v7020_v29 = vcombine.low %v2879_v58, %v2881_v33  ;;  %v7041_v12 = vpop.permute.xlu1 %1958 }
 0x2a2   : > { %v2430_v56 = vrot.slane %v2055_v3, %v6195_v27  ;;  %v3492_v6 = vrot.slane %v3478_v32, %v6195_v27  ;;  %v3475_v38 = vrot.slane %v3461_v11, %v6195_v27  ;;  %v7025_v39 = vcombine.low %v2923_v45, %v2931_v25 }
 0x2a3   : > { %8379 = vst [vmem:[#allocation144_spill] sm:$0xff] %v7020_v29  ;;  %v2950_v60 = vcombine.high %v2086_v13, %v2086_v13  ;;  %v2056_v16 = vadd.f32 %v1947_v50, %v6696_v63  ;;  %v2057_v24 = vadd.f32 %v7016_v57, %v6722_v10  ;;  %v3468_v49 = vrot.slane %v3460_v28, %v6195_v27  ;;  %v1955_v63 = vpop.permute.xlu0 %1954 }
 0x2a4   : > { %8380 = vst [vmem:[#allocation122_spill] sm:$0xff] %v7025_v39  ;;  %v2422_v14 = vcombine.high %v2420_v17, %v2420_v17  ;;  %v3485_v23 = vrot.slane %v3477_v48, %v6195_v27  ;;  %v2439_v58 = vcombine.high %v2437_v9, %v2437_v9  ;;  %v2913_v3 = vrot.slane %v2899_v30, %v6195_v27 }
 0x2a5   : > { %v2914_v43 = vcombine.high %v2906_v22, %v2906_v22  ;;  %v2421_v32 = vcombine.high %v2413_v8, %v2413_v8  ;;  %v2957_v31 = vrot.slane %v2086_v13, %v6195_v27  ;;  %v2085_v45 = vadd.f32 %v6949_v26, %v6692_v59 }
 0x2a6   : > { %v2438_v37 = vcombine.high %v2430_v56, %v2430_v56  ;;  %v3493_v33 = vcombine.low %v3485_v23, %v3492_v6  ;;  %v3476_v11 = vcombine.low %v3468_v49, %v3475_v38  ;;  %v2964_v25 = vrot.slane %v2950_v60, %v6195_v27 }
 0x2a7   : > { %v2440_v28 = vcombine.high %v2056_v16, %v2056_v16  ;;  %v2457_v48 = vcombine.high %v2057_v24, %v2057_v24  ;;  %v7039_v61 = vcombine.low %v2930_v4, %v2932_v18  ;;  %v3495_v30 = vcombine.low %v2420_v17, %v2422_v14  ;;  %v8383_v18 = vld [vmem:[#allocation136_spill] sm:$0xff] }
 0x2a8   : > { %v3512_v53 = vcombine.low %v2437_v9, %v2439_v58  ;;  %4384 = vperm.xlu0 %5157, %v3493_v33   ;;  %4381 = vperm.xlu1 %5158, %v3476_v11   ;;  %v2915_v26 = vcombine.high %v2913_v3, %v2913_v3  ;;  %v2965_v13 = vcombine.high %v2957_v31, %v2957_v31  ;;  %v7054_v11 = vpop.permute.xlu0 %1962 }
 0x2a9   : > { %8381 = vst [vmem:[#allocation79_spill] sm:$0xff] %v7039_v61  ;;  %v2088_v6 = vadd.f32 %v1947_v50, %v6700_v7  ;;  %v7046_v38 = vcombine.low %v2906_v22, %v2914_v43  ;;  %v3494_v60 = vcombine.low %v2413_v8, %v2421_v32  ;;  %v2933_v49 = vcombine.high %v2085_v45, %v2085_v45 }
 0x2aa   : > { %v3511_v23 = vcombine.low %v2430_v56, %v2438_v37  ;;  %v2966_v4 = vcombine.high %v2964_v25, %v2964_v25  ;;  %v2454_v17 = vrot.slane %v2440_v28, %v6195_v27  ;;  %v2471_v9 = vrot.slane %v2457_v48, %v6195_v27 }
 0x2ab   : > { %8382 = vst [vmem:[#allocation120_spill] sm:$0xff] %v7046_v38  ;;  %v2059_v14 = vadd.f32 %v7041_v12, %v8383_v18  ;;  %v2940_v58 = vrot.slane %v2085_v45, %v6195_v27  ;;  %v2447_v33 = vrot.slane %v2056_v16, %v6195_v27  ;;  %v3526_v7 = vrot.slane %v3512_v53, %v6195_v27  ;;  %v8385_v16 = vld [vmem:[#allocation62_spill] sm:$0xff] }
 0x2ac   : > { %v3509_v50 = vrot.slane %v3495_v30, %v6195_v27  ;;  %v7058_v22 = vcombine.low %v2957_v31, %v2965_v13  ;;  %v2984_v8 = vcombine.high %v2088_v6, %v2088_v6  ;;  %v2991_v56 = vrot.slane %v2088_v6, %v6195_v27  ;;  %v7068_v31 = vpop.permute.xlu1 %1966  ;;  %v7074_v39 = vpop.permute.xlu0 %1970 }
 0x2ad   : > { %v2464_v43 = vrot.slane %v2057_v24, %v6195_v27  ;;  %v3502_v32 = vrot.slane %v3494_v60, %v6195_v27  ;;  %v2947_v37 = vrot.slane %v2933_v49, %v6195_v27  ;;  %v3519_v45 = vrot.slane %v3511_v23, %v6195_v27 }
 0x2ae   : > { %8384 = vst [vmem:[#allocation80_spill] sm:$0xff] %v7058_v22  ;;  %v2058_v28 = vadd.f32 %v1955_v63, %v8385_v16  ;;  %v7066_v48 = vcombine.low %v2913_v3, %v2915_v26  ;;  %v2456_v53 = vcombine.high %v2454_v17, %v2454_v17  ;;  %v2473_v18 = vcombine.high %v2471_v9, %v2471_v9  ;;  %v8387_v16 = vld [vmem:[#allocation63_spill] sm:$0xff] }
 0x2af   : > { %v2491_v30 = vcombine.high %v2059_v14, %v2059_v14  ;;  %v2948_v13 = vcombine.high %v2940_v58, %v2940_v58  ;;  %v2455_v59 = vcombine.high %v2447_v33, %v2447_v33  ;;  %v3527_v6 = vcombine.low %v3519_v45, %v3526_v7 }
 0x2b0   : > { %8386 = vst [vmem:[#allocation124_spill] sm:$0xff] %v7066_v48  ;;  %v3510_v10 = vcombine.low %v3502_v32, %v3509_v50  ;;  %v2998_v60 = vrot.slane %v2984_v8, %v6195_v27  ;;  %v2999_v49 = vcombine.high %v2991_v56, %v2991_v56  ;;  %v2472_v23 = vcombine.high %v2464_v43, %v2464_v43  ;;  %v8390_v8 = vld [vmem:[#allocation61_spill] sm:$0xff] }
 0x2b1   : > { %v2949_v22 = vcombine.high %v2947_v37, %v2947_v37  ;;  %v2090_v3 = vadd.f32 %v1955_v63, %v8387_v16  ;;  %v2474_v26 = vcombine.high %v2058_v28, %v2058_v28  ;;  %4390 = vperm.xlu0 %5157, %v3527_v6   ;;  %v7076_v61 = vcombine.low %v2964_v25, %v2966_v4  ;;  %v7089_v25 = vpop.permute.xlu1 %1974 }
 0x2b2   : > { %4387 = vperm.xlu1 %5158, %v3510_v10   ;;  %v3529_v48 = vcombine.low %v2454_v17, %v2456_v53  ;;  %v3546_v7 = vcombine.low %v2471_v9, %v2473_v18  ;;  %v2505_v50 = vrot.slane %v2491_v30, %v6195_v27  ;;  %v7079_v32 = vcombine.low %v2940_v58, %v2948_v13  ;;  %v7106_v53 = vpop.permute.xlu0 %1978 }
 0x2b3   : > { %8388 = vst [vmem:[#allocation81_spill] sm:$0xff] %v7076_v61  ;;  %v3528_v45 = vcombine.low %v2447_v33, %v2455_v59  ;;  %v7083_v24 = vadd.f32 %v6982_v44, %v8390_v8  ;;  %v2481_v63 = vrot.slane %v2058_v28, %v6195_v27  ;;  %v3000_v16 = vcombine.high %v2998_v60, %v2998_v60  ;;  %v8394_v59 = vld [vmem:[#allocation30_spill] sm:$0xff]  ;;  %v8399_v61 = vld [vmem:[#allocation67_spill] sm:$0xff] }
 0x2b4   : > { %8389 = vst [vmem:[#allocation19_spill] sm:$0xff] %v7079_v32  ;;  %v7086_v38 = vcombine.low %v2991_v56, %v2999_v49  ;;  %v3545_v6 = vcombine.low %v2464_v43, %v2472_v23  ;;  %v2498_v10 = vrot.slane %v2059_v14, %v6195_v27  ;;  %v7091_v4 = vcombine.low %v2947_v37, %v2949_v22  ;;  %v8400_v32 = vld [vmem:[#allocation111_spill] sm:$0xff] }
 0x2b5   : > { %8391 = vst [vmem:[#allocation82_spill] sm:$0xff] %v7083_v24  ;;  %v2488_v17 = vrot.slane %v2474_v26, %v6195_v27  ;;  %v3018_v9 = vcombine.high %v2090_v3, %v2090_v3  ;;  %v2060_v58 = vadd.f32 %v7054_v11, %v8394_v59  ;;  %v2507_v44 = vcombine.high %v2505_v50, %v2505_v50  ;;  %v8396_v26 = vld [vmem:[#allocation139_spill] sm:$0xff] }
 0x2b6   : > { %8392 = vst [vmem:[#allocation51_spill] sm:$0xff] %v7086_v38  ;;  %8393 = vst [vmem:[#allocation83_spill] sm:$0xff] %v7091_v4  ;;  %v2061_v33 = vadd.f32 %v7068_v31, %v6755_v35  ;;  %v3560_v56 = vrot.slane %v3546_v7, %v6195_v27  ;;  %v3543_v43 = vrot.slane %v3529_v48, %v6195_v27  ;;  %v8406_v38 = vld [vmem:[#allocation68_spill] sm:$0xff] }
 0x2b7   : > { %v3536_v14 = vrot.slane %v3528_v45, %v6195_v27  ;;  %v2967_v22 = vcombine.high %v7083_v24, %v7083_v24  ;;  %v2489_v37 = vcombine.high %v2481_v63, %v2481_v63  ;;  %v7104_v28 = vrot.slane %v2090_v3, %v6195_v27 }
 0x2b8   : > { %v7108_v18 = vcombine.low %v2998_v60, %v3000_v16  ;;  %v3553_v30 = vrot.slane %v3545_v6, %v6195_v27  ;;  %v2506_v13 = vcombine.high %v2498_v10, %v2498_v10  ;;  %v2490_v48 = vcombine.high %v2488_v17, %v2488_v17  ;;  %v7118_v60 = vpop.permute.xlu1 %1982 }
 0x2b9   : > { %v7114_v49 = vrot.slane %v3018_v9, %v6195_v27  ;;  %v2508_v23 = vcombine.high %v2060_v58, %v2060_v58  ;;  %v2062_v7 = vadd.f32 %v7074_v39, %v8396_v26  ;;  %v3580_v3 = vcombine.low %v2505_v50, %v2507_v44  ;;  %8397 = vst [vmem:[#allocation123_spill] sm:$0xff] %v7118_v60 }
 0x2ba   : > { %8395 = vst [vmem:[#allocation21_spill] sm:$0xff] %v7108_v18  ;;  %v2525_v45 = vcombine.high %v2061_v33, %v2061_v33  ;;  %v3561_v8 = vcombine.low %v3553_v30, %v3560_v56  ;;  %v3544_v59 = vcombine.low %v3536_v14, %v3543_v43  ;;  %v7121_v16 = vrot.slane %v2967_v22, %v6195_v27  ;;  %v8402_v30 = vld [vmem:[#allocation64_spill] sm:$0xff] }
 0x2bb   : > { %v3562_v35 = vcombine.low %v2481_v63, %v2489_v37  ;;  %v2063_v9 = vadd.f32 %v7089_v25, %v8399_v61  ;;  %v7129_v4 = vadd.f32 %v7016_v57, %v8400_v32  ;;  %v2515_v50 = vrot.slane %v2060_v58, %v6195_v27  ;;  %v7135_v63 = vpop.permute.xlu0 %1986  ;;  %v8401_v57 = vld [vmem:[#allocation66_spill] sm:$0xff] }
 0x2bc   : > { %8398 = vst [vmem:[#allocation52_spill] sm:$0xff] %v7121_v16  ;;  %v3579_v44 = vcombine.low %v2498_v10, %v2506_v13  ;;  %4396 = vperm.xlu0 %5157, %v3561_v8   ;;  %4393 = vperm.xlu1 %5158, %v3544_v59   ;;  %v3563_v43 = vcombine.low %v2488_v17, %v2490_v48  ;;  %v8404_v59 = vld [vmem:[#allocation69_spill] sm:$0xff] }
 0x2bd   : > { %v2522_v14 = vrot.slane %v2508_v23, %v6195_v27  ;;  %v2542_v22 = vcombine.high %v2062_v7, %v2062_v7  ;;  %v2549_v61 = vrot.slane %v2062_v7, %v6195_v27  ;;  %v2539_v37 = vrot.slane %v2525_v45, %v6195_v27 }
 0x2be   : > { %v2064_v32 = vadd.f32 %v7106_v53, %v8401_v57  ;;  %v3594_v10 = vrot.slane %v3580_v3, %v6195_v27  ;;  %v3570_v58 = vrot.slane %v3562_v35, %v6195_v27  ;;  %v7145_v13 = vadd.f32 %v7054_v11, %v8402_v30  ;;  %v7155_v3 = vpop.permute.xlu1 %1990 }
 0x2bf   : > { %v2532_v17 = vrot.slane %v2061_v33, %v6195_v27  ;;  %v2559_v48 = vcombine.high %v2063_v9, %v2063_v9  ;;  %v7152_v26 = vrot.slane %v7129_v4, %v6195_v27  ;;  %v2523_v7 = vcombine.high %v2515_v50, %v2515_v50  ;;  %8403 = vst [vmem:[#allocation84_spill] sm:$0xff] %v7155_v3 }
 0x2c0   : > { %v3587_v45 = vrot.slane %v3579_v44, %v6195_v27  ;;  %v2524_v35 = vcombine.high %v2522_v14, %v2522_v14  ;;  %v2556_v8 = vrot.slane %v2542_v22, %v6195_v27  ;;  %v2566_v11 = vrot.slane %v2063_v9, %v6195_v27  ;;  %v7163_v44 = vpop.permute.xlu0 %1994  ;;  %v8410_v22 = vld [vmem:[#allocation65_spill] sm:$0xff] }
 0x2c1   : > { %v2065_v33 = vadd.f32 %v7118_v60, %v8404_v59  ;;  %v2557_v57 = vcombine.high %v2549_v61, %v2549_v61  ;;  %v2541_v30 = vcombine.high %v2539_v37, %v2539_v37  ;;  %v2576_v56 = vcombine.high %v2064_v32, %v2064_v32  ;;  %8405 = vst [vmem:[#allocation18_spill] sm:$0xff] %v7163_v44 }
 0x2c2   : > { %v3595_v6 = vcombine.low %v3587_v45, %v3594_v10  ;;  %v2540_v23 = vcombine.high %v2532_v17, %v2532_v17  ;;  %v2583_v16 = vrot.slane %v2064_v32, %v6195_v27  ;;  %v2573_v24 = vrot.slane %v2559_v48, %v6195_v27  ;;  %v7174_v5 = vpop.permute.xlu1 %1998 }
 0x2c3   : > { %v3577_v36 = vrot.slane %v3563_v43, %v6195_v27  ;;  %v3596_v9 = vcombine.low %v2515_v50, %v2523_v7  ;;  %v2066_v59 = vadd.f32 %v7135_v63, %v8406_v38  ;;  %v2067_v10 = vadd.f32 %v7155_v3, %v8407_v41  ;;  %8409 = vst [vmem:[#allocation129_spill] sm:$0xff] %v7174_v5 }
 0x2c4   : > { %4402 = vperm.xlu0 %5157, %v3595_v6   ;;  %v2558_v45 = vcombine.high %v2556_v8, %v2556_v8  ;;  %v2574_v34 = vcombine.high %v2566_v11, %v2566_v11  ;;  %v2593_v32 = vcombine.high %v2065_v33, %v2065_v33  ;;  %v3597_v48 = vcombine.low %v2522_v14, %v2524_v35 }
 0x2c5   : > { %v3578_v18 = vcombine.low %v3570_v58, %v3577_v36  ;;  %v3630_v46 = vcombine.low %v2549_v61, %v2557_v57  ;;  %v3614_v60 = vcombine.low %v2539_v37, %v2541_v30  ;;  %v2068_v43 = vadd.f32 %v7163_v44, %v8408_v19 }
 0x2c6   : > { %v3613_v50 = vcombine.low %v2532_v17, %v2540_v23  ;;  %v2590_v7 = vrot.slane %v2576_v56, %v6195_v27  ;;  %v2591_v38 = vcombine.high %v2583_v16, %v2583_v16  ;;  %v2575_v6 = vcombine.high %v2573_v24, %v2573_v24  ;;  %v7184_v17 = vpop.permute.xlu0 %2002 }
 0x2c7   : > { %4399 = vperm.xlu1 %5158, %v3578_v18   ;;  %v3604_v41 = vrot.slane %v3596_v9, %v6195_v27  ;;  %v7180_v3 = vadd.f32 %v7041_v12, %v8410_v22  ;;  %v2610_v36 = vcombine.high %v2066_v59, %v2066_v59  ;;  %v2627_v14 = vcombine.high %v2067_v10, %v2067_v10  ;;  %v8412_v22 = vld [vmem:[#allocation140_spill] sm:$0xff]  ;;  %v2007_v9 = vpop.permute.xlu1 %2006 }
 0x2c8   : > { %v3631_v61 = vcombine.low %v2556_v8, %v2558_v45  ;;  %v3647_v37 = vcombine.low %v2566_v11, %v2574_v34  ;;  %v2600_v19 = vrot.slane %v2065_v33, %v6195_v27  ;;  %v2607_v58 = vrot.slane %v2593_v32, %v6195_v27  ;;  %8411 = vst [vmem:[#allocation85_spill] sm:$0xff] %v7184_v17 }
 0x2c9   : > { %v3638_v56 = vrot.slane %v3630_v46, %v6195_v27  ;;  %v2644_v23 = vcombine.high %v2068_v43, %v2068_v43  ;;  %v3628_v18 = vrot.slane %v3614_v60, %v6195_v27  ;;  %v3611_v35 = vrot.slane %v3597_v48, %v6195_v27 }
 0x2ca   : > { %v3621_v12 = vrot.slane %v3613_v50, %v6195_v27  ;;  %v2592_v57 = vcombine.high %v2590_v7, %v2590_v7  ;;  %v7190_v30 = vcombine.low %v2583_v16, %v2591_v38  ;;  %v3648_v8 = vcombine.low %v2573_v24, %v2575_v6  ;;  %v8413_v38 = vld [vmem:[#allocation142_spill] sm:$0xff] }
 0x2cb   : > { %v2617_v34 = vrot.slane %v2066_v59, %v6195_v27  ;;  %v2624_v11 = vrot.slane %v2610_v36, %v6195_v27  ;;  %v2641_v33 = vrot.slane %v2627_v14, %v6195_v27  ;;  %v2070_v46 = vadd.f32 %v7184_v17, %v8412_v22  ;;  %v8414_v14 = vld [vmem:[#allocation74_spill] sm:$0xff] }
 0x2cc   : > { %v3655_v60 = vrot.slane %v3647_v37, %v6195_v27  ;;  %v2608_v45 = vcombine.high %v2600_v19, %v2600_v19  ;;  %v2609_v32 = vcombine.high %v2607_v58, %v2607_v58  ;;  %v2634_v48 = vrot.slane %v2067_v10, %v6195_v27 }
 0x2cd   : > { %v2658_v16 = vrot.slane %v2644_v23, %v6195_v27  ;;  %v3629_v50 = vcombine.low %v3621_v12, %v3628_v18  ;;  %v3612_v24 = vcombine.low %v3604_v41, %v3611_v35  ;;  %v2069_v59 = vadd.f32 %v7174_v5, %v8413_v38 }
 0x2ce   : > { %v3662_v6 = vrot.slane %v3648_v8, %v6195_v27  ;;  %v3645_v36 = vrot.slane %v3631_v61, %v6195_v27  ;;  %v2071_v22 = vadd.f32 %v2007_v9, %v8414_v14  ;;  %v7206_v17 = vadd.f32 %v2007_v9, %v6851_v52 }
 0x2cf   : > { %v2643_v37 = vcombine.high %v2641_v33, %v2641_v33  ;;  %v2678_v44 = vcombine.high %v2070_v46, %v2070_v46  ;;  %4408 = vperm.xlu0 %5157, %v3629_v50   ;;  %4405 = vperm.xlu1 %5158, %v3612_v24   ;;  %v2661_v10 = vcombine.high %v2069_v59, %v2069_v59 }
 0x2d0   : > { %8415 = vst [vmem:[#allocation23_spill] sm:$0xff] %v7206_v17  ;;  %v2642_v23 = vcombine.high %v2634_v48, %v2634_v48  ;;  %v2668_v41 = vrot.slane %v2069_v59, %v6195_v27  ;;  %v3663_v18 = vcombine.low %v3655_v60, %v3662_v6  ;;  %v2695_v35 = vcombine.high %v2071_v22, %v2071_v22 }
 0x2d1   : > { %v2625_v12 = vcombine.high %v2617_v34, %v2617_v34  ;;  %v2626_v38 = vcombine.high %v2624_v11, %v2624_v11  ;;  %v2675_v8 = vrot.slane %v2661_v10, %v6195_v27  ;;  %v3646_v61 = vcombine.low %v3638_v56, %v3645_v36 }
 0x2d2   : > { %v3665_v5 = vcombine.low %v2590_v7, %v2592_v57  ;;  %v3681_v14 = vcombine.low %v2600_v19, %v2608_v45  ;;  %v2651_v52 = vrot.slane %v2068_v43, %v6195_v27  ;;  %v2709_v9 = vrot.slane %v2695_v35, %v6195_v27 }
 0x2d3   : > { %v3682_v17 = vcombine.low %v2607_v58, %v2609_v32  ;;  %v3716_v50 = vcombine.low %v2641_v33, %v2643_v37  ;;  %v2677_v24 = vcombine.high %v2675_v8, %v2675_v8  ;;  %4414 = vperm.xlu0 %5157, %v3663_v18   ;;  %4411 = vperm.xlu1 %5158, %v3646_v61   ;;  %v8417_v61 = vld [vmem:[#allocation93_spill] sm:$0xff] }
 0x2d4   : > { %v2660_v29 = vcombine.high %v2658_v16, %v2658_v16  ;;  %v3715_v59 = vcombine.low %v2634_v48, %v2642_v23  ;;  %v2692_v60 = vrot.slane %v2678_v44, %v6195_v27  ;;  %v2676_v6 = vcombine.high %v2668_v41, %v2668_v41 }
 0x2d5   : > { %v3672_v10 = vrot.slane %v7190_v30, %v6195_v27  ;;  %v3698_v56 = vcombine.low %v2617_v34, %v2625_v12  ;;  %v3699_v7 = vcombine.low %v2624_v11, %v2626_v38  ;;  %v2702_v19 = vrot.slane %v2071_v22, %v6195_v27 }
 0x2d6   : > { %v3689_v43 = vrot.slane %v3681_v14, %v6195_v27  ;;  %v2659_v57 = vcombine.high %v2651_v52, %v2651_v52  ;;  %v2685_v58 = vrot.slane %v2070_v46, %v6195_v27  ;;  %v2711_v33 = vcombine.high %v2709_v9, %v2709_v9 }
 0x2d7   : > { %v3750_v45 = vcombine.low %v2675_v8, %v2677_v24  ;;  %v3696_v32 = vrot.slane %v3682_v17, %v6195_v27  ;;  %v3679_v48 = vrot.slane %v3665_v5, %v6195_v27  ;;  %v3730_v44 = vrot.slane %v3716_v50, %v6195_v27 }
 0x2d8   : > { %v3733_v36 = vcombine.low %v2658_v16, %v2660_v29  ;;  %v3723_v30 = vrot.slane %v3715_v59, %v6195_v27  ;;  %v2694_v34 = vcombine.high %v2692_v60, %v2692_v60  ;;  %v3749_v11 = vcombine.low %v2668_v41, %v2676_v6 }
 0x2d9   : > { %v2710_v37 = vcombine.high %v2702_v19, %v2702_v19  ;;  %v3697_v22 = vcombine.low %v3689_v43, %v3696_v32  ;;  %v3680_v23 = vcombine.low %v3672_v10, %v3679_v48  ;;  %v3713_v18 = vrot.slane %v3699_v7, %v6195_v27 }
 0x2da   : > { %v3059_v46 = vrot.slane %v7145_v13, %v6195_v27  ;;  %v3706_v35 = vrot.slane %v3698_v56, %v6195_v27  ;;  %v3732_v17 = vcombine.low %v2651_v52, %v2659_v57  ;;  %v2693_v12 = vcombine.high %v2685_v58, %v2685_v58 }
 0x2db   : > { %v3784_v5 = vcombine.low %v2709_v9, %v2711_v33  ;;  %4420 = vperm.xlu0 %5157, %v3697_v22   ;;  %4417 = vperm.xlu1 %5158, %v3680_v23   ;;  %v3731_v29 = vcombine.low %v3723_v30, %v3730_v44  ;;  %v3764_v16 = vrot.slane %v3750_v45, %v6195_v27 }
 0x2dc   : > { %v8416_v41 = vcombine.high %v7129_v4, %v7129_v4  ;;  %v3035_v8 = vcombine.high %v7180_v3, %v7180_v3  ;;  %v2094_v14 = vadd.f32 %v7074_v39, %v8417_v61  ;;  %v3767_v50 = vcombine.low %v2692_v60, %v2694_v34  ;;  %v8423_v61 = vld [vmem:[#allocation114_spill] sm:$0xff] }
 0x2dd   : > { %v3757_v52 = vrot.slane %v3749_v11, %v6195_v27  ;;  %v3783_v9 = vcombine.low %v2702_v19, %v2710_v37  ;;  %v3714_v24 = vcombine.low %v3706_v35, %v3713_v18  ;;  %v3747_v59 = vrot.slane %v3733_v36, %v6195_v27 }
 0x2de   : > { %v3015_v38 = vrot.slane %v8416_v41, %v6195_v27  ;;  %v3016_v6 = vcombine.high %v7152_v26, %v7152_v26  ;;  %v8418_v4 = vcombine.high %v7145_v13, %v7145_v13  ;;  %v3042_v56 = vrot.slane %v7180_v3, %v6195_v27  ;;  %v8422_v41 = vld [vmem:[#allocation110_spill] sm:$0xff] }
 0x2df   : > { %v3740_v39 = vrot.slane %v3732_v17, %v6195_v27  ;;  %v3766_v60 = vcombine.low %v2685_v58, %v2693_v12  ;;  %4426 = vperm.xlu0 %5157, %v3731_v29   ;;  %4423 = vperm.xlu1 %5158, %v3714_v24   ;;  %v3765_v7 = vcombine.low %v3757_v52, %v3764_v16 }
 0x2e0   : > { %v3066_v10 = vrot.slane %v8418_v4, %v6195_v27  ;;  %v3798_v19 = vrot.slane %v3784_v5, %v6195_v27  ;;  %v8419_v43 = vcombine.high %v7104_v28, %v7104_v28  ;;  %v3067_v33 = vcombine.high %v3059_v46, %v3059_v46  ;;  %v8421_v5 = vld [vmem:[#allocation43_spill] sm:$0xff] }
 0x2e1   : > { %v3049_v13 = vrot.slane %v3035_v8, %v6195_v27  ;;  %v3086_v45 = vcombine.high %v2094_v14, %v2094_v14  ;;  %v3017_v32 = vcombine.high %v3015_v38, %v3015_v38  ;;  %v3791_v3 = vrot.slane %v3783_v9, %v6195_v27 }
 0x2e2   : > { %v7251_v57 = vcombine.low %v7104_v28, %v8419_v43  ;;  %v3748_v48 = vcombine.low %v3740_v39, %v3747_v59  ;;  %v3781_v58 = vrot.slane %v3767_v50, %v6195_v27  ;;  %v8420_v44 = vcombine.high %v7114_v49, %v7114_v49 }
 0x2e3   : > { %v7263_v30 = vcombine.low %v7152_v26, %v3016_v6  ;;  %v3068_v28 = vcombine.high %v3066_v10, %v3066_v10  ;;  %v3093_v34 = vrot.slane %v2094_v14, %v6195_v27  ;;  %v3050_v11 = vcombine.high %v3042_v56, %v3042_v56  ;;  %4432 = vperm.xlu0 %5157, %v3765_v7  }
 0x2e4   : > { %v7260_v36 = vcombine.low %v7114_v49, %v8420_v44  ;;  %v3774_v37 = vrot.slane %v3766_v60, %v6195_v27  ;;  %4429 = vperm.xlu1 %5158, %v3748_v48   ;;  %v3799_v22 = vcombine.low %v3791_v3, %v3798_v19  ;;  %v4114_v23 = vrot.slane %v7251_v57, %v6195_v27 }
 0x2e5   : > { %v7269_v18 = vcombine.low %v3059_v46, %v3067_v33  ;;  %v3051_v35 = vcombine.high %v3049_v13, %v3049_v13  ;;  %v3100_v49 = vrot.slane %v3086_v45, %v6195_v27  ;;  %v7272_v17 = vcombine.low %v3015_v38, %v3017_v32  ;;  %v4346_v45 = vpop.permute.xlu0 %4345 }
 0x2e6   : > { %v3782_v26 = vcombine.low %v3774_v37, %v3781_v58  ;;  %v3832_v12 = vrot.slane %v6893_v2, %v6195_v27  ;;  %v3815_v29 = vrot.slane %v8421_v5, %v6195_v27  ;;  %v3101_v16 = vcombine.high %v3093_v34, %v3093_v34 }
 0x2e7   : > { %v2093_v8 = vadd.f32 %v7068_v31, %v8422_v41  ;;  %v2096_v46 = vadd.f32 %v7106_v53, %v8423_v61  ;;  %v8424_v14 = vlaneseq  ;;  %v4097_v38 = vrot.slane %v7263_v30, %v6195_v27  ;;  %4438 = vperm.xlu0 %5157, %v3799_v22   ;;  %v8456_v30 = vld [vmem:[#allocation118_spill] sm:$0xff] }
 0x2e8   : > { %v7287_v52 = vcombine.low %v3066_v10, %v3068_v28  ;;  %v7289_v9 = vcombine.low %v3042_v56, %v3050_v11  ;;  %4435 = vperm.xlu1 %5158, %v3782_v26   ;;  %v4148_v2 = vrot.slane %v7269_v18, %v6195_v27  ;;  %v7293_v24 = vcombine.low %v3049_v13, %v3051_v35 }
 0x2e9   : > { %v7283_v50 = vand.u32 127, %v8424_v14  ;;  %v3102_v31 = vcombine.high %v3100_v49, %v3100_v49  ;;  %v8425_v59 = vrot.slane %v6886_v62, %v6195_v27  ;;  %v8426_v4 = vrot.slane %v6847_v55, %v6195_v27  ;;  %v8427_v55 = vld [vmem:[#allocation16_spill] sm:$0xff] }
 0x2ea   : > { %v3866_v56 = vrot.slane %v6931_v47, %v6195_v27  ;;  %v3849_v39 = vrot.slane %v6878_v40, %v6195_v27  ;;  %v7306_v60 = vcombine.low %v3093_v34, %v3101_v16  ;;  %v3069_v7 = vcombine.high %v2093_v8, %v2093_v8 }
 0x2eb   : > { %v4542_v53 = vadd.s32 4294967288, %v7283_v50  ;;  %v3833_v6 = vcombine.low %v8425_v59, %v3832_v12  ;;  %v3816_v10 = vcombine.low %v8426_v4, %v3815_v29  ;;  %v3076_v19 = vrot.slane %v2093_v8, %v6195_v27 }
 0x2ec   : > { %v3120_v43 = vcombine.high %v2096_v46, %v2096_v46  ;;  %v4131_v62 = vrot.slane %v7289_v9, %v6195_v27  ;;  %v3127_v33 = vrot.slane %v2096_v46, %v6195_v27  ;;  %v7314_v13 = vsub.s32 %v7283_v50, %v8427_v55  ;;  %v4349_v32 = vpop.permute.xlu1 %4348 }
 0x2ed   : > { %4444 = vperm.xlu0 %5157, %v3833_v6   ;;  %4441 = vperm.xlu1 %5158, %v3816_v10   ;;  %v7316_v47 = vcombine.low %v3100_v49, %v3102_v31  ;;  %v3900_v40 = vrot.slane %v6962_v20, %v6195_v27  ;;  %v4549_v3 = vadd.s32 4294967280, %v7283_v50  ;;  %v4556_v48 = vadd.s32 4294967272, %v7283_v50 }
 0x2ee   : > { %v8428_v58 = vrot.slane %v6916_v0, %v6195_v27  ;;  %v8429_v28 = vrot.slane %v6865_v1, %v6195_v27  ;;  %v3883_v11 = vrot.slane %v6911_v51, %v6195_v27  ;;  %v7331_v37 = vsub.s32 %v4542_v53, %v8427_v55 }
 0x2ef   : > { %v3083_v20 = vrot.slane %v3069_v7, %v6195_v27  ;;  %v3084_v22 = vcombine.high %v3076_v19, %v3076_v19  ;;  %v3134_v35 = vrot.slane %v3120_v43, %v6195_v27  ;;  %v3135_v49 = vcombine.high %v3127_v33, %v3127_v33 }
 0x2f0   : > { %v3867_v44 = vcombine.low %v8428_v58, %v3866_v56  ;;  %v3850_v34 = vcombine.low %v8429_v28, %v3849_v39  ;;  %v4541_v0 = vrot.slane %v4346_v45, %v7314_v13  ;;  %v4546_v1 = vrot.slane %v4349_v32, %v7331_v37  ;;  %v8435_v56 = vld [vmem:[#allocation76_spill] sm:$0xff] }
 0x2f1   : > { %v4182_v26 = vrot.slane %v7306_v60, %v6195_v27  ;;  %v8430_v51 = vrot.slane %v6947_v54, %v6195_v27  ;;  %v3934_v5 = vrot.slane %v6986_v42, %v6195_v27  ;;  %v7345_v29 = vsub.s32 %v4556_v48, %v8427_v55  ;;  %v8432_v42 = vld [vmem:[#allocation112_spill] sm:$0xff] }
 0x2f2   : > { %4450 = vperm.xlu0 %5157, %v3867_v44   ;;  %4447 = vperm.xlu1 %5158, %v3850_v34   ;;  %v8431_v16 = vrot.slane %v6898_v15, %v6195_v27  ;;  %v3917_v8 = vrot.slane %v6942_v21, %v6195_v27  ;;  %v4548_v61 = vsel %vm4547_vm0, %v4546_v1, %v4541_v0  ;;  %v8433_v15 = vld [vmem:[#allocation115_spill] sm:$0xff]  ;;  %v8434_v21 = vld [vmem:[#allocation144_spill] sm:$0xff]  ;;  %v4570_v48 = vadd.s32 4294967256, %v7283_v50 }
 0x2f3   : > { %v3901_v12 = vcombine.low %v8430_v51, %v3900_v40  ;;  %v7354_v46 = vsub.s32 %v4549_v3, %v8427_v55  ;;  %v3085_v54 = vcombine.high %v3083_v20, %v3083_v20  ;;  %v7356_v14 = vcombine.low %v3076_v19, %v3084_v22  ;;  %v8437_v19 = vld [vmem:[#allocation119_spill] sm:$0xff]  ;;  %v8440_v22 = vld [vmem:[#allocation113_spill] sm:$0xff] }
 0x2f4   : > { %v3884_v41 = vcombine.low %v8431_v16, %v3883_v11  ;;  %v3136_v31 = vcombine.high %v3134_v35, %v3134_v35  ;;  %v2095_v53 = vadd.f32 %v7089_v25, %v8432_v42  ;;  %v7360_v6 = vcombine.low %v3127_v33, %v3135_v49  ;;  %v8438_v40 = vld [vmem:[#allocation75_spill] sm:$0xff]  ;;  %v8444_v16 = vld [vmem:[#allocation21_spill] sm:$0xff] }
 0x2f5   : > { %v2098_v4 = vadd.f32 %v7135_v63, %v8433_v15  ;;  %v3968_v10 = vrot.slane %v8434_v21, %v6195_v27  ;;  %v8436_v39 = vrot.slane %v8435_v56, %v6195_v27  ;;  %v3951_v43 = vrot.slane %v8437_v19, %v6195_v27  ;;  %v8441_v49 = vld [vmem:[#allocation123_spill] sm:$0xff]  ;;  %v8448_v19 = vld [vmem:[#allocation72_spill] sm:$0xff] }
 0x2f6   : > { %v4355_v59 = vpop.permute.xlu0 %4354  ;;  %4456 = vperm.xlu0 %5157, %v3901_v12   ;;  %4453 = vperm.xlu1 %5158, %v3884_v41   ;;  %v8439_v63 = vrot.slane %v8438_v40, %v6195_v27  ;;  %v4563_v3 = vadd.s32 4294967264, %v7283_v50  ;;  %v7378_v58 = vcombine.low %v3083_v20, %v3085_v54  ;;  %v4165_v44 = vrot.slane %v7356_v14, %v6195_v27  ;;  %v8442_v12 = vld [vmem:[#allocation78_spill] sm:$0xff]  ;;  %v8445_v54 = vld [vmem:[#allocation145_spill] sm:$0xff] }
 0x2f7   : > { %v3935_v7 = vcombine.low %v8436_v39, %v3934_v5  ;;  %v4560_v33 = vrot.slane %v4355_v59, %v7345_v29  ;;  %v3103_v28 = vcombine.high %v2095_v53, %v2095_v53  ;;  %v3110_v34 = vrot.slane %v2095_v53, %v6195_v27  ;;  %v8447_v59 = vld [vmem:[#allocation77_spill] sm:$0xff] }
 0x2f8   : > { %v4352_v25 = vpop.permute.xlu1 %4351  ;;  %v3918_v45 = vcombine.low %v8439_v63, %v3917_v8  ;;  %v3154_v11 = vcombine.high %v2098_v4, %v2098_v4  ;;  %v2097_v0 = vadd.f32 %v8441_v49, %v8440_v22  ;;  %v7386_v51 = vcombine.low %v3134_v35, %v3136_v31 }
 0x2f9   : > { %v4553_v32 = vrot.slane %v4352_v25, %v7354_v46  ;;  %v8443_v20 = vrot.slane %v8442_v12, %v6195_v27  ;;  %v4087_v41 = vrot.slane %v8444_v16, %v6195_v27  ;;  %v8446_v42 = vrot.slane %v8445_v54, %v6195_v27 }
 0x2fa   : > { %4462 = vperm.xlu0 %5157, %v3935_v7   ;;  %4459 = vperm.xlu1 %5158, %v3918_v45   ;;  %v3985_v15 = vrot.slane %v8447_v59, %v6195_v27  ;;  %v7403_v35 = vsub.s32 %v4570_v48, %v8427_v55  ;;  %v4216_v31 = vrot.slane %v7360_v6, %v6195_v27  ;;  %v8452_v48 = vld [vmem:[#allocation121_spill] sm:$0xff]  ;;  %v4577_v59 = vadd.s32 4294967248, %v7283_v50 }
 0x2fb   : > { %v4555_v1 = vsel %vm4554_vm1, %v4553_v32, %v4548_v61  ;;  %v3969_v5 = vcombine.low %v8443_v20, %v3968_v10  ;;  %v3952_v53 = vcombine.low %v8446_v42, %v3951_v43  ;;  %v7400_v61 = vsub.s32 %v4563_v3, %v8427_v55  ;;  %v8449_v43 = vld [vmem:[#allocation84_spill] sm:$0xff] }
 0x2fc   : > { %v4562_v8 = vsel %vm4561_vm2, %v4560_v33, %v4555_v1  ;;  %v3117_v21 = vrot.slane %v3103_v28, %v6195_v27  ;;  %v3118_v10 = vcombine.high %v3110_v34, %v3110_v34  ;;  %v3161_v56 = vrot.slane %v2098_v4, %v6195_v27  ;;  %v8450_v33 = vld [vmem:[#allocation51_spill] sm:$0xff] }
 0x2fd   : > { %v3168_v39 = vrot.slane %v3154_v11, %v6195_v27  ;;  %v3137_v7 = vcombine.high %v2097_v0, %v2097_v0  ;;  %v2099_v25 = vadd.f32 %v8449_v43, %v8448_v19  ;;  %v8451_v40 = vrot.slane %v8450_v33, %v6195_v27 }
 0x2fe   : > { %4468 = vperm.xlu0 %5157, %v3969_v5   ;;  %4465 = vperm.xlu1 %5158, %v3952_v53   ;;  %v4121_v45 = vrot.slane %v7260_v36, %v6195_v27  ;;  %v4104_v32 = vrot.slane %v7272_v17, %v6195_v27  ;;  %v8453_v28 = vrot.slane %v8452_v48, %v6195_v27  ;;  %v8454_v36 = vld [vmem:[#allocation71_spill] sm:$0xff]  ;;  %v8455_v5 = vld [vmem:[#allocation18_spill] sm:$0xff]  ;;  %v4591_v14 = vadd.s32 4294967232, %v7283_v50 }
 0x2ff   : > { %v4088_v63 = vcombine.low %v8451_v40, %v4087_v41  ;;  %v3119_v1 = vcombine.high %v3117_v21, %v3117_v21  ;;  %v3169_v12 = vcombine.high %v3161_v56, %v3161_v56  ;;  %v3144_v20 = vrot.slane %v2097_v0, %v6195_v27 }
 0x300   : > { %v4358_v4 = vpop.permute.xlu1 %4357  ;;  %v4361_v3 = vpop.permute.xlu0 %4360  ;;  %v3986_v11 = vcombine.low %v8453_v28, %v3985_v15  ;;  %v2100_v16 = vadd.f32 %v8455_v5, %v8454_v36  ;;  %v3151_v17 = vrot.slane %v3137_v7, %v6195_v27  ;;  %v3171_v41 = vcombine.high %v2099_v25, %v2099_v25  ;;  %v8458_v28 = vld [vmem:[#allocation73_spill] sm:$0xff] }
 0x301   : > { %v4567_v22 = vrot.slane %v4358_v4, %v7400_v61  ;;  %v4574_v49 = vrot.slane %v4361_v3, %v7403_v35  ;;  %v3170_v42 = vcombine.high %v3168_v39, %v3168_v39  ;;  %v4584_v15 = vadd.s32 4294967240, %v7283_v50 }
 0x302   : > { %4489 = vperm.xlu0 %5157, %v4088_v63   ;;  %4471 = vperm.xlu1 %5158, %v3986_v11   ;;  %v4122_v0 = vcombine.low %v4114_v23, %v4121_v45  ;;  %v4105_v7 = vcombine.low %v4097_v38, %v4104_v32  ;;  %v4155_v19 = vrot.slane %v7287_v52, %v6195_v27  ;;  %v8457_v38 = vld [vmem:[#allocation129_spill] sm:$0xff] }
 0x303   : > { %v4569_v54 = vsel %vm4568_vm3, %v4567_v22, %v4562_v8  ;;  %v4138_v8 = vrot.slane %v7293_v24, %v6195_v27  ;;  %v4191_v43 = vcombine.low %v3110_v34, %v3118_v10  ;;  %v4192_v33 = vcombine.low %v3117_v21, %v3119_v1  ;;  %v8459_v11 = vld [vmem:[#allocation85_spill] sm:$0xff] }
 0x304   : > { %v4576_v53 = vsel %vm4575_vm4, %v4574_v49, %v4569_v54  ;;  %v7442_v40 = vcombine.low %v3161_v56, %v3169_v12  ;;  %v3188_v63 = vcombine.high %v2100_v16, %v2100_v16  ;;  %v3152_v4 = vcombine.high %v3144_v20, %v3144_v20 }
 0x305   : > { %v3153_v3 = vcombine.high %v3151_v17, %v3151_v17  ;;  %v3185_v57 = vrot.slane %v3171_v41, %v6195_v27  ;;  %v4243_v23 = vcombine.low %v3168_v39, %v3170_v42  ;;  %v2101_v45 = vadd.f32 %v8457_v38, %v8456_v30 }
 0x306   : > { %4495 = vperm.xlu0 %5157, %v4122_v0   ;;  %4492 = vperm.xlu1 %5158, %v4105_v7   ;;  %v7448_v52 = vsub.s32 %v4577_v59, %v8427_v55  ;;  %v7451_v24 = vsub.s32 %v4584_v15, %v8427_v55  ;;  %v4156_v34 = vcombine.low %v4148_v2, %v4155_v19  ;;  %v4598_v41 = vadd.s32 4294967224, %v7283_v50 }
 0x307   : > { %v4139_v21 = vcombine.low %v4131_v62, %v4138_v8  ;;  %v4189_v10 = vrot.slane %v7316_v47, %v6195_v27  ;;  %v4172_v56 = vrot.slane %v7378_v58, %v6195_v27  ;;  %v3195_v39 = vrot.slane %v2100_v16, %v6195_v27 }
 0x308   : > { %v3202_v32 = vrot.slane %v3188_v63, %v6195_v27  ;;  %v3178_v48 = vrot.slane %v2099_v25, %v6195_v27  ;;  %v2102_v18 = vadd.f32 %v8459_v11, %v8458_v28  ;;  %v4225_v2 = vcombine.low %v3144_v20, %v3152_v4  ;;  %v8460_v63 = vld [vmem:[#allocation23_spill] sm:$0xff] }
 0x309   : > { %v4226_v22 = vcombine.low %v3151_v17, %v3153_v3  ;;  %v3187_v49 = vcombine.high %v3185_v57, %v3185_v57  ;;  %v3205_v47 = vcombine.high %v2101_v45, %v2101_v45  ;;  %v4190_v25 = vcombine.low %v4182_v26, %v4189_v10 }
 0x30a   : > { %4501 = vperm.xlu0 %5157, %v4156_v34   ;;  %4498 = vperm.xlu1 %5158, %v4139_v21   ;;  %v4364_v9 = vpop.permute.xlu1 %4363  ;;  %v4367_v62 = vpop.permute.xlu0 %4366  ;;  %v4173_v12 = vcombine.low %v4165_v44, %v4172_v56  ;;  %v4223_v20 = vrot.slane %v7386_v51, %v6195_v27  ;;  %v4206_v36 = vrot.slane %v4192_v33, %v6195_v27 }
 0x30b   : > { %v4581_v58 = vrot.slane %v4364_v9, %v7448_v52  ;;  %v4588_v1 = vrot.slane %v4367_v62, %v7451_v24  ;;  %v3186_v5 = vcombine.high %v3178_v48, %v3178_v48  ;;  %v3222_v16 = vcombine.high %v2102_v18, %v2102_v18  ;;  %v8462_v62 = vld [vmem:[#allocation120_spill] sm:$0xff] }
 0x30c   : > { %v4199_v54 = vrot.slane %v4191_v43, %v6195_v27  ;;  %v4250_v60 = vrot.slane %v7442_v40, %v6195_v27  ;;  %v3203_v44 = vcombine.high %v3195_v39, %v3195_v39  ;;  %v3204_v51 = vcombine.high %v3202_v32, %v3202_v32 }
 0x30d   : > { %v4583_v17 = vsel %vm4582_vm5, %v4581_v58, %v4576_v53  ;;  %v4260_v42 = vcombine.low %v3185_v57, %v3187_v49  ;;  %v3219_v59 = vrot.slane %v3205_v47, %v6195_v27  ;;  %v4224_v53 = vcombine.low %v4216_v31, %v4223_v20 }
 0x30e   : > { %4507 = vperm.xlu0 %5157, %v4190_v25   ;;  %4504 = vperm.xlu1 %5158, %v4173_v12   ;;  %v4590_v26 = vsel %vm4589_vm6, %v4588_v1, %v4583_v17  ;;  %v4207_v15 = vcombine.low %v4199_v54, %v4206_v36  ;;  %v4257_v0 = vrot.slane %v4243_v23, %v6195_v27  ;;  %v4605_v49 = vadd.s32 4294967216, %v7283_v50  ;;  %v8464_v25 = vld [vmem:[#allocation79_spill] sm:$0xff]  ;;  %v8465_v36 = vld [vmem:[#allocation82_spill] sm:$0xff] }
 0x30f   : > { %v4240_v7 = vrot.slane %v4226_v22, %v6195_v27  ;;  %v4233_v19 = vrot.slane %v4225_v2, %v6195_v27  ;;  %v4259_v8 = vcombine.low %v3178_v48, %v3186_v5  ;;  %v3236_v43 = vrot.slane %v3222_v16, %v6195_v27  ;;  %v8466_v16 = vld [vmem:[#allocation52_spill] sm:$0xff] }
 0x310   : > { %v7495_v33 = vsub.s32 %v4598_v41, %v8427_v55  ;;  %v3212_v40 = vrot.slane %v2101_v45, %v6195_v27  ;;  %v3239_v4 = vcombine.high %v8460_v63, %v8460_v63  ;;  %v7501_v6 = vsub.s32 %v4591_v14, %v8427_v55  ;;  %v8461_v45 = vld [vmem:[#allocation124_spill] sm:$0xff] }
 0x311   : > { %v4276_v3 = vcombine.low %v3195_v39, %v3203_v44  ;;  %v4277_v57 = vcombine.low %v3202_v32, %v3204_v51  ;;  %v3221_v23 = vcombine.high %v3219_v59, %v3219_v59  ;;  %v4274_v30 = vrot.slane %v4260_v42, %v6195_v27 }
 0x312   : > { %4513 = vperm.xlu0 %5157, %v4224_v53   ;;  %4510 = vperm.xlu1 %5158, %v4207_v15   ;;  %v4373_v31 = vpop.permute.xlu0 %4372  ;;  %v3229_v38 = vrot.slane %v2102_v18, %v6195_v27  ;;  %v4258_v34 = vcombine.low %v4250_v60, %v4257_v0  ;;  %v4241_v21 = vcombine.low %v4233_v19, %v4240_v7  ;;  %v4612_v9 = vadd.s32 4294967208, %v7283_v50  ;;  %v8467_v15 = vld [vmem:[#allocation122_spill] sm:$0xff] }
 0x313   : > { %v4002_v10 = vrot.slane %v8461_v45, %v6195_v27  ;;  %v4267_v56 = vrot.slane %v4259_v8, %v6195_v27  ;;  %v3238_v48 = vcombine.high %v3236_v43, %v3236_v43  ;;  %v4602_v11 = vrot.slane %v4373_v31, %v7495_v33  ;;  %v8469_v8 = vld [vmem:[#allocation83_spill] sm:$0xff] }
 0x314   : > { %v3220_v2 = vcombine.high %v3212_v40, %v3212_v40  ;;  %v3253_v39 = vrot.slane %v3239_v4, %v6195_v27  ;;  %v4294_v18 = vcombine.low %v3219_v59, %v3221_v23  ;;  %v8463_v47 = vrot.slane %v8462_v62, %v6195_v27  ;;  %v8471_v4 = vld [vmem:[#allocation19_spill] sm:$0xff] }
 0x315   : > { %v4370_v28 = vpop.permute.xlu1 %4369  ;;  %v4275_v22 = vcombine.low %v4267_v56, %v4274_v30  ;;  %v4291_v1 = vrot.slane %v4277_v57, %v6195_v27  ;;  %v4019_v12 = vrot.slane %v8464_v25, %v6195_v27  ;;  %v2974_v5 = vrot.slane %v8465_v36, %v6195_v27 }
 0x316   : > { %4519 = vperm.xlu0 %5157, %v4258_v34   ;;  %4516 = vperm.xlu1 %5158, %v4241_v21   ;;  %v4595_v32 = vrot.slane %v4370_v28, %v7501_v6  ;;  %v4003_v58 = vcombine.low %v8463_v47, %v4002_v10  ;;  %v2983_v17 = vcombine.high %v8466_v16, %v8466_v16 }
 0x317   : > { %v4284_v41 = vrot.slane %v4276_v3, %v6195_v27  ;;  %v3237_v60 = vcombine.high %v3229_v38, %v3229_v38  ;;  %v4293_v14 = vcombine.low %v3212_v40, %v3220_v2  ;;  %v3246_v44 = vrot.slane %v8460_v63, %v6195_v27  ;;  %v8470_v63 = vld [vmem:[#allocation80_spill] sm:$0xff] }
 0x318   : > { %v4597_v20 = vsel %vm4596_vm7, %v4595_v32, %v4590_v26  ;;  %v4311_v51 = vcombine.low %v3236_v43, %v3238_v48  ;;  %v3255_v42 = vcombine.high %v3253_v39, %v3253_v39  ;;  %v7529_v26 = vsub.s32 %v4605_v49, %v8427_v55 }
 0x319   : > { %v4604_v54 = vsel %vm4603_vm8, %v4602_v11, %v4597_v20  ;;  %v7532_v59 = vsub.s32 %v4612_v9, %v8427_v55  ;;  %v4292_v53 = vcombine.low %v4284_v41, %v4291_v1  ;;  %v8468_v0 = vrot.slane %v8467_v15, %v6195_v27 }
 0x31a   : > { %4522 = vperm.xlu0 %5157, %v4275_v22   ;;  %4474 = vperm.xlu1 %5158, %v4003_v58   ;;  %v4308_v19 = vrot.slane %v4294_v18, %v6195_v27  ;;  %v4036_v40 = vrot.slane %v8469_v8, %v6195_v27  ;;  %v4046_v43 = vrot.slane %v8470_v63, %v6195_v27  ;;  %v4619_v49 = vadd.s32 4294967200, %v7283_v50 }
 0x31b   : > { %v4020_v7 = vcombine.low %v8468_v0, %v4019_v12  ;;  %v4029_v31 = vrot.slane %v8471_v4, %v6195_v27  ;;  %v2982_v3 = vcombine.high %v2974_v5, %v2974_v5  ;;  %v4056_v57 = vcombine.low %v8466_v16, %v2983_v17 }
 0x31c   : > { %v4310_v23 = vcombine.low %v3229_v38, %v3237_v60  ;;  %v4301_v30 = vrot.slane %v4293_v14, %v6195_v27  ;;  %v3254_v34 = vcombine.high %v3246_v44, %v3246_v44  ;;  %v4328_v10 = vcombine.low %v3253_v39, %v3255_v42  ;;  %v8472_v38 = vld [vmem:[#allocation81_spill] sm:$0xff] }
 0x31d   : > { %v4379_v45 = vpop.permute.xlu0 %4378  ;;  %v4037_v11 = vcombine.low %v4029_v31, %v4036_v40  ;;  %v4325_v2 = vrot.slane %v4311_v51, %v6195_v27  ;;  %v4053_v32 = vrot.slane %v8472_v38, %v6195_v27  ;;  %v4055_v18 = vcombine.low %v2974_v5, %v2982_v3 }
 0x31e   : > { %4525 = vperm.xlu0 %5157, %v4292_v53   ;;  %4477 = vperm.xlu1 %5158, %v4020_v7   ;;  %v4376_v21 = vpop.permute.xlu1 %4375  ;;  %v4616_v48 = vrot.slane %v4379_v45, %v7532_v59  ;;  %v4309_v28 = vcombine.low %v4301_v30, %v4308_v19  ;;  %v4626_v9 = vadd.s32 4294967192, %v7283_v50  ;;  %v4318_v39 = vrot.slane %v4310_v23, %v6195_v27 }
 0x31f   : > { %v4609_v56 = vrot.slane %v4376_v21, %v7529_v26  ;;  %v4327_v62 = vcombine.low %v3246_v44, %v3254_v34  ;;  %v4054_v1 = vcombine.low %v4046_v43, %v4053_v32  ;;  %v4342_v25 = vrot.slane %v4328_v10, %v6195_v27 }
 0x320   : > { %v4326_v58 = vcombine.low %v4318_v39, %v4325_v2  ;;  %v4070_v12 = vrot.slane %v4056_v57, %v6195_v27  ;;  %v7559_v20 = vsub.s32 %v4619_v49, %v8427_v55  ;;  %v7562_v36 = vsub.s32 %v4626_v9, %v8427_v55 }
 0x321   : > { %v4611_v22 = vsel %vm4610_vm9, %v4609_v56, %v4604_v54  ;;  %v4063_v5 = vrot.slane %v4055_v18, %v6195_v27  ;;  %v4335_v16 = vrot.slane %v4327_v62, %v6195_v27  ;;  %v4633_v42 = vadd.s32 4294967184, %v7283_v50 }
 0x322   : > { %4528 = vperm.xlu0 %5157, %v4309_v28   ;;  %4480 = vperm.xlu1 %5158, %v4037_v11   ;;  %v4618_v47 = vsel %vm4617_vm10, %v4616_v48, %v4611_v22  ;;  %v4640_v27 = vadd.s32 4294967176, %v7283_v50 }
 0x323   : > { %v4343_v17 = vcombine.low %v4335_v16, %v4342_v25  ;;  %v4071_v41 = vcombine.low %v4063_v5, %v4070_v12  ;;  %v7573_v15 = vsub.s32 %v4633_v42, %v8427_v55 }
 0x324   : > { %v7576_v0 = vsub.s32 %v4640_v27, %v8427_v55 }
 0x326   : > { %4531 = vperm.xlu0 %5157, %v4326_v58   ;;  %4483 = vperm.xlu1 %5158, %v4054_v1  }
 0x327   : > { %v4382_v54 = vpop.permute.xlu1 %4381  ;;  %v4385_v60 = vpop.permute.xlu0 %4384 }
 0x328   : > { %v4623_v14 = vrot.slane %v4382_v54, %v7559_v20  ;;  %v4630_v44 = vrot.slane %v4385_v60, %v7562_v36 }
 0x32a   : > { %4534 = vperm.xlu0 %5157, %v4343_v17   ;;  %4486 = vperm.xlu1 %5158, %v4071_v41   ;;  %v4625_v51 = vsel %vm4624_vm11, %v4623_v14, %v4618_v47 }
 0x32b   : > { %v4632_v53 = vsel %vm4631_vm12, %v4630_v44, %v4625_v51 }
 0x330   : > { %v4391_v19 = vpop.permute.xlu0 %4390 }
 0x331   : > { %v4388_v7 = vpop.permute.xlu1 %4387  ;;  %v4644_v40 = vrot.slane %v4391_v19, %v7576_v0 }
 0x332   : > { %v4637_v8 = vrot.slane %v4388_v7, %v7573_v15 }
 0x334   : > { %v4639_v63 = vsel %vm4638_vm13, %v4637_v8, %v4632_v53 }
 0x335   : > { %v7582_v50 = vsel %vm4645_vm14, %v4644_v40, %v4639_v63 }
 0x33b   : > { %v4394_v43 = vpop.permute.xlu1 %4393  ;;  %v4397_v4 = vpop.permute.xlu0 %4396 }
 0x33c   : > { %v4650_v31 = vrot.slane %v4394_v43, %v7314_v13  ;;  %v4654_v55 = vrot.slane %v4397_v4, %v7331_v37 }
 0x33e   : > { %v4655_v3 = vsel %vm4547_vm0, %v4654_v55, %v4650_v31 }
 0x343   : > { %v4403_v57 = vpop.permute.xlu0 %4402 }
 0x344   : > { %v4664_v30 = vrot.slane %v4403_v57, %v7345_v29 }
 0x346   : > { %v4400_v23 = vpop.permute.xlu1 %4399 }
 0x347   : > { %v4659_v34 = vrot.slane %v4400_v23, %v7354_v46 }
 0x349   : > { %v4660_v21 = vsel %vm4554_vm1, %v4659_v34, %v4655_v3 }
 0x34a   : > { %v4665_v45 = vsel %vm4561_vm2, %v4664_v30, %v4660_v21 }
 0x34e   : > { %v4406_v10 = vpop.permute.xlu1 %4405  ;;  %v4409_v56 = vpop.permute.xlu0 %4408 }
 0x34f   : > { %v4669_v48 = vrot.slane %v4406_v10, %v7400_v61  ;;  %v4674_v28 = vrot.slane %v4409_v56, %v7403_v35 }
 0x351   : > { %v4670_v11 = vsel %vm4568_vm3, %v4669_v48, %v4665_v45 }
 0x352   : > { %v4675_v2 = vsel %vm4575_vm4, %v4674_v28, %v4670_v11  ;;  %v4412_v38 = vpop.permute.xlu1 %4411  ;;  %v4415_v32 = vpop.permute.xlu0 %4414 }
 0x353   : > { %v4679_v18 = vrot.slane %v4412_v38, %v7448_v52  ;;  %v4684_v22 = vrot.slane %v4415_v32, %v7451_v24 }
 0x355   : > { %v4680_v49 = vsel %vm4582_vm5, %v4679_v18, %v4675_v2 }
 0x356   : > { %v4685_v9 = vsel %vm4589_vm6, %v4684_v22, %v4680_v49 }
 0x35a   : > { %v4418_v39 = vpop.permute.xlu1 %4417  ;;  %v4421_v62 = vpop.permute.xlu0 %4420 }
 0x35b   : > { %v4689_v47 = vrot.slane %v4418_v39, %v7501_v6  ;;  %v4694_v58 = vrot.slane %v4421_v62, %v7495_v33 }
 0x35d   : > { %v4690_v1 = vsel %vm4596_vm7, %v4689_v47, %v4685_v9 }
 0x35e   : > { %v4695_v25 = vsel %vm4603_vm8, %v4694_v58, %v4690_v1  ;;  %v4424_v12 = vpop.permute.xlu1 %4423  ;;  %v4427_v5 = vpop.permute.xlu0 %4426 }
 0x35f   : > { %v4699_v16 = vrot.slane %v4424_v12, %v7529_v26  ;;  %v4704_v17 = vrot.slane %v4427_v5, %v7532_v59 }
 0x361   : > { %v4700_v41 = vsel %vm4610_vm9, %v4699_v16, %v4695_v25 }
 0x362   : > { %v4705_v54 = vsel %vm4617_vm10, %v4704_v17, %v4700_v41  ;;  %v4433_v14 = vpop.permute.xlu0 %4432 }
 0x363   : > { %v4430_v60 = vpop.permute.xlu1 %4429  ;;  %v4714_v51 = vrot.slane %v4433_v14, %v7562_v36 }
 0x364   : > { %v4709_v44 = vrot.slane %v4430_v60, %v7559_v20 }
 0x366   : > { %v4710_v42 = vsel %vm4624_vm11, %v4709_v44, %v4705_v54  ;;  %v4439_v7 = vpop.permute.xlu0 %4438 }
 0x367   : > { %v4715_v27 = vsel %vm4631_vm12, %v4714_v51, %v4710_v42  ;;  %v4436_v53 = vpop.permute.xlu1 %4435  ;;  %v4724_v8 = vrot.slane %v4439_v7, %v7576_v0 }
 0x368   : > { %v4719_v19 = vrot.slane %v4436_v53, %v7573_v15 }
 0x36a   : > { %v4720_v40 = vsel %vm4638_vm13, %v4719_v19, %v4715_v27 }
 0x36b   : > { %v7615_v63 = vsel %vm4645_vm14, %v4724_v8, %v4720_v40 }
 0x36c   : > { %v4442_v43 = vpop.permute.xlu1 %4441  ;;  %v4445_v4 = vpop.permute.xlu0 %4444 }
 0x36d   : > { %v4729_v49 = vrot.slane %v4442_v43, %v7314_v13  ;;  %v4733_v9 = vrot.slane %v4445_v4, %v7331_v37 }
 0x36f   : > { %v4734_v5 = vsel %vm4547_vm0, %v4733_v9, %v4729_v49 }
 0x371   : > { %v4448_v31 = vpop.permute.xlu1 %4447  ;;  %v4451_v55 = vpop.permute.xlu0 %4450 }
 0x372   : > { %v4738_v62 = vrot.slane %v4448_v31, %v7354_v46  ;;  %v4743_v16 = vrot.slane %v4451_v55, %v7345_v29 }
 0x374   : > { %v4739_v17 = vsel %vm4554_vm1, %v4738_v62, %v4734_v5 }
 0x375   : > { %v4454_v3 = vpop.permute.xlu1 %4453  ;;  %v4457_v57 = vpop.permute.xlu0 %4456  ;;  %v4744_v44 = vsel %vm4561_vm2, %v4743_v16, %v4739_v17 }
 0x376   : > { %v4753_v51 = vrot.slane %v4457_v57, %v7403_v35 }
 0x379   : > { %v4460_v23 = vpop.permute.xlu1 %4459  ;;  %v4463_v30 = vpop.permute.xlu0 %4462 }
 0x37a   : > { %v4758_v42 = vrot.slane %v4460_v23, %v7448_v52  ;;  %v4763_v43 = vrot.slane %v4463_v30, %v7451_v24 }
 0x37d   : > { %v4466_v34 = vpop.permute.xlu1 %4465  ;;  %v7617_v21 = vpop.permute.xlu0 %4468 }
 0x37e   : > { %v4768_v4 = vrot.slane %v4466_v34, %v7501_v6 }
 0x381   : > { %v7619_v45 = vpop.permute.xlu1 %4471  ;;  %v4490_v10 = vpop.permute.xlu0 %4489 }
 0x382   : > { %v4808_v39 = vrot.slane %v4490_v10, %v7314_v13  ;;  %v4778_v34 = vrot.slane %v7619_v45, %v7529_v26 }
 0x385   : > { %v4493_v56 = vpop.permute.xlu1 %4492  ;;  %v4496_v48 = vpop.permute.xlu0 %4495 }
 0x386   : > { %v4812_v32 = vrot.slane %v4493_v56, %v7331_v37  ;;  %v4817_v47 = vrot.slane %v4496_v48, %v7354_v46  ;;  %v4748_v37 = vrot.slane %v4454_v3, %v7400_v61 }
 0x388   : > { %v4813_v58 = vsel %vm4547_vm0, %v4812_v32, %v4808_v39 }
 0x389   : > { %v4499_v28 = vpop.permute.xlu1 %4498  ;;  %v4502_v11 = vpop.permute.xlu0 %4501  ;;  %v4818_v13 = vsel %vm4554_vm1, %v4817_v47, %v4813_v58 }
 0x38a   : > { %v4822_v1 = vrot.slane %v4499_v28, %v7345_v29  ;;  %v4827_v41 = vrot.slane %v4502_v11, %v7400_v61  ;;  %v4749_v29 = vsel %vm4568_vm3, %v4748_v37, %v4744_v44 }
 0x38b   : > { %v4754_v40 = vsel %vm4575_vm4, %v4753_v51, %v4749_v29 }
 0x38c   : > { %v4823_v46 = vsel %vm4561_vm2, %v4822_v1, %v4818_v13 }
 0x38d   : > { %v4505_v2 = vpop.permute.xlu1 %4504  ;;  %v4508_v38 = vpop.permute.xlu0 %4507  ;;  %v4828_v27 = vsel %vm4568_vm3, %v4827_v41, %v4823_v46 }
 0x38e   : > { %v4832_v54 = vrot.slane %v4505_v2, %v7403_v35  ;;  %v4837_v53 = vrot.slane %v4508_v38, %v7448_v52  ;;  %v4759_v35 = vsel %vm4582_vm5, %v4758_v42, %v4754_v40 }
 0x38f   : > { %v4764_v10 = vsel %vm4589_vm6, %v4763_v43, %v4759_v35 }
 0x390   : > { %v4833_v61 = vsel %vm4575_vm4, %v4832_v54, %v4828_v27  ;;  %v4769_v30 = vsel %vm4596_vm7, %v4768_v4, %v4764_v10 }
 0x391   : > { %v4511_v18 = vpop.permute.xlu1 %4510  ;;  %v4514_v22 = vpop.permute.xlu0 %4513  ;;  %v4838_v31 = vsel %vm4582_vm5, %v4837_v53, %v4833_v61 }
 0x392   : > { %v4842_v7 = vrot.slane %v4511_v18, %v7451_v24  ;;  %v4847_v55 = vrot.slane %v4514_v22, %v7501_v6  ;;  %v4773_v24 = vrot.slane %v7617_v21, %v7495_v33 }
 0x394   : > { %v4843_v52 = vsel %vm4589_vm6, %v4842_v7, %v4838_v31  ;;  %v4774_v32 = vsel %vm4603_vm8, %v4773_v24, %v4769_v30 }
 0x395   : > { %v4517_v25 = vpop.permute.xlu1 %4516  ;;  %v4520_v12 = vpop.permute.xlu0 %4519  ;;  %v4848_v56 = vsel %vm4596_vm7, %v4847_v55, %v4843_v52 }
 0x396   : > { %v4852_v3 = vrot.slane %v4517_v25, %v7495_v33  ;;  %v4857_v6 = vrot.slane %v4520_v12, %v7529_v26  ;;  %v4779_v26 = vsel %vm4610_vm9, %v4778_v34, %v4774_v32 }
 0x398   : > { %v4853_v48 = vsel %vm4603_vm8, %v4852_v3, %v4848_v56 }
 0x399   : > { %v4475_v60 = vpop.permute.xlu1 %4474  ;;  %v4523_v14 = vpop.permute.xlu0 %4522  ;;  %v4858_v22 = vsel %vm4610_vm9, %v4857_v6, %v4853_v48 }
 0x39a   : > { %v4783_v28 = vrot.slane %v4475_v60, %v7532_v59  ;;  %v4862_v11 = vrot.slane %v4523_v14, %v7532_v59 }
 0x39c   : > { %v4863_v9 = vsel %vm4617_vm10, %v4862_v11, %v4858_v22 }
 0x39d   : > { %v4478_v19 = vpop.permute.xlu1 %4477  ;;  %v4526_v8 = vpop.permute.xlu0 %4525 }
 0x39e   : > { %v4788_v2 = vrot.slane %v4478_v19, %v7559_v20  ;;  %v4867_v38 = vrot.slane %v4526_v8, %v7559_v20  ;;  %v4784_v20 = vsel %vm4617_vm10, %v4783_v28, %v4779_v26 }
 0x3a0   : > { %v4789_v39 = vsel %vm4624_vm11, %v4788_v2, %v4784_v20  ;;  %v4868_v62 = vsel %vm4624_vm11, %v4867_v38, %v4863_v9 }
 0x3a1   : > { %v4481_v57 = vpop.permute.xlu1 %4480  ;;  %v4529_v23 = vpop.permute.xlu0 %4528 }
 0x3a2   : > { %v4793_v45 = vrot.slane %v4481_v57, %v7562_v36  ;;  %v4872_v18 = vrot.slane %v4529_v23, %v7562_v36 }
 0x3a4   : > { %v4794_v58 = vsel %vm4631_vm12, %v4793_v45, %v4789_v39  ;;  %v4873_v1 = vsel %vm4631_vm12, %v4872_v18, %v4868_v62 }
 0x3a5   : > { %v4484_v33 = vpop.permute.xlu1 %4483  ;;  %v4532_v21 = vpop.permute.xlu0 %4531 }
 0x3a6   : > { %v4798_v59 = vrot.slane %v4484_v33, %v7573_v15  ;;  %v4877_v49 = vrot.slane %v4532_v21, %v7573_v15 }
 0x3a8   : > { %v4799_v12 = vsel %vm4638_vm13, %v4798_v59, %v4794_v58  ;;  %v4878_v5 = vsel %vm4638_vm13, %v4877_v49, %v4873_v1 }
 0x3a9   : > { %v4487_v47 = vpop.permute.xlu1 %4486  ;;  %v4535_v36 = vpop.permute.xlu0 %4534 }
 0x3aa   : > { %v4803_v25 = vrot.slane %v4487_v47, %v7576_v0  ;;  %v4882_v15 = vrot.slane %v4535_v36, %v7576_v0 }
 0x3ac   : > { %v4804_v16 = vsel %vm4645_vm14, %v4803_v25, %v4799_v12  ;;  %v4883_v17 = vsel %vm4645_vm14, %v4882_v15, %v4878_v5 }
 0x3ad   : > { %v4885_v37 = vsel %vm4884_vm15, %v4804_v16, %v7582_v50  ;;  %v4886_v13 = vsel %vm4884_vm15, %v4883_v17, %v7615_v63 }
 0x3ae   : > { %v4887_v41 = vcombine.low %v4885_v37, %v4886_v13 }
 0x3b0   : > { %5073 = vst.sshfl [vmem:[%s378_s17] sm:$0x33 pattern:$0x76325410] %v4887_v41 }
 0x3b1   : > { %5202 = shalt.err (!%p5199_p0)
}
 0x3b2   : > { %s5203_s29 = scalar_lea.hbm %s7692_s30, 64  ;;  %s5207_s16 = scalar_lea.hbm %s7746_s5, 128 }
 0x3b3   : > { %p5204_p2 = scmp.ne.s32.totalorder %s7692_s30, %s5203_s29  ;;  %p5208_p12 = scmp.lt.u32.totalorder %s7692_s30, %s7746_s5 }
 0x3b4   : > { %p5209_p8 = scmp.lt.u32.totalorder %s5207_s16, %s5203_s29  ;;  %p5211_p9 = scmp.lt.u32.totalorder %s5203_s29, %s7692_s30 }
 0x3b5   : > { %p5205_p1 = pnand %p5204_p2, %p8473_p11 }
 0x3b6   : > { %p5210_p4 = por %p5209_p8, %p5208_p12 }
 0x3b7   : > { %p5206_p3 = pneg %p5205_p1 }
 0x3b8   : > { %p5212_p5 = por %p5211_p9, %p5210_p4 }
 0x3ba   : > { %p5213_p6 = pnand %p5212_p5, %p5206_p3 }
 0x3bc   : > { %5216 = shalt.err (!%p5213_p6)
}
 0x3bd   : > { %5094 = dma.vmem_to_hbm [thread:$0]  (%p8473_p11), %s7694_s26, 64, %s7692_s30, %s4898_s21  }
 0x3be PF: > { %s4926_s24 = sand.u32 1, %s5255_s18   ;;  %p8474_p7 = scmp.ne.s32.totalorder %s7920_s8, 0 }
 0x3bf   : > { %p8475_p10 = scmp.ge.s32.totalorder %s5275_s23, 2  ;;  %s4927_s14 = scalar_lea.sflag [#allocation5], %s4926_s24 }
 0x3c1   : > { %p5097_p13 = pnand %p8475_p10, %p8474_p7 }
 0x3c3   : > { %5250 = dma.done.wait (!%p5097_p13), %s4927_s14, 64  }
 0x3c4   : > { %5252 = vsyncadd (!%p5097_p13), %s4927_s14, 4294967232  ;;  %s24_s23 = sadd.s32 1, %s5275_s23   ;;  %s8476_s6 = sld [smem:[#allocation15_spill]] }
 0x3c5   : > { %p21_p0 = scmp.ge.s32.totalorder %s24_s23, 4   ;;  %s8477_s18 = smov %s5259_s19 }
 0x3c6   : > { %s8478_s19 = smov %s5263_s20  ;;  %s8479_s20 = smov %s5373_s7 }
 0x3c7   : > { %s8480_s21 = smov %s5271_s22  ;;  %23 = sbr.rel (!%p21_p0) target bundleno = 10 (0xa), region = 120 }
 0x3ca   : > { %s8481_s22 = smov %s8476_s6 }
 0x3ce   :  { %4932 = vsyncpa [#allocation4], 1 }
 0x3cf   :  { %4934 = vsyncpa [#allocation4 + $0x1], 1 }
 0x3d0   :  { %4935 = vsyncpa [#allocation7], 1 }
 0x3d1   :  { %4937 = vsyncpa [#allocation7 + $0x1], 1 }
 0x3d2   :  { %4938 = vsyncpa [#allocation5], 1 }
 0x3d3   :  { %4940 = vsyncpa [#allocation5 + $0x1], 1 }

</bundles_post_ra>
